<compile_context>
chip_gen: v6e
topology: v6e:2x2x1
jax: 0.10.0
libtpu: 0.0.40
codegen_flags: <defaults>
</compile_context>

<pallas_src>
import functools

import jax
import jax.numpy as jnp
from jax.experimental import pallas as pl
from jax.experimental.pallas import tpu as pltpu

BN_EPS = 1e-5


# ------------------------------- Pallas kernel ---------------------------------

def _slowfast_seg_kernel(xs_ref, xf_ref, wf_ref, bf_ref, wsf_ref, wfast_ref, bh_ref,
                         o_ref, *, alpha, fusion_kernel, t_slow, t_head, c_slow):
    """One grid step = one (sample, spatial row-tile) slab.

    xs_ref    : (1, T_s,   hw, C_s)        slow pathway, channels-last
    xf_ref    : (1, T_pad, hw, C_f)        fast pathway, zero-padded in time, channels-last
    wf_ref    : (k, C_f, C_fuse)           conv_f2s weight with BN folded in
    bf_ref    : (1, C_fuse)                folded BN bias
    wsf_ref   : (alpha, C_s + C_fuse, nc)  head weights for the slow "pool view",
                                           one table per phase q = t_out // T_s
    wfast_ref : (C_f, nc)                  head weights for the fast channels
    bh_ref    : (1, nc)                    head bias
    o_ref     : (1, T_head, hw, nc)        softmax output, already in final layout
    """
    k = fusion_kernel
    pad = k // 2

    # --- FuseFastToSlow: Conv3d([k,1,1], stride=[alpha,1,1]) + folded BN + ReLU ------
    # Temporal taps accumulated in-kernel: no im2col materialization in HBM.
    fuse = []
    for t in range(t_slow):                        # static unroll -> all indices static
        acc = jnp.dot(xf_ref[0, t * alpha], wf_ref[0],
                      preferred_element_type=jnp.float32)
        for kt in range(1, k):
            acc = acc + jnp.dot(xf_ref[0, t * alpha + kt], wf_ref[kt],
                                preferred_element_type=jnp.float32)
        fuse.append(jnp.maximum(acc + bf_ref[...], 0.0))        # (hw, C_fuse)

    # --- ResNetSegHead: pool "view" + concat + Linear + Softmax ----------------------
    # Output time t2 reads slow/fuse time t2 % T_s with channel phase q = t2 // T_s
    # (the phase-dependent channel interleave is pre-folded into wsf_ref[q]) and the
    # fast pathway at time t2 (offset by the conv padding in xf_ref).
    for t2 in range(t_head):                       # static unroll
        q, t = t2 // t_slow, t2 % t_slow
        w_sf = wsf_ref[q]                          # (C_s + C_fuse, nc)
        logits = jnp.dot(xs_ref[0, t], w_sf[:c_slow],
                         preferred_element_type=jnp.float32)
        logits = logits + jnp.dot(fuse[t], w_sf[c_slow:],
                                  preferred_element_type=jnp.float32)
        logits = logits + jnp.dot(xf_ref[0, pad + t2], wfast_ref[...],
                                  preferred_element_type=jnp.float32)
        logits = logits + bh_ref[...]
        m = jnp.max(logits, axis=-1, keepdims=True)
        e = jnp.exp(logits - m)
        s = jnp.sum(e, axis=-1, keepdims=True)
        r = pl.reciprocal(s, approx=True)          # EUP slot (free vs. VALU)
        r = r * (2.0 - s * r)                      # one Newton step -> f32-tight softmax
        o_ref[0, t2] = (e * r).astype(o_ref.dtype)


# ------------------------------- host wrapper -----------------------------------

def _pick_hw_tile(hw, cap=4096):
    """Whole frame if it fits comfortably; otherwise the largest /8 divisor <= cap."""
    if hw <= cap:
        return hw
    for t in range(cap, 7, -1):
        if hw % t == 0 and t % 8 == 0:
            return t
    return hw


def slowfast_seg_forward(x, params, cfg):
    x_s, x_f = x
    alpha = cfg["ALPHA"]
    k = cfg["FUSION_KERNEL_SZ"]
    pad = k // 2

    N, C_s, T_s, H, W = x_s.shape
    N_f, C_f, T_f, H_f, W_f = x_f.shape
    assert (N_f, H_f, W_f) == (N, H, W)
    assert T_f == T_s * alpha, "SlowFast pathways must satisfy T_fast = ALPHA * T_slow"
    T_out = (T_f + 2 * pad - k) // alpha + 1
    assert T_out == T_s

    conv_w = params["fuse"]["conv_w"]                        # (C_fuse, C_f, k, 1, 1)
    C_fuse = conv_w.shape[0]
    C_sf = C_s + C_fuse
    assert C_s % alpha == 0 and C_fuse % alpha == 0
    T_head = T_s * alpha
    HW = H * W

    # --- fold eval-mode BatchNorm3d into the conv weight / bias (one-time, host) -----
    scale = params["fuse"]["bn_gamma"] * jax.lax.rsqrt(params["fuse"]["bn_var"] + BN_EPS)
    w_fuse = jnp.transpose(conv_w[:, :, :, 0, 0], (2, 1, 0)) * scale[None, None, :]  # (k, C_f, C_fuse)
    b_fuse = (params["fuse"]["bn_beta"] - params["fuse"]["bn_mean"] * scale).reshape(1, C_fuse)

    # --- fold the head "pool view" channel interleave into per-phase weight tables ---
    # slow-view channel c2 at output time t2 reads x_s_fuse channel c2*alpha + t2//T_s,
    # so W_sf[q][c_old] = proj_w[:, c_old // alpha] iff c_old % alpha == q, else 0.
    proj_w = params["head"]["proj_w"]                        # (nc, C_sf//alpha + C_f)
    nc = proj_w.shape[0]
    n_slow_view = C_sf // alpha
    assert proj_w.shape[1] == n_slow_view + C_f
    wp_t = proj_w.T                                          # (n_slow_view + C_f, nc)
    c_old = jnp.arange(C_sf)
    phase = (c_old[None, :] % alpha) == jnp.arange(alpha)[:, None]            # (alpha, C_sf)
    w_sf_all = jnp.where(phase[:, :, None], wp_t[c_old // alpha][None], 0.0)  # (alpha, C_sf, nc)
    w_fast = wp_t[n_slow_view:]                              # (C_f, nc)
    b_head = params["head"]["proj_b"].reshape(1, nc)

    # --- activations channels-last, fast pathway zero-padded along time --------------
    xs_cl = jnp.transpose(x_s, (0, 2, 3, 4, 1)).reshape(N, T_s, HW, C_s)
    xf_cl = jnp.transpose(x_f, (0, 2, 3, 4, 1)).reshape(N, T_f, HW, C_f)
    xf_pad = jnp.pad(xf_cl, ((0, 0), (pad, pad), (0, 0), (0, 0)))
    T_pad = T_f + 2 * pad

    hw_tile = _pick_hw_tile(HW)
    grid = (N, HW // hw_tile)

    kernel = functools.partial(
        _slowfast_seg_kernel, alpha=alpha, fusion_kernel=k,
        t_slow=T_s, t_head=T_head, c_slow=C_s)

    out = pl.pallas_call(
        kernel,
        out_shape=jax.ShapeDtypeStruct((N, T_head, HW, nc), jnp.float32),
        grid_spec=pltpu.PrefetchScalarGridSpec(
            num_scalar_prefetch=0,
            grid=grid,
            in_specs=[
                pl.BlockSpec((1, T_s, hw_tile, C_s), lambda n, s: (n, 0, s, 0)),
                pl.BlockSpec((1, T_pad, hw_tile, C_f), lambda n, s: (n, 0, s, 0)),
                pl.BlockSpec((k, C_f, C_fuse), lambda n, s: (0, 0, 0)),
                pl.BlockSpec((1, C_fuse), lambda n, s: (0, 0)),
                pl.BlockSpec((alpha, C_sf, nc), lambda n, s: (0, 0, 0)),
                pl.BlockSpec((C_f, nc), lambda n, s: (0, 0)),
                pl.BlockSpec((1, nc), lambda n, s: (0, 0)),
            ],
            out_specs=pl.BlockSpec((1, T_head, hw_tile, nc), lambda n, s: (n, 0, s, 0)),
        ),
        compiler_params=pltpu.CompilerParams(
            dimension_semantics=("parallel", "parallel"),   # shard over 2 TCs on v7x
            vmem_limit_bytes=32 * 1024 * 1024,              # safe on v5e/v6e/v7x
        ),
    )(xs_cl, xf_pad, w_fuse, b_fuse, w_sf_all, w_fast, b_head)

    # pathway{0,1}_pool are MaxPool3d([1,1,1]) for ARCH='slowfast' -> identity (no-op).
    return out.reshape(N, T_head, H, W, nc)


# ------------------------------ reference (jnp) ---------------------------------

def reference_forward(x, params, cfg):
    x_s, x_f = x
    k = cfg["FUSION_KERNEL_SZ"]
    alpha = cfg["ALPHA"]
    pad = k // 2
    fuse = jax.lax.conv_general_dilated(
        x_f, params["fuse"]["conv_w"],
        window_strides=(alpha, 1, 1),
        padding=[(pad, pad), (0, 0), (0, 0)],
        dimension_numbers=("NCDHW", "OIDHW", "NCDHW"),
    )
    g = params["fuse"]["bn_gamma"][None, :, None, None, None]
    b = params["fuse"]["bn_beta"][None, :, None, None, None]
    m = params["fuse"]["bn_mean"][None, :, None, None, None]
    v = params["fuse"]["bn_var"][None, :, None, None, None]
    fuse = (fuse - m) * jax.lax.rsqrt(v + BN_EPS) * g + b
    fuse = jnp.maximum(fuse, 0.0)
    x_s = jnp.concatenate([x_s, fuse], axis=1)

    N, C_sf, T_s, H, W = x_s.shape
    x_s = x_s.reshape(N, C_sf // alpha, T_s * alpha, H, W)
    xc = jnp.concatenate([x_s, x_f], axis=1)
    xc = jnp.transpose(xc, (0, 2, 3, 4, 1))
    logits = jnp.einsum("nthwc,kc->nthwk", xc, params["head"]["proj_w"]) + params["head"]["proj_b"]
    return jax.nn.softmax(logits, axis=-1)


# ----------------------------------- main ---------------------------------------

if __name__ == "__main__":
    cfg = {"ALPHA": 4, "BETA_INV": 4, "FUSION_CONV_CHANNEL_RATIO": 2, "FUSION_KERNEL_SZ": 5}

    # Small, internally consistent shapes (fast has ALPHA x more frames than slow).
    N, H, W = 2, 8, 8
    T_slow, T_fast = 2, 8
    C_slow, C_fast = 32, 8                                   # C_fast = C_slow // BETA_INV
    C_fuse_out = C_fast * cfg["FUSION_CONV_CHANNEL_RATIO"]
    num_classes = 16
    C_head_in = (C_slow + C_fuse_out) // cfg["ALPHA"] + C_fast   # sum(dim_in) of Linear

    key = jax.random.PRNGKey(0)
    k_conv, k_proj, k_xs, k_xf = jax.random.split(key, 4)

    arange_f = jnp.arange(C_fuse_out, dtype=jnp.float32)
    params = {
        "fuse": {
            "conv_w": jax.random.normal(
                k_conv, (C_fuse_out, C_fast, cfg["FUSION_KERNEL_SZ"], 1, 1), jnp.float32
            ) * 0.05,
            # eval-mode BatchNorm3d stats/affine (non-trivial, deterministic -> exercises the fold)
            "bn_gamma": 1.0 + 0.1 * arange_f / C_fuse_out,
            "bn_beta": 0.05 * arange_f / C_fuse_out,
            "bn_mean": 0.02 * arange_f / C_fuse_out,
            "bn_var": 1.0 + 0.5 * arange_f / C_fuse_out,
        },
        "head": {
            # init_helper.init_weights: fc ~ N(0, FC_INIT_STD), bias = 0
            "proj_w": jax.random.normal(k_proj, (num_classes, C_head_in), jnp.float32) * 0.01,
            "proj_b": jnp.zeros((num_classes,), jnp.float32),
        },
    }

    x_slow = jax.random.normal(k_xs, (N, C_slow, T_slow, H, W), jnp.float32)
    x_fast = jax.random.normal(k_xf, (N, C_fast, T_fast, H, W), jnp.float32)

    fwd = jax.jit(lambda xs, xf, p: slowfast_seg_forward([xs, xf], p, cfg))
    out = jax.block_until_ready(fwd(x_slow, x_fast, params))

    ref = reference_forward([x_slow, x_fast], params, cfg)
    assert out.shape == (N, T_fast, H, W, num_classes), out.shape
    assert jnp.allclose(jnp.sum(out, axis=-1), 1.0, atol=1e-3)
    assert jnp.allclose(out, ref, atol=1e-3, rtol=1e-3)

    print("KERNEL_OK")
</pallas_src>

<mosaic_0001>
module attributes {stable_mosaic.version = 11 : i64} {
  func.func @_slowfast_seg_kernel(%arg0: i32, %arg1: i32, %arg2: memref<1x2x64x32xf32, #tpu.memory_space<vmem>>, %arg3: memref<1x12x64x8xf32, #tpu.memory_space<vmem>>, %arg4: memref<5x8x16xf32, #tpu.memory_space<vmem>>, %arg5: memref<1x16xf32, #tpu.memory_space<vmem>>, %arg6: memref<4x48x16xf32, #tpu.memory_space<vmem>>, %arg7: memref<8x16xf32, #tpu.memory_space<vmem>>, %arg8: memref<1x16xf32, #tpu.memory_space<vmem>>, %arg9: memref<1x8x64x16xf32, #tpu.memory_space<vmem>>) attributes {dimension_semantics = [#tpu.dimension_semantics<parallel>, #tpu.dimension_semantics<parallel>], iteration_bounds = array<i64: 2, 1>, scalar_prefetch = 0 : i64, scratch_operands = 0 : i64, tpu.core_type = #tpu.core_type<tc>, window_params = [{transform_indices = @transform_0, window_bounds = array<i64: 1, 2, 64, 32>}, {transform_indices = @transform_1, window_bounds = array<i64: 1, 12, 64, 8>}, {pipeline_mode = #tpu.pipeline_mode<synchronous>, transform_indices = @transform_2, window_bounds = array<i64: 5, 8, 16>}, {pipeline_mode = #tpu.pipeline_mode<synchronous>, transform_indices = @transform_3, window_bounds = array<i64: 1, 16>}, {pipeline_mode = #tpu.pipeline_mode<synchronous>, transform_indices = @transform_4, window_bounds = array<i64: 4, 48, 16>}, {pipeline_mode = #tpu.pipeline_mode<synchronous>, transform_indices = @transform_5, window_bounds = array<i64: 8, 16>}, {pipeline_mode = #tpu.pipeline_mode<synchronous>, transform_indices = @transform_6, window_bounds = array<i64: 1, 16>}, {transform_indices = @transform_7, window_bounds = array<i64: 1, 8, 64, 16>}]} {
    %c0 = arith.constant 0 : index
    %c0_0 = arith.constant 0 : index
    %c0_1 = arith.constant 0 : index
    %c0_2 = arith.constant 0 : index
    %0 = vector.load %arg3[%c0, %c0_0, %c0_1, %c0_2] : memref<1x12x64x8xf32, #tpu.memory_space<vmem>>, vector<1x1x64x8xf32>
    %1 = vector.shape_cast %0 : vector<1x1x64x8xf32> to vector<64x8xf32>
    %c0_3 = arith.constant 0 : index
    %c0_4 = arith.constant 0 : index
    %c0_5 = arith.constant 0 : index
    %2 = vector.load %arg4[%c0_3, %c0_4, %c0_5] : memref<5x8x16xf32, #tpu.memory_space<vmem>>, vector<1x8x16xf32>
    %3 = vector.shape_cast %2 : vector<1x8x16xf32> to vector<8x16xf32>
    %cst = arith.constant dense<0.000000e+00> : vector<64x16xf32>
    %4 = tpu.matmul %1, %3, %cst {dimension_numbers = #tpu.dot_dimension_numbers<[1], [0], [0], [1], [0, 0, 1, 1], [], []>} : vector<64x8xf32>, vector<8x16xf32>, vector<64x16xf32> -> vector<64x16xf32>
    %c0_6 = arith.constant 0 : index
    %c1 = arith.constant 1 : index
    %c0_7 = arith.constant 0 : index
    %c0_8 = arith.constant 0 : index
    %5 = vector.load %arg3[%c0_6, %c1, %c0_7, %c0_8] : memref<1x12x64x8xf32, #tpu.memory_space<vmem>>, vector<1x1x64x8xf32>
    %6 = vector.shape_cast %5 : vector<1x1x64x8xf32> to vector<64x8xf32>
    %c1_9 = arith.constant 1 : index
    %c0_10 = arith.constant 0 : index
    %c0_11 = arith.constant 0 : index
    %7 = vector.load %arg4[%c1_9, %c0_10, %c0_11] : memref<5x8x16xf32, #tpu.memory_space<vmem>>, vector<1x8x16xf32>
    %8 = vector.shape_cast %7 : vector<1x8x16xf32> to vector<8x16xf32>
    %cst_12 = arith.constant dense<0.000000e+00> : vector<64x16xf32>
    %9 = tpu.matmul %6, %8, %cst_12 {dimension_numbers = #tpu.dot_dimension_numbers<[1], [0], [0], [1], [0, 0, 1, 1], [], []>} : vector<64x8xf32>, vector<8x16xf32>, vector<64x16xf32> -> vector<64x16xf32>
    %10 = arith.addf %4, %9 : vector<64x16xf32>
    %c0_13 = arith.constant 0 : index
    %c2 = arith.constant 2 : index
    %c0_14 = arith.constant 0 : index
    %c0_15 = arith.constant 0 : index
    %11 = vector.load %arg3[%c0_13, %c2, %c0_14, %c0_15] : memref<1x12x64x8xf32, #tpu.memory_space<vmem>>, vector<1x1x64x8xf32>
    %12 = vector.shape_cast %11 : vector<1x1x64x8xf32> to vector<64x8xf32>
    %c2_16 = arith.constant 2 : index
    %c0_17 = arith.constant 0 : index
    %c0_18 = arith.constant 0 : index
    %13 = vector.load %arg4[%c2_16, %c0_17, %c0_18] : memref<5x8x16xf32, #tpu.memory_space<vmem>>, vector<1x8x16xf32>
    %14 = vector.shape_cast %13 : vector<1x8x16xf32> to vector<8x16xf32>
    %cst_19 = arith.constant dense<0.000000e+00> : vector<64x16xf32>
    %15 = tpu.matmul %12, %14, %cst_19 {dimension_numbers = #tpu.dot_dimension_numbers<[1], [0], [0], [1], [0, 0, 1, 1], [], []>} : vector<64x8xf32>, vector<8x16xf32>, vector<64x16xf32> -> vector<64x16xf32>
    %16 = arith.addf %10, %15 : vector<64x16xf32>
    %c0_20 = arith.constant 0 : index
    %c3 = arith.constant 3 : index
    %c0_21 = arith.constant 0 : index
    %c0_22 = arith.constant 0 : index
    %17 = vector.load %arg3[%c0_20, %c3, %c0_21, %c0_22] : memref<1x12x64x8xf32, #tpu.memory_space<vmem>>, vector<1x1x64x8xf32>
    %18 = vector.shape_cast %17 : vector<1x1x64x8xf32> to vector<64x8xf32>
    %c3_23 = arith.constant 3 : index
    %c0_24 = arith.constant 0 : index
    %c0_25 = arith.constant 0 : index
    %19 = vector.load %arg4[%c3_23, %c0_24, %c0_25] : memref<5x8x16xf32, #tpu.memory_space<vmem>>, vector<1x8x16xf32>
    %20 = vector.shape_cast %19 : vector<1x8x16xf32> to vector<8x16xf32>
    %cst_26 = arith.constant dense<0.000000e+00> : vector<64x16xf32>
    %21 = tpu.matmul %18, %20, %cst_26 {dimension_numbers = #tpu.dot_dimension_numbers<[1], [0], [0], [1], [0, 0, 1, 1], [], []>} : vector<64x8xf32>, vector<8x16xf32>, vector<64x16xf32> -> vector<64x16xf32>
    %22 = arith.addf %16, %21 : vector<64x16xf32>
    %c0_27 = arith.constant 0 : index
    %c4 = arith.constant 4 : index
    %c0_28 = arith.constant 0 : index
    %c0_29 = arith.constant 0 : index
    %23 = vector.load %arg3[%c0_27, %c4, %c0_28, %c0_29] : memref<1x12x64x8xf32, #tpu.memory_space<vmem>>, vector<1x1x64x8xf32>
    %24 = vector.shape_cast %23 : vector<1x1x64x8xf32> to vector<64x8xf32>
    %c4_30 = arith.constant 4 : index
    %c0_31 = arith.constant 0 : index
    %c0_32 = arith.constant 0 : index
    %25 = vector.load %arg4[%c4_30, %c0_31, %c0_32] : memref<5x8x16xf32, #tpu.memory_space<vmem>>, vector<1x8x16xf32>
    %26 = vector.shape_cast %25 : vector<1x8x16xf32> to vector<8x16xf32>
    %cst_33 = arith.constant dense<0.000000e+00> : vector<64x16xf32>
    %27 = tpu.matmul %24, %26, %cst_33 {dimension_numbers = #tpu.dot_dimension_numbers<[1], [0], [0], [1], [0, 0, 1, 1], [], []>} : vector<64x8xf32>, vector<8x16xf32>, vector<64x16xf32> -> vector<64x16xf32>
    %28 = arith.addf %22, %27 : vector<64x16xf32>
    %c0_34 = arith.constant 0 : index
    %c0_35 = arith.constant 0 : index
    %29 = vector.load %arg5[%c0_34, %c0_35] : memref<1x16xf32, #tpu.memory_space<vmem>>, vector<1x16xf32>
    %30 = vector.broadcast %29 : vector<1x16xf32> to vector<64x16xf32>
    %31 = arith.addf %28, %30 : vector<64x16xf32>
    %cst_36 = arith.constant 0.000000e+00 : f32
    %32 = vector.broadcast %cst_36 : f32 to vector<64x16xf32>
    %33 = arith.maximumf %31, %32 : vector<64x16xf32>
    %c0_37 = arith.constant 0 : index
    %c4_38 = arith.constant 4 : index
    %c0_39 = arith.constant 0 : index
    %c0_40 = arith.constant 0 : index
    %34 = vector.load %arg3[%c0_37, %c4_38, %c0_39, %c0_40] : memref<1x12x64x8xf32, #tpu.memory_space<vmem>>, vector<1x1x64x8xf32>
    %35 = vector.shape_cast %34 : vector<1x1x64x8xf32> to vector<64x8xf32>
    %c0_41 = arith.constant 0 : index
    %c0_42 = arith.constant 0 : index
    %c0_43 = arith.constant 0 : index
    %36 = vector.load %arg4[%c0_41, %c0_42, %c0_43] : memref<5x8x16xf32, #tpu.memory_space<vmem>>, vector<1x8x16xf32>
    %37 = vector.shape_cast %36 : vector<1x8x16xf32> to vector<8x16xf32>
    %cst_44 = arith.constant dense<0.000000e+00> : vector<64x16xf32>
    %38 = tpu.matmul %35, %37, %cst_44 {dimension_numbers = #tpu.dot_dimension_numbers<[1], [0], [0], [1], [0, 0, 1, 1], [], []>} : vector<64x8xf32>, vector<8x16xf32>, vector<64x16xf32> -> vector<64x16xf32>
    %c0_45 = arith.constant 0 : index
    %c5 = arith.constant 5 : index
    %c0_46 = arith.constant 0 : index
    %c0_47 = arith.constant 0 : index
    %39 = vector.load %arg3[%c0_45, %c5, %c0_46, %c0_47] : memref<1x12x64x8xf32, #tpu.memory_space<vmem>>, vector<1x1x64x8xf32>
    %40 = vector.shape_cast %39 : vector<1x1x64x8xf32> to vector<64x8xf32>
    %c1_48 = arith.constant 1 : index
    %c0_49 = arith.constant 0 : index
    %c0_50 = arith.constant 0 : index
    %41 = vector.load %arg4[%c1_48, %c0_49, %c0_50] : memref<5x8x16xf32, #tpu.memory_space<vmem>>, vector<1x8x16xf32>
    %42 = vector.shape_cast %41 : vector<1x8x16xf32> to vector<8x16xf32>
    %cst_51 = arith.constant dense<0.000000e+00> : vector<64x16xf32>
    %43 = tpu.matmul %40, %42, %cst_51 {dimension_numbers = #tpu.dot_dimension_numbers<[1], [0], [0], [1], [0, 0, 1, 1], [], []>} : vector<64x8xf32>, vector<8x16xf32>, vector<64x16xf32> -> vector<64x16xf32>
    %44 = arith.addf %38, %43 : vector<64x16xf32>
    %c0_52 = arith.constant 0 : index
    %c6 = arith.constant 6 : index
    %c0_53 = arith.constant 0 : index
    %c0_54 = arith.constant 0 : index
    %45 = vector.load %arg3[%c0_52, %c6, %c0_53, %c0_54] : memref<1x12x64x8xf32, #tpu.memory_space<vmem>>, vector<1x1x64x8xf32>
    %46 = vector.shape_cast %45 : vector<1x1x64x8xf32> to vector<64x8xf32>
    %c2_55 = arith.constant 2 : index
    %c0_56 = arith.constant 0 : index
    %c0_57 = arith.constant 0 : index
    %47 = vector.load %arg4[%c2_55, %c0_56, %c0_57] : memref<5x8x16xf32, #tpu.memory_space<vmem>>, vector<1x8x16xf32>
    %48 = vector.shape_cast %47 : vector<1x8x16xf32> to vector<8x16xf32>
    %cst_58 = arith.constant dense<0.000000e+00> : vector<64x16xf32>
    %49 = tpu.matmul %46, %48, %cst_58 {dimension_numbers = #tpu.dot_dimension_numbers<[1], [0], [0], [1], [0, 0, 1, 1], [], []>} : vector<64x8xf32>, vector<8x16xf32>, vector<64x16xf32> -> vector<64x16xf32>
    %50 = arith.addf %44, %49 : vector<64x16xf32>
    %c0_59 = arith.constant 0 : index
    %c7 = arith.constant 7 : index
    %c0_60 = arith.constant 0 : index
    %c0_61 = arith.constant 0 : index
    %51 = vector.load %arg3[%c0_59, %c7, %c0_60, %c0_61] : memref<1x12x64x8xf32, #tpu.memory_space<vmem>>, vector<1x1x64x8xf32>
    %52 = vector.shape_cast %51 : vector<1x1x64x8xf32> to vector<64x8xf32>
    %c3_62 = arith.constant 3 : index
    %c0_63 = arith.constant 0 : index
    %c0_64 = arith.constant 0 : index
    %53 = vector.load %arg4[%c3_62, %c0_63, %c0_64] : memref<5x8x16xf32, #tpu.memory_space<vmem>>, vector<1x8x16xf32>
    %54 = vector.shape_cast %53 : vector<1x8x16xf32> to vector<8x16xf32>
    %cst_65 = arith.constant dense<0.000000e+00> : vector<64x16xf32>
    %55 = tpu.matmul %52, %54, %cst_65 {dimension_numbers = #tpu.dot_dimension_numbers<[1], [0], [0], [1], [0, 0, 1, 1], [], []>} : vector<64x8xf32>, vector<8x16xf32>, vector<64x16xf32> -> vector<64x16xf32>
    %56 = arith.addf %50, %55 : vector<64x16xf32>
    %c0_66 = arith.constant 0 : index
    %c8 = arith.constant 8 : index
    %c0_67 = arith.constant 0 : index
    %c0_68 = arith.constant 0 : index
    %57 = vector.load %arg3[%c0_66, %c8, %c0_67, %c0_68] : memref<1x12x64x8xf32, #tpu.memory_space<vmem>>, vector<1x1x64x8xf32>
    %58 = vector.shape_cast %57 : vector<1x1x64x8xf32> to vector<64x8xf32>
    %c4_69 = arith.constant 4 : index
    %c0_70 = arith.constant 0 : index
    %c0_71 = arith.constant 0 : index
    %59 = vector.load %arg4[%c4_69, %c0_70, %c0_71] : memref<5x8x16xf32, #tpu.memory_space<vmem>>, vector<1x8x16xf32>
    %60 = vector.shape_cast %59 : vector<1x8x16xf32> to vector<8x16xf32>
    %cst_72 = arith.constant dense<0.000000e+00> : vector<64x16xf32>
    %61 = tpu.matmul %58, %60, %cst_72 {dimension_numbers = #tpu.dot_dimension_numbers<[1], [0], [0], [1], [0, 0, 1, 1], [], []>} : vector<64x8xf32>, vector<8x16xf32>, vector<64x16xf32> -> vector<64x16xf32>
    %62 = arith.addf %56, %61 : vector<64x16xf32>
    %c0_73 = arith.constant 0 : index
    %c0_74 = arith.constant 0 : index
    %63 = vector.load %arg5[%c0_73, %c0_74] : memref<1x16xf32, #tpu.memory_space<vmem>>, vector<1x16xf32>
    %64 = vector.broadcast %63 : vector<1x16xf32> to vector<64x16xf32>
    %65 = arith.addf %62, %64 : vector<64x16xf32>
    %cst_75 = arith.constant 0.000000e+00 : f32
    %66 = vector.broadcast %cst_75 : f32 to vector<64x16xf32>
    %67 = arith.maximumf %65, %66 : vector<64x16xf32>
    %c0_76 = arith.constant 0 : index
    %c0_77 = arith.constant 0 : index
    %c0_78 = arith.constant 0 : index
    %68 = vector.load %arg6[%c0_76, %c0_77, %c0_78] : memref<4x48x16xf32, #tpu.memory_space<vmem>>, vector<1x48x16xf32>
    %69 = vector.shape_cast %68 : vector<1x48x16xf32> to vector<48x16xf32>
    %c0_79 = arith.constant 0 : index
    %c0_80 = arith.constant 0 : index
    %c0_81 = arith.constant 0 : index
    %c0_82 = arith.constant 0 : index
    %70 = vector.load %arg2[%c0_79, %c0_80, %c0_81, %c0_82] : memref<1x2x64x32xf32, #tpu.memory_space<vmem>>, vector<1x1x64x32xf32>
    %71 = vector.shape_cast %70 : vector<1x1x64x32xf32> to vector<64x32xf32>
    %72 = vector.extract_strided_slice %69 {offsets = [0, 0], sizes = [32, 16], strides = [1, 1]} : vector<48x16xf32> to vector<32x16xf32>
    %cst_83 = arith.constant dense<0.000000e+00> : vector<64x16xf32>
    %73 = tpu.matmul %71, %72, %cst_83 {dimension_numbers = #tpu.dot_dimension_numbers<[1], [0], [0], [1], [0, 0, 1, 1], [], []>} : vector<64x32xf32>, vector<32x16xf32>, vector<64x16xf32> -> vector<64x16xf32>
    %74 = vector.extract_strided_slice %69 {offsets = [32, 0], sizes = [16, 16], strides = [1, 1]} : vector<48x16xf32> to vector<16x16xf32>
    %cst_84 = arith.constant dense<0.000000e+00> : vector<64x16xf32>
    %75 = tpu.matmul %33, %74, %cst_84 {dimension_numbers = #tpu.dot_dimension_numbers<[1], [0], [0], [1], [0, 0, 1, 1], [], []>} : vector<64x16xf32>, vector<16x16xf32>, vector<64x16xf32> -> vector<64x16xf32>
    %76 = arith.addf %73, %75 : vector<64x16xf32>
    %c0_85 = arith.constant 0 : index
    %c2_86 = arith.constant 2 : index
    %c0_87 = arith.constant 0 : index
    %c0_88 = arith.constant 0 : index
    %77 = vector.load %arg3[%c0_85, %c2_86, %c0_87, %c0_88] : memref<1x12x64x8xf32, #tpu.memory_space<vmem>>, vector<1x1x64x8xf32>
    %78 = vector.shape_cast %77 : vector<1x1x64x8xf32> to vector<64x8xf32>
    %c0_89 = arith.constant 0 : index
    %c0_90 = arith.constant 0 : index
    %79 = vector.load %arg7[%c0_89, %c0_90] : memref<8x16xf32, #tpu.memory_space<vmem>>, vector<8x16xf32>
    %cst_91 = arith.constant dense<0.000000e+00> : vector<64x16xf32>
    %80 = tpu.matmul %78, %79, %cst_91 {dimension_numbers = #tpu.dot_dimension_numbers<[1], [0], [0], [1], [0, 0, 1, 1], [], []>} : vector<64x8xf32>, vector<8x16xf32>, vector<64x16xf32> -> vector<64x16xf32>
    %81 = arith.addf %76, %80 : vector<64x16xf32>
    %c0_92 = arith.constant 0 : index
    %c0_93 = arith.constant 0 : index
    %82 = vector.load %arg8[%c0_92, %c0_93] : memref<1x16xf32, #tpu.memory_space<vmem>>, vector<1x16xf32>
    %83 = vector.broadcast %82 : vector<1x16xf32> to vector<64x16xf32>
    %84 = arith.addf %81, %83 : vector<64x16xf32>
    %cst_94 = arith.constant dense<0xFF800000> : vector<64xf32>
    %85 = vector.multi_reduction <maximumf>, %84, %cst_94 [1] : vector<64x16xf32> to vector<64xf32>
    %86 = vector.shape_cast %85 : vector<64xf32> to vector<64x1xf32>
    %87 = vector.broadcast %86 : vector<64x1xf32> to vector<64x16xf32>
    %88 = arith.subf %84, %87 : vector<64x16xf32>
    %89 = math.exp %88 : vector<64x16xf32>
    %cst_95 = arith.constant dense<0.000000e+00> : vector<64xf32>
    %90 = vector.multi_reduction <add>, %89, %cst_95 [1] : vector<64x16xf32> to vector<64xf32>
    %91 = vector.shape_cast %90 : vector<64xf32> to vector<64x1xf32>
    %92 = tpu.reciprocal %91 {approx = true} : vector<64x1xf32> -> vector<64x1xf32>
    %93 = arith.mulf %91, %92 : vector<64x1xf32>
    %cst_96 = arith.constant 2.000000e+00 : f32
    %94 = vector.broadcast %cst_96 : f32 to vector<64x1xf32>
    %95 = arith.subf %94, %93 : vector<64x1xf32>
    %96 = arith.mulf %92, %95 : vector<64x1xf32>
    %97 = vector.broadcast %96 : vector<64x1xf32> to vector<64x16xf32>
    %98 = arith.mulf %89, %97 : vector<64x16xf32>
    %c0_97 = arith.constant 0 : index
    %c0_98 = arith.constant 0 : index
    %c0_99 = arith.constant 0 : index
    %c0_100 = arith.constant 0 : index
    %99 = vector.load %arg9[%c0_97, %c0_98, %c0_99, %c0_100] : memref<1x8x64x16xf32, #tpu.memory_space<vmem>>, vector<1x1x64x16xf32>
    %100 = vector.shape_cast %99 : vector<1x1x64x16xf32> to vector<64x16xf32>
    %101 = vector.shape_cast %98 : vector<64x16xf32> to vector<1x1x64x16xf32>
    tpu.vector_store %arg9[%c0_97, %c0_98, %c0_99, %c0_100], %101 {strides = array<i32>} : memref<1x8x64x16xf32, #tpu.memory_space<vmem>>, vector<1x1x64x16xf32>,
    %c0_101 = arith.constant 0 : index
    %c0_102 = arith.constant 0 : index
    %c0_103 = arith.constant 0 : index
    %102 = vector.load %arg6[%c0_101, %c0_102, %c0_103] : memref<4x48x16xf32, #tpu.memory_space<vmem>>, vector<1x48x16xf32>
    %103 = vector.shape_cast %102 : vector<1x48x16xf32> to vector<48x16xf32>
    %c0_104 = arith.constant 0 : index
    %c1_105 = arith.constant 1 : index
    %c0_106 = arith.constant 0 : index
    %c0_107 = arith.constant 0 : index
    %104 = vector.load %arg2[%c0_104, %c1_105, %c0_106, %c0_107] : memref<1x2x64x32xf32, #tpu.memory_space<vmem>>, vector<1x1x64x32xf32>
    %105 = vector.shape_cast %104 : vector<1x1x64x32xf32> to vector<64x32xf32>
    %106 = vector.extract_strided_slice %103 {offsets = [0, 0], sizes = [32, 16], strides = [1, 1]} : vector<48x16xf32> to vector<32x16xf32>
    %cst_108 = arith.constant dense<0.000000e+00> : vector<64x16xf32>
    %107 = tpu.matmul %105, %106, %cst_108 {dimension_numbers = #tpu.dot_dimension_numbers<[1], [0], [0], [1], [0, 0, 1, 1], [], []>} : vector<64x32xf32>, vector<32x16xf32>, vector<64x16xf32> -> vector<64x16xf32>
    %108 = vector.extract_strided_slice %103 {offsets = [32, 0], sizes = [16, 16], strides = [1, 1]} : vector<48x16xf32> to vector<16x16xf32>
    %cst_109 = arith.constant dense<0.000000e+00> : vector<64x16xf32>
    %109 = tpu.matmul %67, %108, %cst_109 {dimension_numbers = #tpu.dot_dimension_numbers<[1], [0], [0], [1], [0, 0, 1, 1], [], []>} : vector<64x16xf32>, vector<16x16xf32>, vector<64x16xf32> -> vector<64x16xf32>
    %110 = arith.addf %107, %109 : vector<64x16xf32>
    %c0_110 = arith.constant 0 : index
    %c3_111 = arith.constant 3 : index
    %c0_112 = arith.constant 0 : index
    %c0_113 = arith.constant 0 : index
    %111 = vector.load %arg3[%c0_110, %c3_111, %c0_112, %c0_113] : memref<1x12x64x8xf32, #tpu.memory_space<vmem>>, vector<1x1x64x8xf32>
    %112 = vector.shape_cast %111 : vector<1x1x64x8xf32> to vector<64x8xf32>
    %c0_114 = arith.constant 0 : index
    %c0_115 = arith.constant 0 : index
    %113 = vector.load %arg7[%c0_114, %c0_115] : memref<8x16xf32, #tpu.memory_space<vmem>>, vector<8x16xf32>
    %cst_116 = arith.constant dense<0.000000e+00> : vector<64x16xf32>
    %114 = tpu.matmul %112, %113, %cst_116 {dimension_numbers = #tpu.dot_dimension_numbers<[1], [0], [0], [1], [0, 0, 1, 1], [], []>} : vector<64x8xf32>, vector<8x16xf32>, vector<64x16xf32> -> vector<64x16xf32>
    %115 = arith.addf %110, %114 : vector<64x16xf32>
    %c0_117 = arith.constant 0 : index
    %c0_118 = arith.constant 0 : index
    %116 = vector.load %arg8[%c0_117, %c0_118] : memref<1x16xf32, #tpu.memory_space<vmem>>, vector<1x16xf32>
    %117 = vector.broadcast %116 : vector<1x16xf32> to vector<64x16xf32>
    %118 = arith.addf %115, %117 : vector<64x16xf32>
    %cst_119 = arith.constant dense<0xFF800000> : vector<64xf32>
    %119 = vector.multi_reduction <maximumf>, %118, %cst_119 [1] : vector<64x16xf32> to vector<64xf32>
    %120 = vector.shape_cast %119 : vector<64xf32> to vector<64x1xf32>
    %121 = vector.broadcast %120 : vector<64x1xf32> to vector<64x16xf32>
    %122 = arith.subf %118, %121 : vector<64x16xf32>
    %123 = math.exp %122 : vector<64x16xf32>
    %cst_120 = arith.constant dense<0.000000e+00> : vector<64xf32>
    %124 = vector.multi_reduction <add>, %123, %cst_120 [1] : vector<64x16xf32> to vector<64xf32>
    %125 = vector.shape_cast %124 : vector<64xf32> to vector<64x1xf32>
    %126 = tpu.reciprocal %125 {approx = true} : vector<64x1xf32> -> vector<64x1xf32>
    %127 = arith.mulf %125, %126 : vector<64x1xf32>
    %cst_121 = arith.constant 2.000000e+00 : f32
    %128 = vector.broadcast %cst_121 : f32 to vector<64x1xf32>
    %129 = arith.subf %128, %127 : vector<64x1xf32>
    %130 = arith.mulf %126, %129 : vector<64x1xf32>
    %131 = vector.broadcast %130 : vector<64x1xf32> to vector<64x16xf32>
    %132 = arith.mulf %123, %131 : vector<64x16xf32>
    %c0_122 = arith.constant 0 : index
    %c1_123 = arith.constant 1 : index
    %c0_124 = arith.constant 0 : index
    %c0_125 = arith.constant 0 : index
    %133 = vector.load %arg9[%c0_122, %c1_123, %c0_124, %c0_125] : memref<1x8x64x16xf32, #tpu.memory_space<vmem>>, vector<1x1x64x16xf32>
    %134 = vector.shape_cast %133 : vector<1x1x64x16xf32> to vector<64x16xf32>
    %135 = vector.shape_cast %132 : vector<64x16xf32> to vector<1x1x64x16xf32>
    tpu.vector_store %arg9[%c0_122, %c1_123, %c0_124, %c0_125], %135 {strides = array<i32>} : memref<1x8x64x16xf32, #tpu.memory_space<vmem>>, vector<1x1x64x16xf32>,
    %c1_126 = arith.constant 1 : index
    %c0_127 = arith.constant 0 : index
    %c0_128 = arith.constant 0 : index
    %136 = vector.load %arg6[%c1_126, %c0_127, %c0_128] : memref<4x48x16xf32, #tpu.memory_space<vmem>>, vector<1x48x16xf32>
    %137 = vector.shape_cast %136 : vector<1x48x16xf32> to vector<48x16xf32>
    %c0_129 = arith.constant 0 : index
    %c0_130 = arith.constant 0 : index
    %c0_131 = arith.constant 0 : index
    %c0_132 = arith.constant 0 : index
    %138 = vector.load %arg2[%c0_129, %c0_130, %c0_131, %c0_132] : memref<1x2x64x32xf32, #tpu.memory_space<vmem>>, vector<1x1x64x32xf32>
    %139 = vector.shape_cast %138 : vector<1x1x64x32xf32> to vector<64x32xf32>
    %140 = vector.extract_strided_slice %137 {offsets = [0, 0], sizes = [32, 16], strides = [1, 1]} : vector<48x16xf32> to vector<32x16xf32>
    %cst_133 = arith.constant dense<0.000000e+00> : vector<64x16xf32>
    %141 = tpu.matmul %139, %140, %cst_133 {dimension_numbers = #tpu.dot_dimension_numbers<[1], [0], [0], [1], [0, 0, 1, 1], [], []>} : vector<64x32xf32>, vector<32x16xf32>, vector<64x16xf32> -> vector<64x16xf32>
    %142 = vector.extract_strided_slice %137 {offsets = [32, 0], sizes = [16, 16], strides = [1, 1]} : vector<48x16xf32> to vector<16x16xf32>
    %cst_134 = arith.constant dense<0.000000e+00> : vector<64x16xf32>
    %143 = tpu.matmul %33, %142, %cst_134 {dimension_numbers = #tpu.dot_dimension_numbers<[1], [0], [0], [1], [0, 0, 1, 1], [], []>} : vector<64x16xf32>, vector<16x16xf32>, vector<64x16xf32> -> vector<64x16xf32>
    %144 = arith.addf %141, %143 : vector<64x16xf32>
    %c0_135 = arith.constant 0 : index
    %c4_136 = arith.constant 4 : index
    %c0_137 = arith.constant 0 : index
    %c0_138 = arith.constant 0 : index
    %145 = vector.load %arg3[%c0_135, %c4_136, %c0_137, %c0_138] : memref<1x12x64x8xf32, #tpu.memory_space<vmem>>, vector<1x1x64x8xf32>
    %146 = vector.shape_cast %145 : vector<1x1x64x8xf32> to vector<64x8xf32>
    %c0_139 = arith.constant 0 : index
    %c0_140 = arith.constant 0 : index
    %147 = vector.load %arg7[%c0_139, %c0_140] : memref<8x16xf32, #tpu.memory_space<vmem>>, vector<8x16xf32>
    %cst_141 = arith.constant dense<0.000000e+00> : vector<64x16xf32>
    %148 = tpu.matmul %146, %147, %cst_141 {dimension_numbers = #tpu.dot_dimension_numbers<[1], [0], [0], [1], [0, 0, 1, 1], [], []>} : vector<64x8xf32>, vector<8x16xf32>, vector<64x16xf32> -> vector<64x16xf32>
    %149 = arith.addf %144, %148 : vector<64x16xf32>
    %c0_142 = arith.constant 0 : index
    %c0_143 = arith.constant 0 : index
    %150 = vector.load %arg8[%c0_142, %c0_143] : memref<1x16xf32, #tpu.memory_space<vmem>>, vector<1x16xf32>
    %151 = vector.broadcast %150 : vector<1x16xf32> to vector<64x16xf32>
    %152 = arith.addf %149, %151 : vector<64x16xf32>
    %cst_144 = arith.constant dense<0xFF800000> : vector<64xf32>
    %153 = vector.multi_reduction <maximumf>, %152, %cst_144 [1] : vector<64x16xf32> to vector<64xf32>
    %154 = vector.shape_cast %153 : vector<64xf32> to vector<64x1xf32>
    %155 = vector.broadcast %154 : vector<64x1xf32> to vector<64x16xf32>
    %156 = arith.subf %152, %155 : vector<64x16xf32>
    %157 = math.exp %156 : vector<64x16xf32>
    %cst_145 = arith.constant dense<0.000000e+00> : vector<64xf32>
    %158 = vector.multi_reduction <add>, %157, %cst_145 [1] : vector<64x16xf32> to vector<64xf32>
    %159 = vector.shape_cast %158 : vector<64xf32> to vector<64x1xf32>
    %160 = tpu.reciprocal %159 {approx = true} : vector<64x1xf32> -> vector<64x1xf32>
    %161 = arith.mulf %159, %160 : vector<64x1xf32>
    %cst_146 = arith.constant 2.000000e+00 : f32
    %162 = vector.broadcast %cst_146 : f32 to vector<64x1xf32>
    %163 = arith.subf %162, %161 : vector<64x1xf32>
    %164 = arith.mulf %160, %163 : vector<64x1xf32>
    %165 = vector.broadcast %164 : vector<64x1xf32> to vector<64x16xf32>
    %166 = arith.mulf %157, %165 : vector<64x16xf32>
    %c0_147 = arith.constant 0 : index
    %c2_148 = arith.constant 2 : index
    %c0_149 = arith.constant 0 : index
    %c0_150 = arith.constant 0 : index
    %167 = vector.load %arg9[%c0_147, %c2_148, %c0_149, %c0_150] : memref<1x8x64x16xf32, #tpu.memory_space<vmem>>, vector<1x1x64x16xf32>
    %168 = vector.shape_cast %167 : vector<1x1x64x16xf32> to vector<64x16xf32>
    %169 = vector.shape_cast %166 : vector<64x16xf32> to vector<1x1x64x16xf32>
    tpu.vector_store %arg9[%c0_147, %c2_148, %c0_149, %c0_150], %169 {strides = array<i32>} : memref<1x8x64x16xf32, #tpu.memory_space<vmem>>, vector<1x1x64x16xf32>,
    %c1_151 = arith.constant 1 : index
    %c0_152 = arith.constant 0 : index
    %c0_153 = arith.constant 0 : index
    %170 = vector.load %arg6[%c1_151, %c0_152, %c0_153] : memref<4x48x16xf32, #tpu.memory_space<vmem>>, vector<1x48x16xf32>
    %171 = vector.shape_cast %170 : vector<1x48x16xf32> to vector<48x16xf32>
    %c0_154 = arith.constant 0 : index
    %c1_155 = arith.constant 1 : index
    %c0_156 = arith.constant 0 : index
    %c0_157 = arith.constant 0 : index
    %172 = vector.load %arg2[%c0_154, %c1_155, %c0_156, %c0_157] : memref<1x2x64x32xf32, #tpu.memory_space<vmem>>, vector<1x1x64x32xf32>
    %173 = vector.shape_cast %172 : vector<1x1x64x32xf32> to vector<64x32xf32>
    %174 = vector.extract_strided_slice %171 {offsets = [0, 0], sizes = [32, 16], strides = [1, 1]} : vector<48x16xf32> to vector<32x16xf32>
    %cst_158 = arith.constant dense<0.000000e+00> : vector<64x16xf32>
    %175 = tpu.matmul %173, %174, %cst_158 {dimension_numbers = #tpu.dot_dimension_numbers<[1], [0], [0], [1], [0, 0, 1, 1], [], []>} : vector<64x32xf32>, vector<32x16xf32>, vector<64x16xf32> -> vector<64x16xf32>
    %176 = vector.extract_strided_slice %171 {offsets = [32, 0], sizes = [16, 16], strides = [1, 1]} : vector<48x16xf32> to vector<16x16xf32>
    %cst_159 = arith.constant dense<0.000000e+00> : vector<64x16xf32>
    %177 = tpu.matmul %67, %176, %cst_159 {dimension_numbers = #tpu.dot_dimension_numbers<[1], [0], [0], [1], [0, 0, 1, 1], [], []>} : vector<64x16xf32>, vector<16x16xf32>, vector<64x16xf32> -> vector<64x16xf32>
    %178 = arith.addf %175, %177 : vector<64x16xf32>
    %c0_160 = arith.constant 0 : index
    %c5_161 = arith.constant 5 : index
    %c0_162 = arith.constant 0 : index
    %c0_163 = arith.constant 0 : index
    %179 = vector.load %arg3[%c0_160, %c5_161, %c0_162, %c0_163] : memref<1x12x64x8xf32, #tpu.memory_space<vmem>>, vector<1x1x64x8xf32>
    %180 = vector.shape_cast %179 : vector<1x1x64x8xf32> to vector<64x8xf32>
    %c0_164 = arith.constant 0 : index
    %c0_165 = arith.constant 0 : index
    %181 = vector.load %arg7[%c0_164, %c0_165] : memref<8x16xf32, #tpu.memory_space<vmem>>, vector<8x16xf32>
    %cst_166 = arith.constant dense<0.000000e+00> : vector<64x16xf32>
    %182 = tpu.matmul %180, %181, %cst_166 {dimension_numbers = #tpu.dot_dimension_numbers<[1], [0], [0], [1], [0, 0, 1, 1], [], []>} : vector<64x8xf32>, vector<8x16xf32>, vector<64x16xf32> -> vector<64x16xf32>
    %183 = arith.addf %178, %182 : vector<64x16xf32>
    %c0_167 = arith.constant 0 : index
    %c0_168 = arith.constant 0 : index
    %184 = vector.load %arg8[%c0_167, %c0_168] : memref<1x16xf32, #tpu.memory_space<vmem>>, vector<1x16xf32>
    %185 = vector.broadcast %184 : vector<1x16xf32> to vector<64x16xf32>
    %186 = arith.addf %183, %185 : vector<64x16xf32>
    %cst_169 = arith.constant dense<0xFF800000> : vector<64xf32>
    %187 = vector.multi_reduction <maximumf>, %186, %cst_169 [1] : vector<64x16xf32> to vector<64xf32>
    %188 = vector.shape_cast %187 : vector<64xf32> to vector<64x1xf32>
    %189 = vector.broadcast %188 : vector<64x1xf32> to vector<64x16xf32>
    %190 = arith.subf %186, %189 : vector<64x16xf32>
    %191 = math.exp %190 : vector<64x16xf32>
    %cst_170 = arith.constant dense<0.000000e+00> : vector<64xf32>
    %192 = vector.multi_reduction <add>, %191, %cst_170 [1] : vector<64x16xf32> to vector<64xf32>
    %193 = vector.shape_cast %192 : vector<64xf32> to vector<64x1xf32>
    %194 = tpu.reciprocal %193 {approx = true} : vector<64x1xf32> -> vector<64x1xf32>
    %195 = arith.mulf %193, %194 : vector<64x1xf32>
    %cst_171 = arith.constant 2.000000e+00 : f32
    %196 = vector.broadcast %cst_171 : f32 to vector<64x1xf32>
    %197 = arith.subf %196, %195 : vector<64x1xf32>
    %198 = arith.mulf %194, %197 : vector<64x1xf32>
    %199 = vector.broadcast %198 : vector<64x1xf32> to vector<64x16xf32>
    %200 = arith.mulf %191, %199 : vector<64x16xf32>
    %c0_172 = arith.constant 0 : index
    %c3_173 = arith.constant 3 : index
    %c0_174 = arith.constant 0 : index
    %c0_175 = arith.constant 0 : index
    %201 = vector.load %arg9[%c0_172, %c3_173, %c0_174, %c0_175] : memref<1x8x64x16xf32, #tpu.memory_space<vmem>>, vector<1x1x64x16xf32>
    %202 = vector.shape_cast %201 : vector<1x1x64x16xf32> to vector<64x16xf32>
    %203 = vector.shape_cast %200 : vector<64x16xf32> to vector<1x1x64x16xf32>
    tpu.vector_store %arg9[%c0_172, %c3_173, %c0_174, %c0_175], %203 {strides = array<i32>} : memref<1x8x64x16xf32, #tpu.memory_space<vmem>>, vector<1x1x64x16xf32>,
    %c2_176 = arith.constant 2 : index
    %c0_177 = arith.constant 0 : index
    %c0_178 = arith.constant 0 : index
    %204 = vector.load %arg6[%c2_176, %c0_177, %c0_178] : memref<4x48x16xf32, #tpu.memory_space<vmem>>, vector<1x48x16xf32>
    %205 = vector.shape_cast %204 : vector<1x48x16xf32> to vector<48x16xf32>
    %c0_179 = arith.constant 0 : index
    %c0_180 = arith.constant 0 : index
    %c0_181 = arith.constant 0 : index
    %c0_182 = arith.constant 0 : index
    %206 = vector.load %arg2[%c0_179, %c0_180, %c0_181, %c0_182] : memref<1x2x64x32xf32, #tpu.memory_space<vmem>>, vector<1x1x64x32xf32>
    %207 = vector.shape_cast %206 : vector<1x1x64x32xf32> to vector<64x32xf32>
    %208 = vector.extract_strided_slice %205 {offsets = [0, 0], sizes = [32, 16], strides = [1, 1]} : vector<48x16xf32> to vector<32x16xf32>
    %cst_183 = arith.constant dense<0.000000e+00> : vector<64x16xf32>
    %209 = tpu.matmul %207, %208, %cst_183 {dimension_numbers = #tpu.dot_dimension_numbers<[1], [0], [0], [1], [0, 0, 1, 1], [], []>} : vector<64x32xf32>, vector<32x16xf32>, vector<64x16xf32> -> vector<64x16xf32>
    %210 = vector.extract_strided_slice %205 {offsets = [32, 0], sizes = [16, 16], strides = [1, 1]} : vector<48x16xf32> to vector<16x16xf32>
    %cst_184 = arith.constant dense<0.000000e+00> : vector<64x16xf32>
    %211 = tpu.matmul %33, %210, %cst_184 {dimension_numbers = #tpu.dot_dimension_numbers<[1], [0], [0], [1], [0, 0, 1, 1], [], []>} : vector<64x16xf32>, vector<16x16xf32>, vector<64x16xf32> -> vector<64x16xf32>
    %212 = arith.addf %209, %211 : vector<64x16xf32>
    %c0_185 = arith.constant 0 : index
    %c6_186 = arith.constant 6 : index
    %c0_187 = arith.constant 0 : index
    %c0_188 = arith.constant 0 : index
    %213 = vector.load %arg3[%c0_185, %c6_186, %c0_187, %c0_188] : memref<1x12x64x8xf32, #tpu.memory_space<vmem>>, vector<1x1x64x8xf32>
    %214 = vector.shape_cast %213 : vector<1x1x64x8xf32> to vector<64x8xf32>
    %c0_189 = arith.constant 0 : index
    %c0_190 = arith.constant 0 : index
    %215 = vector.load %arg7[%c0_189, %c0_190] : memref<8x16xf32, #tpu.memory_space<vmem>>, vector<8x16xf32>
    %cst_191 = arith.constant dense<0.000000e+00> : vector<64x16xf32>
    %216 = tpu.matmul %214, %215, %cst_191 {dimension_numbers = #tpu.dot_dimension_numbers<[1], [0], [0], [1], [0, 0, 1, 1], [], []>} : vector<64x8xf32>, vector<8x16xf32>, vector<64x16xf32> -> vector<64x16xf32>
    %217 = arith.addf %212, %216 : vector<64x16xf32>
    %c0_192 = arith.constant 0 : index
    %c0_193 = arith.constant 0 : index
    %218 = vector.load %arg8[%c0_192, %c0_193] : memref<1x16xf32, #tpu.memory_space<vmem>>, vector<1x16xf32>
    %219 = vector.broadcast %218 : vector<1x16xf32> to vector<64x16xf32>
    %220 = arith.addf %217, %219 : vector<64x16xf32>
    %cst_194 = arith.constant dense<0xFF800000> : vector<64xf32>
    %221 = vector.multi_reduction <maximumf>, %220, %cst_194 [1] : vector<64x16xf32> to vector<64xf32>
    %222 = vector.shape_cast %221 : vector<64xf32> to vector<64x1xf32>
    %223 = vector.broadcast %222 : vector<64x1xf32> to vector<64x16xf32>
    %224 = arith.subf %220, %223 : vector<64x16xf32>
    %225 = math.exp %224 : vector<64x16xf32>
    %cst_195 = arith.constant dense<0.000000e+00> : vector<64xf32>
    %226 = vector.multi_reduction <add>, %225, %cst_195 [1] : vector<64x16xf32> to vector<64xf32>
    %227 = vector.shape_cast %226 : vector<64xf32> to vector<64x1xf32>
    %228 = tpu.reciprocal %227 {approx = true} : vector<64x1xf32> -> vector<64x1xf32>
    %229 = arith.mulf %227, %228 : vector<64x1xf32>
    %cst_196 = arith.constant 2.000000e+00 : f32
    %230 = vector.broadcast %cst_196 : f32 to vector<64x1xf32>
    %231 = arith.subf %230, %229 : vector<64x1xf32>
    %232 = arith.mulf %228, %231 : vector<64x1xf32>
    %233 = vector.broadcast %232 : vector<64x1xf32> to vector<64x16xf32>
    %234 = arith.mulf %225, %233 : vector<64x16xf32>
    %c0_197 = arith.constant 0 : index
    %c4_198 = arith.constant 4 : index
    %c0_199 = arith.constant 0 : index
    %c0_200 = arith.constant 0 : index
    %235 = vector.load %arg9[%c0_197, %c4_198, %c0_199, %c0_200] : memref<1x8x64x16xf32, #tpu.memory_space<vmem>>, vector<1x1x64x16xf32>
    %236 = vector.shape_cast %235 : vector<1x1x64x16xf32> to vector<64x16xf32>
    %237 = vector.shape_cast %234 : vector<64x16xf32> to vector<1x1x64x16xf32>
    tpu.vector_store %arg9[%c0_197, %c4_198, %c0_199, %c0_200], %237 {strides = array<i32>} : memref<1x8x64x16xf32, #tpu.memory_space<vmem>>, vector<1x1x64x16xf32>,
    %c2_201 = arith.constant 2 : index
    %c0_202 = arith.constant 0 : index
    %c0_203 = arith.constant 0 : index
    %238 = vector.load %arg6[%c2_201, %c0_202, %c0_203] : memref<4x48x16xf32, #tpu.memory_space<vmem>>, vector<1x48x16xf32>
    %239 = vector.shape_cast %238 : vector<1x48x16xf32> to vector<48x16xf32>
    %c0_204 = arith.constant 0 : index
    %c1_205 = arith.constant 1 : index
    %c0_206 = arith.constant 0 : index
    %c0_207 = arith.constant 0 : index
    %240 = vector.load %arg2[%c0_204, %c1_205, %c0_206, %c0_207] : memref<1x2x64x32xf32, #tpu.memory_space<vmem>>, vector<1x1x64x32xf32>
    %241 = vector.shape_cast %240 : vector<1x1x64x32xf32> to vector<64x32xf32>
    %242 = vector.extract_strided_slice %239 {offsets = [0, 0], sizes = [32, 16], strides = [1, 1]} : vector<48x16xf32> to vector<32x16xf32>
    %cst_208 = arith.constant dense<0.000000e+00> : vector<64x16xf32>
    %243 = tpu.matmul %241, %242, %cst_208 {dimension_numbers = #tpu.dot_dimension_numbers<[1], [0], [0], [1], [0, 0, 1, 1], [], []>} : vector<64x32xf32>, vector<32x16xf32>, vector<64x16xf32> -> vector<64x16xf32>
    %244 = vector.extract_strided_slice %239 {offsets = [32, 0], sizes = [16, 16], strides = [1, 1]} : vector<48x16xf32> to vector<16x16xf32>
    %cst_209 = arith.constant dense<0.000000e+00> : vector<64x16xf32>
    %245 = tpu.matmul %67, %244, %cst_209 {dimension_numbers = #tpu.dot_dimension_numbers<[1], [0], [0], [1], [0, 0, 1, 1], [], []>} : vector<64x16xf32>, vector<16x16xf32>, vector<64x16xf32> -> vector<64x16xf32>
    %246 = arith.addf %243, %245 : vector<64x16xf32>
    %c0_210 = arith.constant 0 : index
    %c7_211 = arith.constant 7 : index
    %c0_212 = arith.constant 0 : index
    %c0_213 = arith.constant 0 : index
    %247 = vector.load %arg3[%c0_210, %c7_211, %c0_212, %c0_213] : memref<1x12x64x8xf32, #tpu.memory_space<vmem>>, vector<1x1x64x8xf32>
    %248 = vector.shape_cast %247 : vector<1x1x64x8xf32> to vector<64x8xf32>
    %c0_214 = arith.constant 0 : index
    %c0_215 = arith.constant 0 : index
    %249 = vector.load %arg7[%c0_214, %c0_215] : memref<8x16xf32, #tpu.memory_space<vmem>>, vector<8x16xf32>
    %cst_216 = arith.constant dense<0.000000e+00> : vector<64x16xf32>
    %250 = tpu.matmul %248, %249, %cst_216 {dimension_numbers = #tpu.dot_dimension_numbers<[1], [0], [0], [1], [0, 0, 1, 1], [], []>} : vector<64x8xf32>, vector<8x16xf32>, vector<64x16xf32> -> vector<64x16xf32>
    %251 = arith.addf %246, %250 : vector<64x16xf32>
    %c0_217 = arith.constant 0 : index
    %c0_218 = arith.constant 0 : index
    %252 = vector.load %arg8[%c0_217, %c0_218] : memref<1x16xf32, #tpu.memory_space<vmem>>, vector<1x16xf32>
    %253 = vector.broadcast %252 : vector<1x16xf32> to vector<64x16xf32>
    %254 = arith.addf %251, %253 : vector<64x16xf32>
    %cst_219 = arith.constant dense<0xFF800000> : vector<64xf32>
    %255 = vector.multi_reduction <maximumf>, %254, %cst_219 [1] : vector<64x16xf32> to vector<64xf32>
    %256 = vector.shape_cast %255 : vector<64xf32> to vector<64x1xf32>
    %257 = vector.broadcast %256 : vector<64x1xf32> to vector<64x16xf32>
    %258 = arith.subf %254, %257 : vector<64x16xf32>
    %259 = math.exp %258 : vector<64x16xf32>
    %cst_220 = arith.constant dense<0.000000e+00> : vector<64xf32>
    %260 = vector.multi_reduction <add>, %259, %cst_220 [1] : vector<64x16xf32> to vector<64xf32>
    %261 = vector.shape_cast %260 : vector<64xf32> to vector<64x1xf32>
    %262 = tpu.reciprocal %261 {approx = true} : vector<64x1xf32> -> vector<64x1xf32>
    %263 = arith.mulf %261, %262 : vector<64x1xf32>
    %cst_221 = arith.constant 2.000000e+00 : f32
    %264 = vector.broadcast %cst_221 : f32 to vector<64x1xf32>
    %265 = arith.subf %264, %263 : vector<64x1xf32>
    %266 = arith.mulf %262, %265 : vector<64x1xf32>
    %267 = vector.broadcast %266 : vector<64x1xf32> to vector<64x16xf32>
    %268 = arith.mulf %259, %267 : vector<64x16xf32>
    %c0_222 = arith.constant 0 : index
    %c5_223 = arith.constant 5 : index
    %c0_224 = arith.constant 0 : index
    %c0_225 = arith.constant 0 : index
    %269 = vector.load %arg9[%c0_222, %c5_223, %c0_224, %c0_225] : memref<1x8x64x16xf32, #tpu.memory_space<vmem>>, vector<1x1x64x16xf32>
    %270 = vector.shape_cast %269 : vector<1x1x64x16xf32> to vector<64x16xf32>
    %271 = vector.shape_cast %268 : vector<64x16xf32> to vector<1x1x64x16xf32>
    tpu.vector_store %arg9[%c0_222, %c5_223, %c0_224, %c0_225], %271 {strides = array<i32>} : memref<1x8x64x16xf32, #tpu.memory_space<vmem>>, vector<1x1x64x16xf32>,
    %c3_226 = arith.constant 3 : index
    %c0_227 = arith.constant 0 : index
    %c0_228 = arith.constant 0 : index
    %272 = vector.load %arg6[%c3_226, %c0_227, %c0_228] : memref<4x48x16xf32, #tpu.memory_space<vmem>>, vector<1x48x16xf32>
    %273 = vector.shape_cast %272 : vector<1x48x16xf32> to vector<48x16xf32>
    %c0_229 = arith.constant 0 : index
    %c0_230 = arith.constant 0 : index
    %c0_231 = arith.constant 0 : index
    %c0_232 = arith.constant 0 : index
    %274 = vector.load %arg2[%c0_229, %c0_230, %c0_231, %c0_232] : memref<1x2x64x32xf32, #tpu.memory_space<vmem>>, vector<1x1x64x32xf32>
    %275 = vector.shape_cast %274 : vector<1x1x64x32xf32> to vector<64x32xf32>
    %276 = vector.extract_strided_slice %273 {offsets = [0, 0], sizes = [32, 16], strides = [1, 1]} : vector<48x16xf32> to vector<32x16xf32>
    %cst_233 = arith.constant dense<0.000000e+00> : vector<64x16xf32>
    %277 = tpu.matmul %275, %276, %cst_233 {dimension_numbers = #tpu.dot_dimension_numbers<[1], [0], [0], [1], [0, 0, 1, 1], [], []>} : vector<64x32xf32>, vector<32x16xf32>, vector<64x16xf32> -> vector<64x16xf32>
    %278 = vector.extract_strided_slice %273 {offsets = [32, 0], sizes = [16, 16], strides = [1, 1]} : vector<48x16xf32> to vector<16x16xf32>
    %cst_234 = arith.constant dense<0.000000e+00> : vector<64x16xf32>
    %279 = tpu.matmul %33, %278, %cst_234 {dimension_numbers = #tpu.dot_dimension_numbers<[1], [0], [0], [1], [0, 0, 1, 1], [], []>} : vector<64x16xf32>, vector<16x16xf32>, vector<64x16xf32> -> vector<64x16xf32>
    %280 = arith.addf %277, %279 : vector<64x16xf32>
    %c0_235 = arith.constant 0 : index
    %c8_236 = arith.constant 8 : index
    %c0_237 = arith.constant 0 : index
    %c0_238 = arith.constant 0 : index
    %281 = vector.load %arg3[%c0_235, %c8_236, %c0_237, %c0_238] : memref<1x12x64x8xf32, #tpu.memory_space<vmem>>, vector<1x1x64x8xf32>
    %282 = vector.shape_cast %281 : vector<1x1x64x8xf32> to vector<64x8xf32>
    %c0_239 = arith.constant 0 : index
    %c0_240 = arith.constant 0 : index
    %283 = vector.load %arg7[%c0_239, %c0_240] : memref<8x16xf32, #tpu.memory_space<vmem>>, vector<8x16xf32>
    %cst_241 = arith.constant dense<0.000000e+00> : vector<64x16xf32>
    %284 = tpu.matmul %282, %283, %cst_241 {dimension_numbers = #tpu.dot_dimension_numbers<[1], [0], [0], [1], [0, 0, 1, 1], [], []>} : vector<64x8xf32>, vector<8x16xf32>, vector<64x16xf32> -> vector<64x16xf32>
    %285 = arith.addf %280, %284 : vector<64x16xf32>
    %c0_242 = arith.constant 0 : index
    %c0_243 = arith.constant 0 : index
    %286 = vector.load %arg8[%c0_242, %c0_243] : memref<1x16xf32, #tpu.memory_space<vmem>>, vector<1x16xf32>
    %287 = vector.broadcast %286 : vector<1x16xf32> to vector<64x16xf32>
    %288 = arith.addf %285, %287 : vector<64x16xf32>
    %cst_244 = arith.constant dense<0xFF800000> : vector<64xf32>
    %289 = vector.multi_reduction <maximumf>, %288, %cst_244 [1] : vector<64x16xf32> to vector<64xf32>
    %290 = vector.shape_cast %289 : vector<64xf32> to vector<64x1xf32>
    %291 = vector.broadcast %290 : vector<64x1xf32> to vector<64x16xf32>
    %292 = arith.subf %288, %291 : vector<64x16xf32>
    %293 = math.exp %292 : vector<64x16xf32>
    %cst_245 = arith.constant dense<0.000000e+00> : vector<64xf32>
    %294 = vector.multi_reduction <add>, %293, %cst_245 [1] : vector<64x16xf32> to vector<64xf32>
    %295 = vector.shape_cast %294 : vector<64xf32> to vector<64x1xf32>
    %296 = tpu.reciprocal %295 {approx = true} : vector<64x1xf32> -> vector<64x1xf32>
    %297 = arith.mulf %295, %296 : vector<64x1xf32>
    %cst_246 = arith.constant 2.000000e+00 : f32
    %298 = vector.broadcast %cst_246 : f32 to vector<64x1xf32>
    %299 = arith.subf %298, %297 : vector<64x1xf32>
    %300 = arith.mulf %296, %299 : vector<64x1xf32>
    %301 = vector.broadcast %300 : vector<64x1xf32> to vector<64x16xf32>
    %302 = arith.mulf %293, %301 : vector<64x16xf32>
    %c0_247 = arith.constant 0 : index
    %c6_248 = arith.constant 6 : index
    %c0_249 = arith.constant 0 : index
    %c0_250 = arith.constant 0 : index
    %303 = vector.load %arg9[%c0_247, %c6_248, %c0_249, %c0_250] : memref<1x8x64x16xf32, #tpu.memory_space<vmem>>, vector<1x1x64x16xf32>
    %304 = vector.shape_cast %303 : vector<1x1x64x16xf32> to vector<64x16xf32>
    %305 = vector.shape_cast %302 : vector<64x16xf32> to vector<1x1x64x16xf32>
    tpu.vector_store %arg9[%c0_247, %c6_248, %c0_249, %c0_250], %305 {strides = array<i32>} : memref<1x8x64x16xf32, #tpu.memory_space<vmem>>, vector<1x1x64x16xf32>,
    %c3_251 = arith.constant 3 : index
    %c0_252 = arith.constant 0 : index
    %c0_253 = arith.constant 0 : index
    %306 = vector.load %arg6[%c3_251, %c0_252, %c0_253] : memref<4x48x16xf32, #tpu.memory_space<vmem>>, vector<1x48x16xf32>
    %307 = vector.shape_cast %306 : vector<1x48x16xf32> to vector<48x16xf32>
    %c0_254 = arith.constant 0 : index
    %c1_255 = arith.constant 1 : index
    %c0_256 = arith.constant 0 : index
    %c0_257 = arith.constant 0 : index
    %308 = vector.load %arg2[%c0_254, %c1_255, %c0_256, %c0_257] : memref<1x2x64x32xf32, #tpu.memory_space<vmem>>, vector<1x1x64x32xf32>
    %309 = vector.shape_cast %308 : vector<1x1x64x32xf32> to vector<64x32xf32>
    %310 = vector.extract_strided_slice %307 {offsets = [0, 0], sizes = [32, 16], strides = [1, 1]} : vector<48x16xf32> to vector<32x16xf32>
    %cst_258 = arith.constant dense<0.000000e+00> : vector<64x16xf32>
    %311 = tpu.matmul %309, %310, %cst_258 {dimension_numbers = #tpu.dot_dimension_numbers<[1], [0], [0], [1], [0, 0, 1, 1], [], []>} : vector<64x32xf32>, vector<32x16xf32>, vector<64x16xf32> -> vector<64x16xf32>
    %312 = vector.extract_strided_slice %307 {offsets = [32, 0], sizes = [16, 16], strides = [1, 1]} : vector<48x16xf32> to vector<16x16xf32>
    %cst_259 = arith.constant dense<0.000000e+00> : vector<64x16xf32>
    %313 = tpu.matmul %67, %312, %cst_259 {dimension_numbers = #tpu.dot_dimension_numbers<[1], [0], [0], [1], [0, 0, 1, 1], [], []>} : vector<64x16xf32>, vector<16x16xf32>, vector<64x16xf32> -> vector<64x16xf32>
    %314 = arith.addf %311, %313 : vector<64x16xf32>
    %c0_260 = arith.constant 0 : index
    %c9 = arith.constant 9 : index
    %c0_261 = arith.constant 0 : index
    %c0_262 = arith.constant 0 : index
    %315 = vector.load %arg3[%c0_260, %c9, %c0_261, %c0_262] : memref<1x12x64x8xf32, #tpu.memory_space<vmem>>, vector<1x1x64x8xf32>
    %316 = vector.shape_cast %315 : vector<1x1x64x8xf32> to vector<64x8xf32>
    %c0_263 = arith.constant 0 : index
    %c0_264 = arith.constant 0 : index
    %317 = vector.load %arg7[%c0_263, %c0_264] : memref<8x16xf32, #tpu.memory_space<vmem>>, vector<8x16xf32>
    %cst_265 = arith.constant dense<0.000000e+00> : vector<64x16xf32>
    %318 = tpu.matmul %316, %317, %cst_265 {dimension_numbers = #tpu.dot_dimension_numbers<[1], [0], [0], [1], [0, 0, 1, 1], [], []>} : vector<64x8xf32>, vector<8x16xf32>, vector<64x16xf32> -> vector<64x16xf32>
    %319 = arith.addf %314, %318 : vector<64x16xf32>
    %c0_266 = arith.constant 0 : index
    %c0_267 = arith.constant 0 : index
    %320 = vector.load %arg8[%c0_266, %c0_267] : memref<1x16xf32, #tpu.memory_space<vmem>>, vector<1x16xf32>
    %321 = vector.broadcast %320 : vector<1x16xf32> to vector<64x16xf32>
    %322 = arith.addf %319, %321 : vector<64x16xf32>
    %cst_268 = arith.constant dense<0xFF800000> : vector<64xf32>
    %323 = vector.multi_reduction <maximumf>, %322, %cst_268 [1] : vector<64x16xf32> to vector<64xf32>
    %324 = vector.shape_cast %323 : vector<64xf32> to vector<64x1xf32>
    %325 = vector.broadcast %324 : vector<64x1xf32> to vector<64x16xf32>
    %326 = arith.subf %322, %325 : vector<64x16xf32>
    %327 = math.exp %326 : vector<64x16xf32>
    %cst_269 = arith.constant dense<0.000000e+00> : vector<64xf32>
    %328 = vector.multi_reduction <add>, %327, %cst_269 [1] : vector<64x16xf32> to vector<64xf32>
    %329 = vector.shape_cast %328 : vector<64xf32> to vector<64x1xf32>
    %330 = tpu.reciprocal %329 {approx = true} : vector<64x1xf32> -> vector<64x1xf32>
    %331 = arith.mulf %329, %330 : vector<64x1xf32>
    %cst_270 = arith.constant 2.000000e+00 : f32
    %332 = vector.broadcast %cst_270 : f32 to vector<64x1xf32>
    %333 = arith.subf %332, %331 : vector<64x1xf32>
    %334 = arith.mulf %330, %333 : vector<64x1xf32>
    %335 = vector.broadcast %334 : vector<64x1xf32> to vector<64x16xf32>
    %336 = arith.mulf %327, %335 : vector<64x16xf32>
    %c0_271 = arith.constant 0 : index
    %c7_272 = arith.constant 7 : index
    %c0_273 = arith.constant 0 : index
    %c0_274 = arith.constant 0 : index
    %337 = vector.load %arg9[%c0_271, %c7_272, %c0_273, %c0_274] : memref<1x8x64x16xf32, #tpu.memory_space<vmem>>, vector<1x1x64x16xf32>
    %338 = vector.shape_cast %337 : vector<1x1x64x16xf32> to vector<64x16xf32>
    %339 = vector.shape_cast %336 : vector<64x16xf32> to vector<1x1x64x16xf32>
    tpu.vector_store %arg9[%c0_271, %c7_272, %c0_273, %c0_274], %339 {strides = array<i32>} : memref<1x8x64x16xf32, #tpu.memory_space<vmem>>, vector<1x1x64x16xf32>,
    return
  }
  func.func @transform_0(%arg0: i32, %arg1: i32) -> (i32, i32, i32, i32) {
    %c0_i32 = arith.constant 0 : i32
    %c0_i32_0 = arith.constant 0 : i32
    %c0_i32_1 = arith.constant 0 : i32
    return %arg0, %c0_i32, %arg1, %c0_i32_0 : i32, i32, i32, i32
  }
  func.func @transform_1(%arg0: i32, %arg1: i32) -> (i32, i32, i32, i32) {
    %c0_i32 = arith.constant 0 : i32
    %c0_i32_0 = arith.constant 0 : i32
    %c0_i32_1 = arith.constant 0 : i32
    return %arg0, %c0_i32, %arg1, %c0_i32_0 : i32, i32, i32, i32
  }
  func.func @transform_2(%arg0: i32, %arg1: i32) -> (i32, i32, i32) {
    %c0_i32 = arith.constant 0 : i32
    %c0_i32_0 = arith.constant 0 : i32
    %c0_i32_1 = arith.constant 0 : i32
    %c0_i32_2 = arith.constant 0 : i32
    return %c0_i32, %c0_i32_0, %c0_i32_1 : i32, i32, i32
  }
  func.func @transform_3(%arg0: i32, %arg1: i32) -> (i32, i32) {
    %c0_i32 = arith.constant 0 : i32
    %c0_i32_0 = arith.constant 0 : i32
    %c0_i32_1 = arith.constant 0 : i32
    return %c0_i32, %c0_i32_0 : i32, i32
  }
  func.func @transform_4(%arg0: i32, %arg1: i32) -> (i32, i32, i32) {
    %c0_i32 = arith.constant 0 : i32
    %c0_i32_0 = arith.constant 0 : i32
    %c0_i32_1 = arith.constant 0 : i32
    %c0_i32_2 = arith.constant 0 : i32
    return %c0_i32, %c0_i32_0, %c0_i32_1 : i32, i32, i32
  }
  func.func @transform_5(%arg0: i32, %arg1: i32) -> (i32, i32) {
    %c0_i32 = arith.constant 0 : i32
    %c0_i32_0 = arith.constant 0 : i32
    %c0_i32_1 = arith.constant 0 : i32
    return %c0_i32, %c0_i32_0 : i32, i32
  }
  func.func @transform_6(%arg0: i32, %arg1: i32) -> (i32, i32) {
    %c0_i32 = arith.constant 0 : i32
    %c0_i32_0 = arith.constant 0 : i32
    %c0_i32_1 = arith.constant 0 : i32
    return %c0_i32, %c0_i32_0 : i32, i32
  }
  func.func @transform_7(%arg0: i32, %arg1: i32) -> (i32, i32, i32, i32) {
    %c0_i32 = arith.constant 0 : i32
    %c0_i32_0 = arith.constant 0 : i32
    %c0_i32_1 = arith.constant 0 : i32
    return %arg0, %c0_i32, %arg1, %c0_i32_0 : i32, i32, i32, i32
  }
}

</mosaic_0001>

<bundles_post_ra>
// kernel: _lambda_.1
= control target key start
LH: loop header
LB: loop body
LE: loop exit
PB: predicated region body
PF: predicated region fallthrough
CT: control target
= control target key end

     0   :  { %12 = vsyncpa [#allocation3], 0  ;;  %s10006_s0 = inlined_call_operand.vmem [shape: f32[2,2,64,32], index: 0, kind: input, shape index: {}]   ;;  %s10007_s1 = inlined_call_operand.vmem [shape: f32[2,12,64,8], index: 1, kind: input, shape index: {}]   ;;  %s10008_s2 = inlined_call_operand.vmem [shape: f32[5,8,16], index: 2, kind: input, shape index: {}]   ;;  %s10009_s3 = inlined_call_operand.vmem [shape: f32[1,16], index: 3, kind: input, shape index: {}]   ;;  %s10010_s4 = inlined_call_operand.vmem [shape: f32[4,48,16], index: 4, kind: input, shape index: {}]   ;;  %s10011_s5 = inlined_call_operand.vmem [shape: f32[8,16], index: 5, kind: input, shape index: {}]   ;;  %s10012_s6 = inlined_call_operand.vmem [shape: f32[1,16], index: 6, kind: input, shape index: {}]   ;;  %s10013_s7 = inlined_call_operand.hbm [shape: f32[2,8,64,16], index: 7, kind: output, shape index: {}]  }
   0x1   :  { %14 = vsyncpa [#allocation3 + $0x1], 0  ;;  %s8020_s24 = smov 0   ;;  %s8022_s25 = smov 0  }
   0x2   :  { %s8024_s26 = smov 0   ;;  %s8026_s27 = smov 0  }
   0x3   :  { %s8028_s28 = smov 0   ;;  %s8030_s29 = smov 0  }
   0x4 LB: > { %s6162_s30 = sadd.s32 4294967295, %s7975_s29   ;;  %s6163_s8 = sadd.s32 4294967294, %s7975_s29   ;;  %s7975_s29 = sphi %s8030_s29, %s20_s29   ;;  %s7971_s28 = sphi %s8028_s28, %s10244_s28   ;;  %s7967_s27 = sphi %s8026_s27, %s10243_s27   ;;  %s7963_s26 = sphi %s8024_s26, %s10242_s26   ;;  %s7959_s25 = sphi %s8022_s25, %s10241_s25   ;;  %s7955_s24 = sphi %s8020_s24, %s10240_s24  }
   0x5   : > { %s32_s9 = sadd.s32 1, %s7971_s28  ;;  %s202_s10 = sadd.s32 1, %s7963_s26 }
   0x6   : > { %p34_p0 = scmp.ge.s32.totalorder %s32_s9, 2  ;;  %p212_p1 = scmp.ne.s32.totalorder %s7963_s26, %s7959_s25 }
   0x7   : > { %p213_p2 = scmp.eq.s32.totalorder %s6162_s30, 1  ;;  %p218_p3 = scmp.ne.s32.totalorder %s7959_s25, %s7955_s24 }
   0x8   : > { %s10246_s9 = smov (%p34_p0, %s32_s9), 0  ;;  %p219_p5 = scmp.eq.s32.totalorder %s6163_s8, 1 }
   0x9   : > { %p8060_p4 = por %p213_p2, %p212_p1  ;;  %s197_s12 = ssub.s32 %s7971_s28, %s10246_s9 }
   0xa   : > { %p6166_p6 = scmp.ge.s32.totalorder %s7975_s29, 1  ;;  %p200_p7 = scmp.eq.s32.totalorder %s197_s12, 0 }
   0xb   : > { %p8067_p8 = por %p219_p5, %p218_p3  ;;  %p278_p9 = scmp.lt.s32.totalorder %s7975_s29, 3 }
   0xc   : > { %s8073_s14 = scalar_select %p200_p7, %s7963_s26, %s202_s10  }
   0xd   : > { %p279_p10 = pnand %p6166_p6, %p278_p9 }
   0xf   : > { %282 = sbr.rel (%p279_p10) target bundleno = 1003 (0x3eb), region = 48 }
  0x14   : > { %v6179_v0 = vld [vmem:[%s10008_s2 + $0x8] sm:$0xff]  ;;  %v8081_v1 = vld [vmem:[%s10008_s2] sm:$0xff]  ;;  %p324_p11 = scmp.lt.s32.totalorder %s7967_s27, 1  ;;  %v8087_v2 = vld [vmem:[%s10008_s2 + $0x10] sm:$0xff]  ;;  %vm364_vm0 = vcmask 64512   ;;  %vm1931_vm1 = vcmask 261120  }
  0x15   : > { %7045 = vmatprep.subr.mxu0 %v6179_v0  ;;  %7059 = vmatprep.subr.mxu1 %v8081_v1  ;;  %v8093_v3 = vld [vmem:[%s10008_s2 + $0x18] sm:$0xff]  ;;  %v8120_v10 = vld [vmem:[%s10008_s2 + $0x20] sm:$0xff]  ;;  %vm1801_vm2 = vcmask 130048   ;;  %s320_s17 = sand.u32 1, %s7959_s25   ;;  %s6706_s20 = sshll.u32 %s7967_s27, 13 }
  0x16   : > { %7046 = vmatpush3.msra.mxu0 %v6179_v0  ;;  %s8096_s23 = scalar_select %p324_p11, %s7967_s27, 1  ;;  %7060 = vmatpush3.msra.mxu1 %v8081_v1 }
  0x17   : > { %7073 = vmatprep.subr.mxu0 %v8087_v2  ;;  %7087 = vmatprep.subr.mxu1 %v8093_v3  ;;  %s6167_s18 = sshll.u32 %s320_s17, 9  ;;  %s9961_s27 = scalar_lea.sflag [#allocation3], %s320_s17 }
  0x18   : > { %s7585_s30 = smul.u32 768, %s8096_s23  ;;  %s6705_s10 = sshll.u32 %s8096_s23, 7 }
  0x19   : > { %s8434_s21 = scalar_lea.vmem %s10006_s0, %s6705_s10  ;;  %s9713_s19 = scalar_lea.vmem [#allocation2], %s6167_s18 }
  0x1a   : > { %s8105_s12 = scalar_lea.vmem %s10007_s1, %s7585_s30  ;;  %s9952_s30 = scalar_lea.hbm %s10013_s7, %s6706_s20 }
  0x1b   : > { %v6171_v4 = vld [vmem:[%s8105_s12 + $0x40] sm:$0xff]  ;;  %v6172_v6 = vld [vmem:[%s8105_s12 + $0x48] sm:$0xff]  ;;  %v6173_v8 = vld [vmem:[%s8105_s12 + $0x50] sm:$0xff]  ;;  %s7977_s10 = smov [#allocation2]  }
  0x1c   : > { %v344_v5 = vld [vmem:[%s8105_s12] sm:$0xff]  ;;  %7047 = vmatprep.mubr.msk.f32.mxu0 %vm364_vm0, %v6171_v4  ;;  %v345_v7 = vld [vmem:[%s8105_s12 + $0x8] sm:$0xff]  ;;  %v346_v9 = vld [vmem:[%s8105_s12 + $0x10] sm:$0xff]  ;;  %s7903_s15 = sshll.u32 %s7977_s10, 4  ;;  %s7904_s15 = int_to_ptr.vmem [resolvable:$false] %s7903_s15 }
  0x1d   : > { %7061 = vmatprep.mubr.msk.f32.mxu1 %vm364_vm0, %v344_v5  ;;  %7048 = vmatmul.mubr.msk.f32.vlgmr.msra.gmra.mxu0 %vm364_vm0, %v6172_v6  ;;  %v6174_v11 = vld [vmem:[%s8105_s12 + $0x58] sm:$0xff]  ;;  %v6175_v13 = vld [vmem:[%s8105_s12 + $0x60] sm:$0xff]  ;;  %v6176_v15 = vld [vmem:[%s8105_s12 + $0x68] sm:$0xff] }
  0x1e   : > { %7062 = vmatmul.mubr.msk.f32.vlgmr.msra.gmra.mxu1 %vm364_vm0, %v345_v7  ;;  %7074 = vmatpush3.msra.mxu0 %v8087_v2  ;;  %v347_v12 = vld [vmem:[%s8105_s12 + $0x18] sm:$0xff]  ;;  %v348_v14 = vld [vmem:[%s8105_s12 + $0x20] sm:$0xff]  ;;  %v349_v16 = vld [vmem:[%s8105_s12 + $0x28] sm:$0xff] }
  0x1f   : > { %7088 = vmatpush3.msra.mxu1 %v8093_v3  ;;  %7050 = vmatprep.mubr.msk.f32.mxu0 %vm364_vm0, %v6173_v8  ;;  %v6177_v17 = vld [vmem:[%s8105_s12 + $0x70] sm:$0xff]  ;;  %v6178_v19 = vld [vmem:[%s8105_s12 + $0x78] sm:$0xff]  ;;  %v8146_v21 = vld [vmem:[%s8105_s12 + $0x80] sm:$0xff] }
  0x20   : > { %7064 = vmatprep.mubr.msk.f32.mxu1 %vm364_vm0, %v346_v9  ;;  %7101 = vmatprep.subr.mxu0 %v8120_v10  ;;  %v350_v18 = vld [vmem:[%s8105_s12 + $0x30] sm:$0xff]  ;;  %v351_v20 = vld [vmem:[%s8105_s12 + $0x38] sm:$0xff]  ;;  %v8149_v22 = vld [vmem:[%s8105_s12 + $0xc0] sm:$0xff] }
  0x21   : > { %7115 = vmatprep.subr.mxu1 %v6179_v0  ;;  %7051 = vmatmul.mubr.msk.f32.gmra.mxu0 %vm364_vm0, %v6174_v11  ;;  %v8158_v23 = vld [vmem:[%s8105_s12 + $0x88] sm:$0xff]  ;;  %v8164_v25 = vld [vmem:[%s8105_s12 + $0x90] sm:$0xff]  ;;  %v8175_v27 = vld [vmem:[%s8105_s12 + $0x98] sm:$0xff] }
  0x22   : > { %7065 = vmatmul.mubr.msk.f32.gmra.mxu1 %vm364_vm0, %v347_v12  ;;  %7053 = vmatprep.mubr.msk.f32.mxu0 %vm364_vm0, %v6175_v13  ;;  %v8161_v24 = vld [vmem:[%s8105_s12 + $0xc8] sm:$0xff]  ;;  %v8167_v26 = vld [vmem:[%s8105_s12 + $0xd0] sm:$0xff]  ;;  %v8178_v28 = vld [vmem:[%s8105_s12 + $0xd8] sm:$0xff] }
  0x23   : > { %7067 = vmatprep.mubr.msk.f32.mxu1 %vm364_vm0, %v348_v14  ;;  %v8185_v29 = vld [vmem:[%s8105_s12 + $0xa0] sm:$0xff]  ;;  %v8201_v31 = vld [vmem:[%s8105_s12 + $0xa8] sm:$0xff]  ;;  %v8207_v33 = vld [vmem:[%s8105_s12 + $0xb0] sm:$0xff] }
  0x24   : > { %v8188_v30 = vld [vmem:[%s8105_s12 + $0xe0] sm:$0xff]  ;;  %v8204_v32 = vld [vmem:[%s8105_s12 + $0xe8] sm:$0xff]  ;;  %v8210_v34 = vld [vmem:[%s8105_s12 + $0xf0] sm:$0xff] }
  0x25   : > { %7054 = vmatmul.mubr.msk.f32.gmra.mxu0 %vm364_vm0, %v6176_v15  ;;  %10096 = vst [vmem:[#allocation5_spill] sm:$0xff] %v8210_v34  ;;  %v8221_v35 = vld [vmem:[%s8105_s12 + $0xb8] sm:$0xff]  ;;  %v8227_v37 = vld [vmem:[%s8105_s12 + $0x100] sm:$0xff]  ;;  %v8241_v39 = vld [vmem:[%s8105_s12 + $0x108] sm:$0xff] }
  0x26   : > { %7068 = vmatmul.mubr.msk.f32.gmra.mxu1 %vm364_vm0, %v349_v16  ;;  %7056 = vmatprep.mubr.msk.f32.mxu0 %vm364_vm0, %v6177_v17  ;;  %v8224_v36 = vld [vmem:[%s8105_s12 + $0xf8] sm:$0xff]  ;;  %10098 = vst [vmem:[#allocation7_spill] sm:$0xff] %v8227_v37  ;;  %v8230_v38 = vld [vmem:[%s8105_s12 + $0x140] sm:$0xff]  ;;  %10100 = vst [vmem:[#allocation9_spill] sm:$0xff] %v8241_v39 }
  0x27   : > { %7070 = vmatprep.mubr.msk.f32.mxu1 %vm364_vm0, %v350_v18  ;;  %10097 = vst [vmem:[#allocation6_spill] sm:$0xff] %v8224_v36  ;;  %10099 = vst [vmem:[#allocation8_spill] sm:$0xff] %v8230_v38  ;;  %v8244_v40 = vld [vmem:[%s8105_s12 + $0x148] sm:$0xff]  ;;  %v8247_v41 = vld [vmem:[%s8105_s12 + $0x110] sm:$0xff] }
  0x28   : > { %10101 = vst [vmem:[#allocation10_spill] sm:$0xff] %v8244_v40  ;;  %10102 = vst [vmem:[#allocation11_spill] sm:$0xff] %v8247_v41  ;;  %v8250_v42 = vld [vmem:[%s8105_s12 + $0x150] sm:$0xff]  ;;  %v8259_v43 = vld [vmem:[%s8105_s12 + $0x118] sm:$0xff] }
  0x29   : > { %7057 = vmatmul.mubr.msk.f32.gmra.mxu0 %vm364_vm0, %v6178_v19  ;;  %10103 = vst [vmem:[#allocation12_spill] sm:$0xff] %v8250_v42  ;;  %10104 = vst [vmem:[#allocation13_spill] sm:$0xff] %v8259_v43  ;;  %v8262_v44 = vld [vmem:[%s8105_s12 + $0x158] sm:$0xff]  ;;  %v8269_v45 = vld [vmem:[%s8105_s12 + $0x120] sm:$0xff] }
  0x2a   : > { %7071 = vmatmul.mubr.msk.f32.gmra.mxu1 %vm364_vm0, %v351_v20  ;;  %7075 = vmatprep.mubr.msk.f32.mxu0 %vm364_vm0, %v8146_v21  ;;  %10105 = vst [vmem:[#allocation14_spill] sm:$0xff] %v8262_v44  ;;  %10106 = vst [vmem:[#allocation15_spill] sm:$0xff] %v8269_v45  ;;  %v8272_v46 = vld [vmem:[%s8105_s12 + $0x160] sm:$0xff]  ;;  %v8285_v47 = vld [vmem:[%s8105_s12 + $0x128] sm:$0xff] }
  0x2b   : > { %7089 = vmatprep.mubr.msk.f32.mxu1 %vm364_vm0, %v8149_v22  ;;  %10107 = vst [vmem:[#allocation16_spill] sm:$0xff] %v8272_v46  ;;  %10108 = vst [vmem:[#allocation17_spill] sm:$0xff] %v8285_v47  ;;  %v8288_v48 = vld [vmem:[%s8105_s12 + $0x168] sm:$0xff]  ;;  %v8291_v49 = vld [vmem:[%s8105_s12 + $0x130] sm:$0xff] }
  0x2c   : > { %10109 = vst [vmem:[#allocation18_spill] sm:$0xff] %v8288_v48  ;;  %10110 = vst [vmem:[#allocation19_spill] sm:$0xff] %v8291_v49  ;;  %v8294_v50 = vld [vmem:[%s8105_s12 + $0x170] sm:$0xff]  ;;  %v8305_v51 = vld [vmem:[%s8105_s12 + $0x138] sm:$0xff] }
  0x2d   : > { %7076 = vmatmul.mubr.msk.f32.vlgmr.msra.gmra.mxu0 %vm364_vm0, %v8158_v23  ;;  %10111 = vst [vmem:[#allocation20_spill] sm:$0xff] %v8294_v50  ;;  %10112 = vst [vmem:[#allocation21_spill] sm:$0xff] %v8305_v51  ;;  %v8308_v52 = vld [vmem:[%s8105_s12 + $0x178] sm:$0xff]  ;;  %v8311_v53 = vld [vmem:[%s8105_s12 + $0x180] sm:$0xff] }
  0x2e   : > { %7090 = vmatmul.mubr.msk.f32.vlgmr.msra.gmra.mxu1 %vm364_vm0, %v8161_v24  ;;  %7102 = vmatpush3.msra.mxu0 %v8120_v10  ;;  %10113 = vst [vmem:[#allocation22_spill] sm:$0xff] %v8308_v52  ;;  %10114 = vst [vmem:[#allocation23_spill] sm:$0xff] %v8311_v53  ;;  %v8322_v54 = vld [vmem:[%s8105_s12 + $0x188] sm:$0xff]  ;;  %v8325_v55 = vld [vmem:[%s8105_s12 + $0x190] sm:$0xff] }
  0x2f   : > { %7116 = vmatpush3.msra.mxu1 %v6179_v0  ;;  %7078 = vmatprep.mubr.msk.f32.mxu0 %vm364_vm0, %v8164_v25  ;;  %10115 = vst [vmem:[#allocation24_spill] sm:$0xff] %v8322_v54  ;;  %10116 = vst [vmem:[#allocation25_spill] sm:$0xff] %v8325_v55  ;;  %v8334_v56 = vld [vmem:[%s8105_s12 + $0x198] sm:$0xff]  ;;  %v8341_v57 = vld [vmem:[%s8105_s12 + $0x1a0] sm:$0xff] }
  0x30   : > { %7092 = vmatprep.mubr.msk.f32.mxu1 %vm364_vm0, %v8167_v26  ;;  %7129 = vmatprep.subr.mxu0 %v8081_v1  ;;  %10117 = vst [vmem:[#allocation26_spill] sm:$0xff] %v8334_v56  ;;  %10118 = vst [vmem:[#allocation27_spill] sm:$0xff] %v8341_v57  ;;  %v8352_v58 = vld [vmem:[%s8105_s12 + $0x1a8] sm:$0xff]  ;;  %v6278_v59 = vld [vmem:[%s8105_s12 + $0x1b0] sm:$0xff] }
  0x31   : > { %7143 = vmatprep.subr.mxu1 %v8087_v2  ;;  %7079 = vmatmul.mubr.msk.f32.gmra.mxu0 %vm364_vm0, %v8175_v27  ;;  %10119 = vst [vmem:[#allocation28_spill] sm:$0xff] %v8352_v58  ;;  %v6279_v60 = vld [vmem:[%s8105_s12 + $0x1b8] sm:$0xff]  ;;  %v6288_v61 = vld [vmem:[%s8105_s12 + $0x1c0] sm:$0xff]  ;;  %v6289_v63 = vld [vmem:[%s8105_s12 + $0x1c8] sm:$0xff] }
  0x32   : > { %7093 = vmatmul.mubr.msk.f32.gmra.mxu1 %vm364_vm0, %v8178_v28  ;;  %7081 = vmatprep.mubr.msk.f32.mxu0 %vm364_vm0, %v8185_v29  ;;  %v6304_v62 = vld [vmem:[%s8105_s12 + $0x200] sm:$0xff]  ;;  %v6305_v0 = vld [vmem:[%s8105_s12 + $0x208] sm:$0xff]  ;;  %v6307_v4 = vld [vmem:[%s8105_s12 + $0x218] sm:$0xff] }
  0x33   : > { %7095 = vmatprep.mubr.msk.f32.mxu1 %vm364_vm0, %v8188_v30  ;;  %v6292_v5 = vld [vmem:[%s8105_s12 + $0x1e0] sm:$0xff]  ;;  %v6293_v7 = vld [vmem:[%s8105_s12 + $0x1e8] sm:$0xff]  ;;  %v6294_v9 = vld [vmem:[%s8105_s12 + $0x1f0] sm:$0xff] }
  0x34   : > { %v6308_v6 = vld [vmem:[%s8105_s12 + $0x220] sm:$0xff]  ;;  %v6309_v8 = vld [vmem:[%s8105_s12 + $0x228] sm:$0xff]  ;;  %v6295_v11 = vld [vmem:[%s8105_s12 + $0x1f8] sm:$0xff] }
  0x35   : > { %7082 = vmatmul.mubr.msk.f32.gmra.mxu0 %vm364_vm0, %v8201_v31  ;;  %v6311_v12 = vld [vmem:[%s8105_s12 + $0x238] sm:$0xff]  ;;  %v1792_v13 = vld [vmem:[%s10010_s4 + $0x28] sm:$0xff]  ;;  %v8411_v15 = vld [vmem:[%s10010_s4 + $0x10] sm:$0xff] }
  0x36   : > { %7096 = vmatmul.mubr.msk.f32.gmra.mxu1 %vm364_vm0, %v8204_v32  ;;  %7084 = vmatprep.mubr.msk.f32.mxu0 %vm364_vm0, %v8207_v33  ;;  %v8404_v14 = vld [vmem:[%s10010_s4 + $0x18] sm:$0xff]  ;;  %v8418_v16 = vld [vmem:[%s10010_s4 + $0x8] sm:$0xff]  ;;  %v1791_v17 = vld [vmem:[%s10010_s4 + $0x20] sm:$0xff] }
  0x37   : > { %7098 = vmatprep.mubr.msk.f32.mxu1 %vm364_vm0, %v8210_v34  ;;  %v8429_v18 = vld [vmem:[%s10010_s4] sm:$0xff]  ;;  %v8442_v20 = vld [vmem:[%s8434_s21 + $0x8] sm:$0xff] }
  0x38   : > { %v8438_v19 = vld [vmem:[%s8434_s21] sm:$0xff]  ;;  %10121 = vst [vmem:[#allocation30_spill] sm:$0xff] %v8442_v20 }
  0x39   : > { %7085 = vmatmul.mubr.msk.f32.gmra.mxu0 %vm364_vm0, %v8221_v35  ;;  %10120 = vst [vmem:[#allocation29_spill] sm:$0xff] %v8438_v19 }
  0x3a   : > { %7099 = vmatmul.mubr.msk.f32.gmra.mxu1 %vm364_vm0, %v8224_v36  ;;  %7103 = vmatprep.mubr.msk.f32.mxu0 %vm364_vm0, %v8227_v37 }
  0x3b   : > { %7117 = vmatprep.mubr.msk.f32.mxu1 %vm364_vm0, %v8230_v38 }
  0x3d   : > { %7104 = vmatmul.mubr.msk.f32.vlgmr.msra.gmra.mxu0 %vm364_vm0, %v8241_v39 }
  0x3e   : > { %7118 = vmatmul.mubr.msk.f32.vlgmr.msra.gmra.mxu1 %vm364_vm0, %v8244_v40  ;;  %7130 = vmatpush3.msra.mxu0 %v8081_v1  ;;  %v6290_v1 = vld [vmem:[%s8105_s12 + $0x1d0] sm:$0xff] }
  0x3f   : > { %7144 = vmatpush3.msra.mxu1 %v8087_v2  ;;  %7106 = vmatprep.mubr.msk.f32.mxu0 %vm364_vm0, %v8247_v41  ;;  %v6306_v2 = vld [vmem:[%s8105_s12 + $0x210] sm:$0xff] }
  0x40   : > { %7120 = vmatprep.mubr.msk.f32.mxu1 %vm364_vm0, %v8250_v42  ;;  %7157 = vmatprep.subr.mxu0 %v8093_v3 }
  0x41   : > { %7171 = vmatprep.subr.mxu1 %v8120_v10  ;;  %7107 = vmatmul.mubr.msk.f32.gmra.mxu0 %vm364_vm0, %v8259_v43 }
  0x42   : > { %7121 = vmatmul.mubr.msk.f32.gmra.mxu1 %vm364_vm0, %v8262_v44  ;;  %7109 = vmatprep.mubr.msk.f32.mxu0 %vm364_vm0, %v8269_v45 }
  0x43   : > { %7123 = vmatprep.mubr.msk.f32.mxu1 %vm364_vm0, %v8272_v46 }
  0x45   : > { %7110 = vmatmul.mubr.msk.f32.gmra.mxu0 %vm364_vm0, %v8285_v47 }
  0x46   : > { %7124 = vmatmul.mubr.msk.f32.gmra.mxu1 %vm364_vm0, %v8288_v48  ;;  %7112 = vmatprep.mubr.msk.f32.mxu0 %vm364_vm0, %v8291_v49 }
  0x47   : > { %7126 = vmatprep.mubr.msk.f32.mxu1 %vm364_vm0, %v8294_v50 }
  0x49   : > { %7113 = vmatmul.mubr.msk.f32.gmra.mxu0 %vm364_vm0, %v8305_v51 }
  0x4a   : > { %7127 = vmatmul.mubr.msk.f32.gmra.mxu1 %vm364_vm0, %v8308_v52  ;;  %7131 = vmatprep.mubr.msk.f32.mxu0 %vm364_vm0, %v8227_v37 }
  0x4b   : > { %7145 = vmatprep.mubr.msk.f32.mxu1 %vm364_vm0, %v8311_v53 }
  0x4d   : > { %7132 = vmatmul.mubr.msk.f32.vlgmr.msra.gmra.mxu0 %vm364_vm0, %v8241_v39 }
  0x4e   : > { %7146 = vmatmul.mubr.msk.f32.vlgmr.msra.gmra.mxu1 %vm364_vm0, %v8322_v54  ;;  %7158 = vmatpush3.msra.mxu0 %v8093_v3  ;;  %v6291_v3 = vld [vmem:[%s8105_s12 + $0x1d8] sm:$0xff] }
  0x4f   : > { %7172 = vmatpush3.msra.mxu1 %v8120_v10  ;;  %7134 = vmatprep.mubr.msk.f32.mxu0 %vm364_vm0, %v8247_v41  ;;  %v6310_v10 = vld [vmem:[%s8105_s12 + $0x230] sm:$0xff] }
  0x50   : > { %7148 = vmatprep.mubr.msk.f32.mxu1 %vm364_vm0, %v8325_v55  ;;  %7185 = vmatprep.subr.mxu0 %v1792_v13 }
  0x51   : > { %7135 = vmatmul.mubr.msk.f32.gmra.mxu0 %vm364_vm0, %v8259_v43  ;;  %7201 = vmatprep.subr.mxu1 %v8404_v14 }
  0x52   : > { %7149 = vmatmul.mubr.msk.f32.gmra.mxu1 %vm364_vm0, %v8334_v56  ;;  %7137 = vmatprep.mubr.msk.f32.mxu0 %vm364_vm0, %v8269_v45 }
  0x53   : > { %7151 = vmatprep.mubr.msk.f32.mxu1 %vm364_vm0, %v8341_v57 }
  0x55   : > { %7138 = vmatmul.mubr.msk.f32.gmra.mxu0 %vm364_vm0, %v8285_v47 }
  0x56   : > { %7152 = vmatmul.mubr.msk.f32.gmra.mxu1 %vm364_vm0, %v8352_v58  ;;  %7140 = vmatprep.mubr.msk.f32.mxu0 %vm364_vm0, %v8291_v49 }
  0x57   : > { %7154 = vmatprep.mubr.msk.f32.mxu1 %vm364_vm0, %v6278_v59  ;;  %v8449_v59 = vld [vmem:[%s8434_s21 + $0x10] sm:$0xff] }
  0x58   : > { %10122 = vst [vmem:[#allocation31_spill] sm:$0xff] %v8449_v59 }
  0x59   : > { %7141 = vmatmul.mubr.msk.f32.gmra.mxu0 %vm364_vm0, %v8305_v51 }
  0x5a   : > { %7155 = vmatmul.mubr.msk.f32.gmra.mxu1 %vm364_vm0, %v6279_v60  ;;  %7159 = vmatprep.mubr.msk.f32.mxu0 %vm364_vm0, %v6288_v61  ;;  %v8454_v60 = vld [vmem:[%s8434_s21 + $0x18] sm:$0xff]  ;;  %v8459_v61 = vld [vmem:[%s10011_s5] sm:$0xff] }
  0x5b   : > { %7173 = vmatprep.mubr.msk.f32.mxu1 %vm364_vm0, %v6304_v62  ;;  %10123 = vst [vmem:[#allocation32_spill] sm:$0xff] %v8454_v60  ;;  %v8465_v62 = vld [vmem:[%s8434_s21 + $0x20] sm:$0xff] }
  0x5c   : > { %10124 = vst [vmem:[#allocation33_spill] sm:$0xff] %v8465_v62 }
  0x5d   : > { %7160 = vmatmul.mubr.msk.f32.vlgmr.msra.gmra.mxu0 %vm364_vm0, %v6289_v63  ;;  %v8471_v63 = vld [vmem:[%s8434_s21 + $0x28] sm:$0xff] }
  0x5e   : > { %7174 = vmatmul.mubr.msk.f32.vlgmr.msra.gmra.mxu1 %vm364_vm0, %v6305_v0  ;;  %7162 = vmatprep.mubr.msk.f32.mxu0 %vm364_vm0, %v6290_v1  ;;  %10125 = vst [vmem:[#allocation34_spill] sm:$0xff] %v8471_v63  ;;  %v8476_v0 = vld [vmem:[%s8434_s21 + $0x30] sm:$0xff]  ;;  %v8481_v1 = vld [vmem:[%s8434_s21 + $0x38] sm:$0xff] }
  0x5f   : > { %7176 = vmatprep.mubr.msk.f32.mxu1 %vm364_vm0, %v6306_v2  ;;  %7186 = vmatpush3.msra.mxu0 %v1792_v13  ;;  %10126 = vst [vmem:[#allocation35_spill] sm:$0xff] %v8476_v0  ;;  %10127 = vst [vmem:[#allocation36_spill] sm:$0xff] %v8481_v1 }
  0x60   : > { %7202 = vmatpush3.msra.mxu1 %v8404_v14  ;;  %7187 = vmatprep.subr.mxu0 %v1791_v17 }
  0x61   : > { %7163 = vmatmul.mubr.msk.f32.gmra.mxu0 %vm364_vm0, %v6291_v3  ;;  %7203 = vmatprep.subr.mxu1 %v8411_v15 }
  0x62   : > { %7177 = vmatmul.mubr.msk.f32.gmra.mxu1 %vm364_vm0, %v6307_v4  ;;  %7165 = vmatprep.mubr.msk.f32.mxu0 %vm364_vm0, %v6292_v5 }
  0x63   : > { %7179 = vmatprep.mubr.msk.f32.mxu1 %vm364_vm0, %v6308_v6  ;;  %7204 = vmatpush3.msra.mxu1 %v8411_v15 }
  0x64   : > { %7205 = vmatprep.subr.mxu1 %v8418_v16  ;;  %7188 = vmatpush3.msra.mxu0 %v1791_v17 }
  0x65   : > { %7166 = vmatmul.mubr.msk.f32.gmra.mxu0 %vm364_vm0, %v6293_v7  ;;  %7206 = vmatpush3.msra.mxu1 %v8418_v16 }
  0x66   : > { %7180 = vmatmul.mubr.msk.f32.gmra.mxu1 %vm364_vm0, %v6309_v8  ;;  %7168 = vmatprep.mubr.msk.f32.mxu0 %vm364_vm0, %v6294_v9 }
  0x67   : > { %7182 = vmatprep.mubr.msk.f32.mxu1 %vm364_vm0, %v6310_v10  ;;  %7207 = vmatprep.subr.mxu1 %v8429_v18 }
  0x68   : > { %7208 = vmatpush3.msra.mxu1 %v8429_v18  ;;  %7221 = vmatprep.subr.mxu0 %v8459_v61 }
  0x69   : > { %7169 = vmatmul.mubr.msk.f32.gmra.mxu0 %vm364_vm0, %v6295_v11  ;;  %7235 = vmatprep.subr.mxu1 %v1792_v13 }
  0x6a   : > { %7183 = vmatmul.mubr.msk.f32.gmra.mxu1 %vm364_vm0, %v6311_v12 }
  0x6b   : > { %7209 = vmatprep.mubr.msk.f32.mxu1 %vm1931_vm1, %v8438_v19 }
  0x6e   : > { %7210 = vmatmul.mubr.msk.f32.vlgmr.msra.gmra.mxu1 %vm1931_vm1, %v8442_v20 }
  0x6f   : > { %7236 = vmatpush3.msra.mxu1 %v1792_v13  ;;  %7212 = vmatprep.mubr.msk.f32.mxu1 %vm1931_vm1, %v8449_v59 }
  0x70   : > { %7237 = vmatprep.subr.mxu1 %v1791_v17 }
  0x71   : > { %7238 = vmatpush3.msra.mxu1 %v1791_v17 }
  0x72   : > { %7213 = vmatmul.mubr.msk.f32.gmra.mxu1 %vm1931_vm1, %v8454_v60  ;;  %7271 = vmatprep.subr.mxu1 %v8459_v61 }
  0x73   : > { %7215 = vmatprep.mubr.msk.f32.mxu1 %vm1931_vm1, %v8465_v62 }
  0x76   : > { %7216 = vmatmul.mubr.msk.f32.gmra.mxu1 %vm1931_vm1, %v8471_v63 }
  0x77   : > { %7218 = vmatprep.mubr.msk.f32.mxu1 %vm1931_vm1, %v8476_v0 }
  0x7a   : > { %7219 = vmatmul.mubr.msk.f32.gmra.mxu1 %vm1931_vm1, %v8481_v1 }
  0xdd   : > { %v7049_v2 = vpop.f32.mrf.mxu0 }
  0xde   : > { %v7063_v3 = vpop.f32.mrf.mxu1 }
  0xdf   : > { %v455_v4 = vpop.f32.mrf.mxu0  ;;  %v590_v38 = vadd.f32 %v7063_v3, %v7049_v2 }
  0xe0   : > { %v584_v5 = vpop.f32.mrf.mxu1 }
  0xe1   : > { %v7052_v6 = vpop.f32.mrf.mxu0  ;;  %v585_v0 = vadd.f32 %v584_v5, %v455_v4 }
  0xe2   : > { %v7066_v7 = vpop.f32.mrf.mxu1 }
  0xe3   : > { %v465_v8 = vpop.f32.mrf.mxu0  ;;  %v600_v62 = vadd.f32 %v7066_v7, %v7052_v6 }
  0xe4   : > { %v594_v9 = vpop.f32.mrf.mxu1 }
  0xe5   : > { %v7055_v10 = vpop.f32.mrf.mxu0  ;;  %v595_v59 = vadd.f32 %v594_v9, %v465_v8 }
  0xe6   : > { %v7069_v11 = vpop.f32.mrf.mxu1 }
  0xe7   : > { %v475_v12 = vpop.f32.mrf.mxu0  ;;  %v610_v36 = vadd.f32 %v7069_v11, %v7055_v10 }
  0xe8   : > { %v604_v13 = vpop.f32.mrf.mxu1 }
  0xe9   : > { %v7058_v17 = vpop.f32.mrf.mxu0 }
  0xea   : > { %v7072_v58 = vpop.f32.mrf.mxu1 }
  0xeb   : > { %v485_v57 = vpop.f32.mrf.mxu0 }
  0xec   : > { %v614_v56 = vpop.f32.mrf.mxu1 }
  0xed   : > { %v7077_v55 = vpop.f32.mrf.mxu0 }
  0xee   : > { %v7091_v54 = vpop.f32.mrf.mxu1  ;;  %v764_v63 = vadd.f32 %v7077_v55, %v590_v38  ;;  %v8490_v38 = vld [vmem:[%s10009_s3] ss:$0 sm:$0xff] }
  0xef   : > { %v724_v52 = vpop.f32.mrf.mxu0 }
  0xf0   : > { %v872_v53 = vpop.f32.mrf.mxu1  ;;  %v763_v60 = vadd.f32 %v724_v52, %v585_v0  ;;  %v912_v20 = vadd.f32 %v7091_v54, %v764_v63  ;;  %v605_v52 = vadd.f32 %v604_v13, %v475_v12 }
  0xf1   : > { %v7080_v50 = vpop.f32.mrf.mxu0 }
  0xf2   : > { %v7094_v48 = vpop.f32.mrf.mxu1  ;;  %v766_v41 = vadd.f32 %v7080_v50, %v600_v62  ;;  %v911_v37 = vadd.f32 %v872_v53, %v763_v60  ;;  %v620_v50 = vadd.f32 %v7072_v58, %v7058_v17 }
  0xf3   : > { %v734_v46 = vpop.f32.mrf.mxu0 }
  0xf4   : > { %v882_v44 = vpop.f32.mrf.mxu1  ;;  %v765_v34 = vadd.f32 %v734_v46, %v595_v59  ;;  %v914_v0 = vadd.f32 %v7094_v48, %v766_v41  ;;  %v615_v59 = vadd.f32 %v614_v56, %v485_v57 }
  0xf5   : > { %v7083_v42 = vpop.f32.mrf.mxu0 }
  0xf6   : > { %v7097_v40 = vpop.f32.mrf.mxu1  ;;  %v768_v4 = vadd.f32 %v7083_v42, %v610_v36  ;;  %v913_v46 = vadd.f32 %v882_v44, %v765_v34 }
  0xf7   : > { %v744_v1 = vpop.f32.mrf.mxu0 }
  0xf8   : > { %v892_v51 = vpop.f32.mrf.mxu1  ;;  %v916_v7 = vadd.f32 %v7097_v40, %v768_v4 }
  0xf9   : > { %v7086_v49 = vpop.f32.mrf.mxu0 }
  0xfa   : > { %v7100_v47 = vpop.f32.mrf.mxu1  ;;  %v770_v41 = vadd.f32 %v7086_v49, %v620_v50 }
  0xfb   : > { %v754_v45 = vpop.f32.mrf.mxu0 }
  0xfc   : > { %v902_v43 = vpop.f32.mrf.mxu1  ;;  %v918_v8 = vadd.f32 %v7100_v47, %v770_v41 }
  0xfd   : > { %v7105_v39 = vpop.f32.mrf.mxu0 }
  0xfe   : > { %v8485_v19 = vpop.f32.mrf.mxu1  ;;  %v1060_v2 = vadd.f32 %v7105_v39, %v912_v20  ;;  %v767_v39 = vadd.f32 %v744_v1, %v605_v52  ;;  %v769_v1 = vadd.f32 %v754_v45, %v615_v59 }
  0xff   : > { %v1020_v55 = vpop.f32.mrf.mxu0 }
 0x100   : > { %v8492_v3 = vpop.f32.mrf.mxu1  ;;  %v1059_v54 = vadd.f32 %v1020_v55, %v911_v37  ;;  %v1075_v62 = vadd.f32 %v8490_v38, %v1060_v2  ;;  %v915_v44 = vadd.f32 %v892_v51, %v767_v39  ;;  %v917_v13 = vadd.f32 %v902_v43, %v769_v1 }
 0x101   : > { %v7108_v63 = vpop.f32.mrf.mxu0 }
 0x102   : > { %v8495_v5 = vpop.f32.mrf.mxu1  ;;  %v1074_v53 = vadd.f32 %v8490_v38, %v1059_v54  ;;  %v1062_v20 = vadd.f32 %v7108_v63, %v914_v0  ;;  %v8502_v42 = vmax.f32 %v1075_v62, 0.0 }
 0x103   : > { %v1030_v60 = vpop.f32.mrf.mxu0 }
 0x104   : > { %v8498_v6 = vpop.f32.mrf.mxu1  ;;  %v8500_v36 = vmax.f32 %v1074_v53, 0.0  ;;  %v1061_v37 = vadd.f32 %v1030_v60, %v913_v46  ;;  %v1077_v48 = vadd.f32 %v8490_v38, %v1062_v20 }
 0x105   : > { %v7111_v58 = vpop.f32.mrf.mxu0 }
 0x106   : > { %v8505_v34 = vpop.f32.mrf.mxu1  ;;  %v1076_v56 = vadd.f32 %v8490_v38, %v1061_v37  ;;  %v1064_v57 = vadd.f32 %v7111_v58, %v916_v7  ;;  %7189 = vmatprep.mubr.msk.f32.mxu0 %vm1801_vm2, %v8500_v36  ;;  %v8517_v51 = vmax.f32 %v1077_v48, 0.0 }
 0x107   : > { %v1040_v40 = vpop.f32.mrf.mxu0  ;;  %7190 = vmatmul.mubr.msk.f32.vlgmr.msra.gmra.mxu0 %vm1801_vm2, %v8502_v42 }
 0x108   : > { %v8510_v49 = vpop.f32.mrf.mxu1  ;;  %v8514_v9 = vmax.f32 %v1076_v56, 0.0  ;;  %v1063_v10 = vadd.f32 %v1040_v40, %v915_v44  ;;  %7222 = vmatpush3.msra.mxu0 %v8459_v61  ;;  %v1079_v45 = vadd.f32 %v8490_v38, %v1064_v57 }
 0x109   : > { %v7114_v11 = vpop.f32.mrf.mxu0  ;;  %7251 = vmatprep.subr.mxu0 %v8404_v14 }
 0x10a   : > { %v8520_v12 = vpop.f32.mrf.mxu1  ;;  %v1078_v17 = vadd.f32 %v8490_v38, %v1063_v10  ;;  %v1066_v2 = vadd.f32 %v7114_v11, %v918_v8  ;;  %7192 = vmatprep.mubr.msk.f32.mxu0 %vm1801_vm2, %v8514_v9  ;;  %v8532_v4 = vmax.f32 %v1079_v45, 0.0 }
 0x10b   : > { %v1050_v47 = vpop.f32.mrf.mxu0  ;;  %7193 = vmatmul.mubr.msk.f32.gmra.mxu0 %vm1801_vm2, %v8517_v51 }
 0x10c   : > { %v8526_v55 = vpop.f32.mrf.mxu1  ;;  %v8530_v52 = vmax.f32 %v1078_v17, 0.0  ;;  %v1065_v0 = vadd.f32 %v1050_v47, %v917_v13  ;;  %v1081_v54 = vadd.f32 %v8490_v38, %v1066_v2  ;;  %v8584_v17 = vld [vmem:[%s8434_s21 + $0x40] sm:$0xff] }
 0x10d   : > { %v7133_v43 = vpop.f32.mrf.mxu0 }
 0x10e   : > { %v7147_v50 = vpop.f32.mrf.mxu1  ;;  %v1080_v62 = vadd.f32 %v8490_v38, %v1065_v0  ;;  %7195 = vmatprep.mubr.msk.f32.mxu0 %vm1801_vm2, %v8530_v52  ;;  %v8542_v53 = vmax.f32 %v1081_v54, 0.0  ;;  %v1300_v44 = vadd.f32 %v7133_v43, %v8485_v19 }
 0x10f   : > { %v1294_v63 = vpop.f32.mrf.mxu0  ;;  %7196 = vmatmul.mubr.msk.f32.gmra.mxu0 %vm1801_vm2, %v8532_v4 }
 0x110   : > { %v1432_v46 = vpop.f32.mrf.mxu1  ;;  %v8540_v39 = vmax.f32 %v1080_v62, 0.0 }
 0x111   : > { %v7136_v20 = vpop.f32.mrf.mxu0 }
 0x112   : > { %v7150_v59 = vpop.f32.mrf.mxu1  ;;  %7198 = vmatprep.mubr.msk.f32.mxu0 %vm1801_vm2, %v8540_v39 }
 0x113   : > { %v1304_v60 = vpop.f32.mrf.mxu0  ;;  %7199 = vmatmul.mubr.msk.f32.gmra.mxu0 %vm1801_vm2, %v8542_v53 }
 0x114   : > { %v1442_v7 = vpop.f32.mrf.mxu1  ;;  %7223 = vmatprep.mubr.msk.f32.mxu0 %vm364_vm0, %v8146_v21  ;;  %v1295_v21 = vadd.f32 %v1294_v63, %v8492_v3  ;;  %v1305_v3 = vadd.f32 %v1304_v60, %v8498_v6  ;;  %v8594_v63 = vld [vmem:[%s8434_s21 + $0x48] sm:$0xff] }
 0x115   : > { %v7139_v41 = vpop.f32.mrf.mxu0 }
 0x116   : > { %v7153_v37 = vpop.f32.mrf.mxu1  ;;  %v1320_v10 = vadd.f32 %v7139_v41, %v8505_v34  ;;  %v1473_v2 = vadd.f32 %v1442_v7, %v1305_v3 }
 0x117   : > { %v1314_v48 = vpop.f32.mrf.mxu0  ;;  %7224 = vmatmul.mubr.msk.f32.vlgmr.msra.gmra.mxu0 %vm364_vm0, %v8158_v23  ;;  %v1472_v23 = vadd.f32 %v7147_v50, %v1300_v44 }
 0x118   : > { %v1452_v58 = vpop.f32.mrf.mxu1  ;;  %7226 = vmatprep.mubr.msk.f32.mxu0 %vm364_vm0, %v8164_v25  ;;  %7252 = vmatpush3.msra.mxu0 %v8404_v14  ;;  %v1310_v25 = vadd.f32 %v7136_v20, %v8495_v5  ;;  %v8571_v14 = vld [vmem:[%s10010_s4 + $0x58] sm:$0xff]  ;;  %v1315_v6 = vadd.f32 %v1314_v48, %v8510_v49 }
 0x119   : > { %v7142_v1 = vpop.f32.mrf.mxu0  ;;  %7253 = vmatprep.subr.mxu0 %v8411_v15 }
 0x11a   : > { %v7156_v56 = vpop.f32.mrf.mxu1  ;;  %7254 = vmatpush3.msra.mxu0 %v8411_v15  ;;  %v1330_v0 = vadd.f32 %v7142_v1, %v8520_v12 }
 0x11b   : > { %v1324_v57 = vpop.f32.mrf.mxu0  ;;  %7227 = vmatmul.mubr.msk.f32.gmra.mxu0 %vm364_vm0, %v8175_v27  ;;  %7255 = vmatprep.subr.mxu0 %v8418_v16  ;;  %v1471_v27 = vadd.f32 %v1432_v46, %v1295_v21  ;;  %v1475_v46 = vadd.f32 %v1452_v58, %v1315_v6 }
 0x11c   : > { %v8559_v40 = vpop.f32.mrf.mxu1  ;;  %7229 = vmatprep.mubr.msk.f32.mxu0 %vm364_vm0, %v8185_v29  ;;  %7256 = vmatpush3.msra.mxu0 %v8418_v16  ;;  %v1474_v16 = vadd.f32 %v7150_v59, %v1310_v25  ;;  %v8597_v59 = vld [vmem:[%s8434_s21 + $0x50] sm:$0xff]  ;;  %v1325_v60 = vadd.f32 %v1324_v57, %v8526_v55  ;;  %v8623_v25 = vld [vmem:[%s10010_s4 + $0x48] sm:$0xff] }
 0x11d   : > { %v7161_v15 = vpop.f32.mrf.mxu0  ;;  %7257 = vmatprep.subr.mxu0 %v8429_v18  ;;  %v8610_v55 = vld [vmem:[%s10010_s4 + $0x50] sm:$0xff] }
 0x11e   : > { %v7175_v19 = vpop.f32.mrf.mxu1  ;;  %v1618_v8 = vadd.f32 %v7161_v15, %v1472_v23  ;;  %7258 = vmatpush3.msra.mxu0 %v8429_v18  ;;  %v1477_v3 = vadd.f32 %v8559_v40, %v1325_v60  ;;  %v10137_v60 = vld [vmem:[#allocation15_spill] sm:$0xff] }
 0x11f   : > { %v1578_v5 = vpop.f32.mrf.mxu0  ;;  %7230 = vmatmul.mubr.msk.f32.gmra.mxu0 %vm364_vm0, %v8201_v31  ;;  %7285 = vmatprep.subr.mxu0 %v8571_v14 }
 0x120   : > { %v1724_v29 = vpop.f32.mrf.mxu1  ;;  %v1764_v45 = vadd.f32 %v7175_v19, %v1618_v8  ;;  %v1617_v11 = vadd.f32 %v1578_v5, %v1471_v27  ;;  %7232 = vmatprep.mubr.msk.f32.mxu0 %vm364_vm0, %v8207_v33  ;;  %v1476_v33 = vadd.f32 %v7153_v37, %v1320_v10  ;;  %v1478_v37 = vadd.f32 %v7156_v56, %v1330_v0  ;;  %v8618_v56 = vld [vmem:[%s8434_s21 + $0x58] sm:$0xff]  ;;  %v8629_v27 = vld [vmem:[%s8434_s21 + $0x60] sm:$0xff] }
 0x121   : > { %v7164_v13 = vpop.f32.mrf.mxu0 }
 0x122   : > { %v7178_v18 = vpop.f32.mrf.mxu1  ;;  %v1763_v47 = vadd.f32 %v1724_v29, %v1617_v11  ;;  %v1620_v31 = vadd.f32 %v7164_v13, %v1474_v16  ;;  %v1772_v34 = vadd.f32 %v8490_v38, %v1764_v45  ;;  %v8648_v13 = vld [vmem:[%s8434_s21 + $0x68] sm:$0xff] }
 0x123   : > { %v1588_v54 = vpop.f32.mrf.mxu0  ;;  %7233 = vmatmul.mubr.msk.f32.gmra.mxu0 %vm364_vm0, %v8221_v35 }
 0x124   : > { %v1734_v43 = vpop.f32.mrf.mxu1  ;;  %v1771_v49 = vadd.f32 %v8490_v38, %v1763_v47  ;;  %v1766_v50 = vadd.f32 %v7178_v18, %v1620_v31  ;;  %v1619_v62 = vadd.f32 %v1588_v54, %v1473_v2  ;;  %7259 = vmatprep.mubr.msk.f32.mxu0 %vm1931_vm1, %v8584_v17  ;;  %v8602_v48 = vmax.f32 %v1772_v34, 0.0  ;;  %v8653_v2 = vld [vmem:[%s8434_s21 + $0x70] sm:$0xff] }
 0x125   : > { %v7167_v20 = vpop.f32.mrf.mxu0 }
 0x126   : > { %v7181_v12 = vpop.f32.mrf.mxu1  ;;  %v8600_v7 = vmax.f32 %v1771_v49, 0.0  ;;  %v1765_v35 = vadd.f32 %v1734_v43, %v1619_v62  ;;  %v1622_v41 = vadd.f32 %v7167_v20, %v1476_v33  ;;  %v1774_v44 = vadd.f32 %v8490_v38, %v1766_v50  ;;  %v8670_v43 = vld [vmem:[%s8434_s21 + $0x78] sm:$0xff]  ;;  %v10131_v50 = vld [vmem:[#allocation29_spill] sm:$0xff]  ;;  %v10135_v20 = vld [vmem:[#allocation31_spill] sm:$0xff]  ;;  %s6065_s21 = sshll.u32 %s9713_s19, 4  ;;  %s9954_s21 = int_to_ptr.vmem [resolvable:$true] %s6065_s21 }
 0x127   : > { %v1598_v1 = vpop.f32.mrf.mxu0  ;;  %7260 = vmatmul.mubr.msk.f32.vlgmr.msra.gmra.mxu0 %vm1931_vm1, %v8594_v63  ;;  %v10132_v62 = vld [vmem:[#allocation9_spill] sm:$0xff]  ;;  %s7899_s8 = scalar_lea.vmem %s9954_s21, 8192  ;;  %p7906_p1 = scmp.lt.s32.totalorder %s9954_s21, %s7904_s15 }
 0x128   : > { %v1744_v21 = vpop.f32.mrf.mxu1  ;;  %v1773_v58 = vadd.f32 %v8490_v38, %v1765_v35  ;;  %v1768_v57 = vadd.f32 %v7181_v12, %v1622_v41  ;;  %v1621_v23 = vadd.f32 %v1598_v1, %v1475_v46  ;;  %7239 = vmatprep.mubr.msk.f32.mxu1 %vm1801_vm2, %v8600_v7  ;;  %7262 = vmatprep.mubr.msk.f32.mxu0 %vm1931_vm1, %v8597_v59  ;;  %v8636_v16 = vmax.f32 %v1774_v44, 0.0  ;;  %v10134_v46 = vld [vmem:[#allocation30_spill] sm:$0xff]  ;;  %v10136_v12 = vld [vmem:[#allocation13_spill] sm:$0xff]  ;;  %v10138_v35 = vld [vmem:[#allocation32_spill] sm:$0xff]  ;;  %p7900_p12 = scmp.ne.s32.totalorder %s9954_s21, %s7899_s8 }
 0x129   : > { %v7170_v15 = vpop.f32.mrf.mxu0  ;;  %7240 = vmatmul.mubr.msk.f32.vlgmr.msra.gmra.mxu1 %vm1801_vm2, %v8602_v48  ;;  %7286 = vmatpush3.msra.mxu0 %v8571_v14  ;;  %v10139_v41 = vld [vmem:[#allocation33_spill] sm:$0xff]  ;;  %v8761_v44 = vld [vmem:[%s10010_s4 + $0x88] sm:$0xff] }
 0x12a   : > { %v7184_v19 = vpop.f32.mrf.mxu1  ;;  %v8632_v8 = vmax.f32 %v1773_v58, 0.0  ;;  %v1767_v5 = vadd.f32 %v1744_v21, %v1621_v23  ;;  %v1624_v29 = vadd.f32 %v7170_v15, %v1478_v37  ;;  %7272 = vmatpush3.msra.mxu1 %v8459_v61  ;;  %7287 = vmatprep.subr.mxu0 %v8610_v55  ;;  %v1776_v10 = vadd.f32 %v8490_v38, %v1768_v57  ;;  %v10141_v37 = vld [vmem:[#allocation19_spill] sm:$0xff]  ;;  %v10142_v1 = vld [vmem:[#allocation34_spill] sm:$0xff]  ;;  %v10145_v58 = vld [vmem:[#allocation36_spill] sm:$0xff]  ;;  %p7901_p13 = pnand %p7900_p12, %p8060_p4 }
 0x12b   : > { %v1608_v45 = vpop.f32.mrf.mxu0  ;;  %7263 = vmatmul.mubr.msk.f32.gmra.mxu0 %vm1931_vm1, %v8618_v56  ;;  %7301 = vmatprep.subr.mxu1 %v8623_v25  ;;  %v10143_v21 = vld [vmem:[#allocation35_spill] sm:$0xff]  ;;  %v8779_v57 = vld [vmem:[%s10010_s4 + $0x80] sm:$0xff]  ;;  %v6499_v23 = vld [vmem:[%s10010_s4 + $0x78] sm:$0xff] }
 0x12c   : > { %v1775_v40 = vadd.f32 %v8490_v38, %v1767_v5  ;;  %v1770_v11 = vadd.f32 %v7184_v19, %v1624_v29  ;;  %v1623_v6 = vadd.f32 %v1608_v45, %v1477_v3  ;;  %7242 = vmatprep.mubr.msk.f32.mxu1 %vm1801_vm2, %v8632_v8  ;;  %7265 = vmatprep.mubr.msk.f32.mxu0 %vm1931_vm1, %v8629_v27  ;;  %v1754_v18 = vpop.f32.mrf.mxu1  ;;  %v8659_v0 = vmax.f32 %v1776_v10, 0.0  ;;  %v6498_v15 = vld [vmem:[%s10010_s4 + $0x70] sm:$0xff]  ;;  %v10147_v19 = vld [vmem:[#allocation10_spill] sm:$0xff]  ;;  %v10148_v3 = vld [vmem:[#allocation12_spill] sm:$0xff]  ;;  %p7902_p0 = pneg %p7901_p13 }
 0x12d   : > { %7243 = vmatmul.mubr.msk.f32.gmra.mxu1 %vm1801_vm2, %v8636_v16  ;;  %7288 = vmatpush3.msra.mxu0 %v8610_v55  ;;  %v6497_v5 = vld [vmem:[%s10010_s4 + $0x68] sm:$0xff]  ;;  %v6496_v29 = vld [vmem:[%s10010_s4 + $0x60] sm:$0xff]  ;;  %v10150_v45 = vld [vmem:[#allocation16_spill] sm:$0xff] }
 0x12e   : > { %v8656_v47 = vmax.f32 %v1775_v40, 0.0  ;;  %v1769_v31 = vadd.f32 %v1754_v18, %v1623_v6  ;;  %7321 = vmatprep.subr.mxu0 %v8459_v61  ;;  %v1778_v34 = vadd.f32 %v8490_v38, %v1770_v11  ;;  %v10149_v10 = vld [vmem:[#allocation14_spill] sm:$0xff]  ;;  %v10152_v11 = vld [vmem:[#allocation20_spill] sm:$0xff]  ;;  %v10153_v6 = vld [vmem:[#allocation23_spill] sm:$0xff] }
 0x12f   : > { %7266 = vmatmul.mubr.msk.f32.gmra.mxu0 %vm1931_vm1, %v8648_v13  ;;  %v10151_v40 = vld [vmem:[#allocation18_spill] sm:$0xff] }
 0x130   : > { %v1777_v54 = vadd.f32 %v8490_v38, %v1769_v31  ;;  %7245 = vmatprep.mubr.msk.f32.mxu1 %vm1801_vm2, %v8656_v47  ;;  %7268 = vmatprep.mubr.msk.f32.mxu0 %vm1931_vm1, %v8653_v2  ;;  %v8676_v49 = vmax.f32 %v1778_v34, 0.0  ;;  %v6396_v38 = vld [vmem:[%s10010_s4 + $0x40] sm:$0xff]  ;;  %v10154_v18 = vld [vmem:[#allocation22_spill] sm:$0xff]  ;;  %v10155_v31 = vld [vmem:[#allocation24_spill] sm:$0xff] }
 0x131   : > { %7246 = vmatmul.mubr.msk.f32.gmra.mxu1 %vm1801_vm2, %v8659_v0  ;;  %v10156_v34 = vld [vmem:[#allocation25_spill] sm:$0xff] }
 0x132   : > { %v8674_v33 = vmax.f32 %v1777_v54, 0.0  ;;  %v10157_v54 = vld [vmem:[#allocation26_spill] sm:$0xff] }
 0x133   : > { %7269 = vmatmul.mubr.msk.f32.gmra.mxu0 %vm1931_vm1, %v8670_v43 }
 0x134   : > { %7248 = vmatprep.mubr.msk.f32.mxu1 %vm1801_vm2, %v8674_v33  ;;  %7289 = vmatprep.mubr.msk.f32.mxu0 %vm1801_vm2, %v8500_v36 }
 0x135   : > { %7249 = vmatmul.mubr.msk.f32.gmra.mxu1 %vm1801_vm2, %v8676_v49 }
 0x136   : > { %7273 = vmatprep.mubr.msk.f32.mxu1 %vm364_vm0, %v8149_v22  ;;  %v6395_v22 = vld [vmem:[%s10010_s4 + $0x38] sm:$0xff] }
 0x137   : > { %7290 = vmatmul.mubr.msk.f32.vlgmr.msra.gmra.mxu0 %vm1801_vm2, %v8502_v42 }
 0x138   : > { %7292 = vmatprep.mubr.msk.f32.mxu0 %vm1801_vm2, %v8514_v9  ;;  %7322 = vmatpush3.msra.mxu0 %v8459_v61 }
 0x139   : > { %7274 = vmatmul.mubr.msk.f32.vlgmr.msra.gmra.mxu1 %vm364_vm0, %v8161_v24  ;;  %7351 = vmatprep.subr.mxu0 %v8623_v25  ;;  %v6394_v24 = vld [vmem:[%s10010_s4 + $0x30] sm:$0xff] }
 0x13a   : > { %7302 = vmatpush3.msra.mxu1 %v8623_v25  ;;  %7276 = vmatprep.mubr.msk.f32.mxu1 %vm364_vm0, %v8167_v26  ;;  %v10128_v26 = vld [vmem:[#allocation5_spill] sm:$0xff] }
 0x13b   : > { %7293 = vmatmul.mubr.msk.f32.gmra.mxu0 %vm1801_vm2, %v8517_v51  ;;  %7303 = vmatprep.subr.mxu1 %v6396_v38 }
 0x13c   : > { %7295 = vmatprep.mubr.msk.f32.mxu0 %vm1801_vm2, %v8530_v52  ;;  %7304 = vmatpush3.msra.mxu1 %v6396_v38 }
 0x13d   : > { %7277 = vmatmul.mubr.msk.f32.gmra.mxu1 %vm364_vm0, %v8178_v28  ;;  %7305 = vmatprep.subr.mxu1 %v6395_v22  ;;  %v10129_v28 = vld [vmem:[#allocation7_spill] sm:$0xff] }
 0x13e   : > { %7279 = vmatprep.mubr.msk.f32.mxu1 %vm364_vm0, %v8188_v30  ;;  %7306 = vmatpush3.msra.mxu1 %v6395_v22  ;;  %v10130_v30 = vld [vmem:[#allocation6_spill] sm:$0xff] }
 0x13f   : > { %7296 = vmatmul.mubr.msk.f32.gmra.mxu0 %vm1801_vm2, %v8532_v4  ;;  %7307 = vmatprep.subr.mxu1 %v6394_v24 }
 0x140   : > { %7298 = vmatprep.mubr.msk.f32.mxu0 %vm1801_vm2, %v8540_v39  ;;  %7308 = vmatpush3.msra.mxu1 %v6394_v24 }
 0x141   : > { %7280 = vmatmul.mubr.msk.f32.gmra.mxu1 %vm364_vm0, %v8204_v32  ;;  %7335 = vmatprep.subr.mxu1 %v8571_v14  ;;  %v10133_v32 = vld [vmem:[#allocation11_spill] sm:$0xff] }
 0x142   : > { %7282 = vmatprep.mubr.msk.f32.mxu1 %vm364_vm0, %v10128_v26  ;;  %v6525_v26 = vld [vmem:[%s8105_s12 + $0x1b8] sm:$0xff] }
 0x143   : > { %7299 = vmatmul.mubr.msk.f32.gmra.mxu0 %vm1801_vm2, %v8542_v53 }
 0x144   : > { %7323 = vmatprep.mubr.msk.f32.mxu0 %vm364_vm0, %v10129_v28  ;;  %v8892_v28 = vld [vmem:[%s10010_s4 + $0xb8] sm:$0xff] }
 0x145   : > { %7283 = vmatmul.mubr.msk.f32.gmra.mxu1 %vm364_vm0, %v10130_v30  ;;  %v8909_v30 = vld [vmem:[%s10010_s4 + $0xb0] sm:$0xff] }
 0x146   : > { %7309 = vmatprep.mubr.msk.f32.mxu1 %vm1931_vm1, %v10131_v50 }
 0x147   : > { %7324 = vmatmul.mubr.msk.f32.vlgmr.msra.gmra.mxu0 %vm364_vm0, %v10132_v62  ;;  %v6601_v62 = vld [vmem:[%s10010_s4 + $0xa8] sm:$0xff] }
 0x148   : > { %7326 = vmatprep.mubr.msk.f32.mxu0 %vm364_vm0, %v10133_v32  ;;  %7352 = vmatpush3.msra.mxu0 %v8623_v25  ;;  %v10146_v25 = vld [vmem:[#allocation8_spill] sm:$0xff]  ;;  %v6573_v32 = vld [vmem:[%s8105_s12 + $0x1c0] sm:$0xff] }
 0x149   : > { %7310 = vmatmul.mubr.msk.f32.vlgmr.msra.gmra.mxu1 %vm1931_vm1, %v10134_v46  ;;  %7353 = vmatprep.subr.mxu0 %v6396_v38 }
 0x14a   : > { %7336 = vmatpush3.msra.mxu1 %v8571_v14  ;;  %7312 = vmatprep.mubr.msk.f32.mxu1 %vm1931_vm1, %v10135_v20  ;;  %v10140_v14 = vld [vmem:[#allocation17_spill] sm:$0xff] }
 0x14b   : > { %7327 = vmatmul.mubr.msk.f32.gmra.mxu0 %vm364_vm0, %v10136_v12  ;;  %7337 = vmatprep.subr.mxu1 %v8610_v55  ;;  %v6574_v12 = vld [vmem:[%s8105_s12 + $0x1c8] sm:$0xff] }
 0x14c   : > { %7329 = vmatprep.mubr.msk.f32.mxu0 %vm364_vm0, %v10137_v60  ;;  %7354 = vmatpush3.msra.mxu0 %v6396_v38  ;;  %v10158_v38 = vld [vmem:[#allocation27_spill] sm:$0xff] }
 0x14d   : > { %7313 = vmatmul.mubr.msk.f32.gmra.mxu1 %vm1931_vm1, %v10138_v35  ;;  %7355 = vmatprep.subr.mxu0 %v6395_v22  ;;  %v6575_v60 = vld [vmem:[%s8105_s12 + $0x1d0] sm:$0xff] }
 0x14e   : > { %7315 = vmatprep.mubr.msk.f32.mxu1 %vm1931_vm1, %v10139_v41  ;;  %7338 = vmatpush3.msra.mxu1 %v8610_v55  ;;  %v10144_v55 = vld [vmem:[#allocation21_spill] sm:$0xff] }
 0x14f   : > { %7330 = vmatmul.mubr.msk.f32.gmra.mxu0 %vm364_vm0, %v10140_v14  ;;  %7371 = vmatprep.subr.mxu1 %v8459_v61  ;;  %v6576_v14 = vld [vmem:[%s8105_s12 + $0x1d8] sm:$0xff] }
 0x150   : > { %7332 = vmatprep.mubr.msk.f32.mxu0 %vm364_vm0, %v10141_v37  ;;  %7356 = vmatpush3.msra.mxu0 %v6395_v22  ;;  %v6524_v22 = vld [vmem:[%s8105_s12 + $0x1b0] sm:$0xff] }
 0x151   : > { %7316 = vmatmul.mubr.msk.f32.gmra.mxu1 %vm1931_vm1, %v10142_v1  ;;  %7357 = vmatprep.subr.mxu0 %v6394_v24  ;;  %v6598_v37 = vld [vmem:[%s10010_s4 + $0x90] sm:$0xff] }
 0x152   : > { %7318 = vmatprep.mubr.msk.f32.mxu1 %vm1931_vm1, %v10143_v21  ;;  %7358 = vmatpush3.msra.mxu0 %v6394_v24  ;;  %v10159_v24 = vld [vmem:[#allocation28_spill] sm:$0xff] }
 0x153   : > { %7333 = vmatmul.mubr.msk.f32.gmra.mxu0 %vm364_vm0, %v10144_v55  ;;  %7385 = vmatprep.subr.mxu0 %v8761_v44  ;;  %v6580_v55 = vld [vmem:[%s8105_s12 + $0x1f8] sm:$0xff] }
 0x154   : > { %7359 = vmatprep.mubr.msk.f32.mxu0 %vm1931_vm1, %v8584_v17 }
 0x155   : > { %7319 = vmatmul.mubr.msk.f32.gmra.mxu1 %vm1931_vm1, %v10145_v58 }
 0x156   : > { %7339 = vmatprep.mubr.msk.f32.mxu1 %vm1801_vm2, %v8600_v7 }
 0x157   : > { %7360 = vmatmul.mubr.msk.f32.vlgmr.msra.gmra.mxu0 %vm1931_vm1, %v8594_v63 }
 0x158   : > { %7362 = vmatprep.mubr.msk.f32.mxu0 %vm1931_vm1, %v8597_v59  ;;  %7386 = vmatpush3.msra.mxu0 %v8761_v44 }
 0x159   : > { %7340 = vmatmul.mubr.msk.f32.vlgmr.msra.gmra.mxu1 %vm1801_vm2, %v8602_v48  ;;  %7387 = vmatprep.subr.mxu0 %v8779_v57 }
 0x15a   : > { %7372 = vmatpush3.msra.mxu1 %v8459_v61  ;;  %7342 = vmatprep.mubr.msk.f32.mxu1 %vm1801_vm2, %v8632_v8 }
 0x15b   : > { %7363 = vmatmul.mubr.msk.f32.gmra.mxu0 %vm1931_vm1, %v8618_v56  ;;  %7401 = vmatprep.subr.mxu1 %v6499_v23 }
 0x15c   : > { %7365 = vmatprep.mubr.msk.f32.mxu0 %vm1931_vm1, %v8629_v27  ;;  %7388 = vmatpush3.msra.mxu0 %v8779_v57 }
 0x15d   : > { %7343 = vmatmul.mubr.msk.f32.gmra.mxu1 %vm1801_vm2, %v8636_v16  ;;  %7421 = vmatprep.subr.mxu0 %v8459_v61 }
 0x15e   : > { %7345 = vmatprep.mubr.msk.f32.mxu1 %vm1801_vm2, %v8656_v47 }
 0x15f   : > { %7366 = vmatmul.mubr.msk.f32.gmra.mxu0 %vm1931_vm1, %v8648_v13 }
 0x160   : > { %7368 = vmatprep.mubr.msk.f32.mxu0 %vm1931_vm1, %v8653_v2 }
 0x161   : > { %7346 = vmatmul.mubr.msk.f32.gmra.mxu1 %vm1801_vm2, %v8659_v0 }
 0x162   : > { %7348 = vmatprep.mubr.msk.f32.mxu1 %vm1801_vm2, %v8674_v33 }
 0x163   : > { %7369 = vmatmul.mubr.msk.f32.gmra.mxu0 %vm1931_vm1, %v8670_v43 }
 0x164   : > { %7389 = vmatprep.mubr.msk.f32.mxu0 %vm1801_vm2, %v8500_v36 }
 0x165   : > { %7349 = vmatmul.mubr.msk.f32.gmra.mxu1 %vm1801_vm2, %v8676_v49 }
 0x166   : > { %7373 = vmatprep.mubr.msk.f32.mxu1 %vm364_vm0, %v10146_v25  ;;  %v9078_v25 = vld [vmem:[%s10012_s6] ss:$0 sm:$0xff] }
 0x167   : > { %7390 = vmatmul.mubr.msk.f32.vlgmr.msra.gmra.mxu0 %vm1801_vm2, %v8502_v42 }
 0x168   : > { %7392 = vmatprep.mubr.msk.f32.mxu0 %vm1801_vm2, %v8514_v9  ;;  %7422 = vmatpush3.msra.mxu0 %v8459_v61 }
 0x169   : > { %7374 = vmatmul.mubr.msk.f32.vlgmr.msra.gmra.mxu1 %vm364_vm0, %v10147_v19  ;;  %7451 = vmatprep.subr.mxu0 %v6499_v23 }
 0x16a   : > { %7402 = vmatpush3.msra.mxu1 %v6499_v23  ;;  %7376 = vmatprep.mubr.msk.f32.mxu1 %vm364_vm0, %v10148_v3 }
 0x16b   : > { %7393 = vmatmul.mubr.msk.f32.gmra.mxu0 %vm1801_vm2, %v8517_v51  ;;  %7403 = vmatprep.subr.mxu1 %v6498_v15 }
 0x16c   : > { %7395 = vmatprep.mubr.msk.f32.mxu0 %vm1801_vm2, %v8530_v52  ;;  %7404 = vmatpush3.msra.mxu1 %v6498_v15 }
 0x16d   : > { %7377 = vmatmul.mubr.msk.f32.gmra.mxu1 %vm364_vm0, %v10149_v10  ;;  %7405 = vmatprep.subr.mxu1 %v6497_v5 }
 0x16e   : > { %7379 = vmatprep.mubr.msk.f32.mxu1 %vm364_vm0, %v10150_v45  ;;  %7406 = vmatpush3.msra.mxu1 %v6497_v5 }
 0x16f   : > { %7396 = vmatmul.mubr.msk.f32.gmra.mxu0 %vm1801_vm2, %v8532_v4  ;;  %7407 = vmatprep.subr.mxu1 %v6496_v29 }
 0x170   : > { %7398 = vmatprep.mubr.msk.f32.mxu0 %vm1801_vm2, %v8540_v39  ;;  %7408 = vmatpush3.msra.mxu1 %v6496_v29 }
 0x171   : > { %7380 = vmatmul.mubr.msk.f32.gmra.mxu1 %vm364_vm0, %v10151_v40  ;;  %7435 = vmatprep.subr.mxu1 %v8761_v44 }
 0x172   : > { %7382 = vmatprep.mubr.msk.f32.mxu1 %vm364_vm0, %v10152_v11 }
 0x173   : > { %7399 = vmatmul.mubr.msk.f32.gmra.mxu0 %vm1801_vm2, %v8542_v53 }
 0x174   : > { %7423 = vmatprep.mubr.msk.f32.mxu0 %vm364_vm0, %v10153_v6 }
 0x175   : > { %7383 = vmatmul.mubr.msk.f32.gmra.mxu1 %vm364_vm0, %v10154_v18 }
 0x176   : > { %7409 = vmatprep.mubr.msk.f32.mxu1 %vm1931_vm1, %v10131_v50 }
 0x177   : > { %7424 = vmatmul.mubr.msk.f32.vlgmr.msra.gmra.mxu0 %vm364_vm0, %v10155_v31 }
 0x178   : > { %7426 = vmatprep.mubr.msk.f32.mxu0 %vm364_vm0, %v10156_v34  ;;  %7452 = vmatpush3.msra.mxu0 %v6499_v23 }
 0x179   : > { %7410 = vmatmul.mubr.msk.f32.vlgmr.msra.gmra.mxu1 %vm1931_vm1, %v10134_v46  ;;  %7453 = vmatprep.subr.mxu0 %v6498_v15 }
 0x17a   : > { %7436 = vmatpush3.msra.mxu1 %v8761_v44  ;;  %7412 = vmatprep.mubr.msk.f32.mxu1 %vm1931_vm1, %v10135_v20  ;;  %v6578_v44 = vld [vmem:[%s8105_s12 + $0x1e8] sm:$0xff] }
 0x17b   : > { %7427 = vmatmul.mubr.msk.f32.gmra.mxu0 %vm364_vm0, %v10157_v54  ;;  %7437 = vmatprep.subr.mxu1 %v8779_v57 }
 0x17c   : > { %7429 = vmatprep.mubr.msk.f32.mxu0 %vm364_vm0, %v10158_v38  ;;  %7454 = vmatpush3.msra.mxu0 %v6498_v15 }
 0x17d   : > { %7413 = vmatmul.mubr.msk.f32.gmra.mxu1 %vm1931_vm1, %v10138_v35  ;;  %7455 = vmatprep.subr.mxu0 %v6497_v5 }
 0x17e   : > { %7415 = vmatprep.mubr.msk.f32.mxu1 %vm1931_vm1, %v10139_v41  ;;  %7438 = vmatpush3.msra.mxu1 %v8779_v57  ;;  %v6623_v57 = vld [vmem:[%s8105_s12 + $0x218] sm:$0xff] }
 0x17f   : > { %7430 = vmatmul.mubr.msk.f32.gmra.mxu0 %vm364_vm0, %v10159_v24  ;;  %7471 = vmatprep.subr.mxu1 %v8459_v61 }
 0x180   : > { %7432 = vmatprep.mubr.msk.f32.mxu0 %vm364_vm0, %v6524_v22  ;;  %7456 = vmatpush3.msra.mxu0 %v6497_v5 }
 0x181   : > { %7416 = vmatmul.mubr.msk.f32.gmra.mxu1 %vm1931_vm1, %v10142_v1  ;;  %7457 = vmatprep.subr.mxu0 %v6496_v29 }
 0x182   : > { %7418 = vmatprep.mubr.msk.f32.mxu1 %vm1931_vm1, %v10143_v21  ;;  %7458 = vmatpush3.msra.mxu0 %v6496_v29 }
 0x183   : > { %7433 = vmatmul.mubr.msk.f32.gmra.mxu0 %vm364_vm0, %v6525_v26  ;;  %7485 = vmatprep.subr.mxu0 %v8892_v28 }
 0x184   : > { %7459 = vmatprep.mubr.msk.f32.mxu0 %vm1931_vm1, %v8584_v17 }
 0x185   : > { %7419 = vmatmul.mubr.msk.f32.gmra.mxu1 %vm1931_vm1, %v10145_v58 }
 0x186   : > { %7439 = vmatprep.mubr.msk.f32.mxu1 %vm1801_vm2, %v8600_v7 }
 0x187   : > { %7460 = vmatmul.mubr.msk.f32.vlgmr.msra.gmra.mxu0 %vm1931_vm1, %v8594_v63 }
 0x188   : > { %7462 = vmatprep.mubr.msk.f32.mxu0 %vm1931_vm1, %v8597_v59  ;;  %7486 = vmatpush3.msra.mxu0 %v8892_v28 }
 0x189   : > { %7440 = vmatmul.mubr.msk.f32.vlgmr.msra.gmra.mxu1 %vm1801_vm2, %v8602_v48  ;;  %7487 = vmatprep.subr.mxu0 %v8909_v30 }
 0x18a   : > { %7472 = vmatpush3.msra.mxu1 %v8459_v61  ;;  %7442 = vmatprep.mubr.msk.f32.mxu1 %vm1801_vm2, %v8632_v8 }
 0x18b   : > { %7463 = vmatmul.mubr.msk.f32.gmra.mxu0 %vm1931_vm1, %v8618_v56  ;;  %7501 = vmatprep.subr.mxu1 %v6601_v62 }
 0x18c   : > { %7465 = vmatprep.mubr.msk.f32.mxu0 %vm1931_vm1, %v8629_v27  ;;  %7488 = vmatpush3.msra.mxu0 %v8909_v30 }
 0x18d   : > { %7443 = vmatmul.mubr.msk.f32.gmra.mxu1 %vm1801_vm2, %v8636_v16  ;;  %7521 = vmatprep.subr.mxu0 %v8459_v61 }
 0x18e   : > { %7445 = vmatprep.mubr.msk.f32.mxu1 %vm1801_vm2, %v8656_v47 }
 0x18f   : > { %7466 = vmatmul.mubr.msk.f32.gmra.mxu0 %vm1931_vm1, %v8648_v13 }
 0x190   : > { %7468 = vmatprep.mubr.msk.f32.mxu0 %vm1931_vm1, %v8653_v2 }
 0x191   : > { %7446 = vmatmul.mubr.msk.f32.gmra.mxu1 %vm1801_vm2, %v8659_v0 }
 0x192   : > { %7448 = vmatprep.mubr.msk.f32.mxu1 %vm1801_vm2, %v8674_v33 }
 0x193   : > { %7469 = vmatmul.mubr.msk.f32.gmra.mxu0 %vm1931_vm1, %v8670_v43 }
 0x194   : > { %7489 = vmatprep.mubr.msk.f32.mxu0 %vm1801_vm2, %v8500_v36  ;;  %v6600_v36 = vld [vmem:[%s10010_s4 + $0xa0] sm:$0xff] }
 0x195   : > { %7449 = vmatmul.mubr.msk.f32.gmra.mxu1 %vm1801_vm2, %v8676_v49 }
 0x196   : > { %7473 = vmatprep.mubr.msk.f32.mxu1 %vm364_vm0, %v6573_v32 }
 0x197   : > { %7490 = vmatmul.mubr.msk.f32.vlgmr.msra.gmra.mxu0 %vm1801_vm2, %v8502_v42  ;;  %v6599_v42 = vld [vmem:[%s10010_s4 + $0x98] sm:$0xff] }
 0x198   : > { %7492 = vmatprep.mubr.msk.f32.mxu0 %vm1801_vm2, %v8514_v9  ;;  %7522 = vmatpush3.msra.mxu0 %v8459_v61  ;;  %v6577_v9 = vld [vmem:[%s8105_s12 + $0x1e0] sm:$0xff] }
 0x199   : > { %7474 = vmatmul.mubr.msk.f32.vlgmr.msra.gmra.mxu1 %vm364_vm0, %v6574_v12  ;;  %7551 = vmatprep.subr.mxu0 %v6601_v62 }
 0x19a   : > { %7502 = vmatpush3.msra.mxu1 %v6601_v62  ;;  %7476 = vmatprep.mubr.msk.f32.mxu1 %vm364_vm0, %v6575_v60 }
 0x19b   : > { %7493 = vmatmul.mubr.msk.f32.gmra.mxu0 %vm1801_vm2, %v8517_v51  ;;  %7503 = vmatprep.subr.mxu1 %v6600_v36  ;;  %v6579_v51 = vld [vmem:[%s8105_s12 + $0x1f0] sm:$0xff] }
 0x19c   : > { %7495 = vmatprep.mubr.msk.f32.mxu0 %vm1801_vm2, %v8530_v52  ;;  %7504 = vmatpush3.msra.mxu1 %v6600_v36  ;;  %v6620_v52 = vld [vmem:[%s8105_s12 + $0x200] sm:$0xff] }
 0x19d   : > { %7477 = vmatmul.mubr.msk.f32.gmra.mxu1 %vm364_vm0, %v6576_v14  ;;  %7505 = vmatprep.subr.mxu1 %v6599_v42 }
 0x19e   : > { %7479 = vmatprep.mubr.msk.f32.mxu1 %vm364_vm0, %v6577_v9  ;;  %7506 = vmatpush3.msra.mxu1 %v6599_v42 }
 0x19f   : > { %7496 = vmatmul.mubr.msk.f32.gmra.mxu0 %vm1801_vm2, %v8532_v4  ;;  %7507 = vmatprep.subr.mxu1 %v6598_v37  ;;  %v6621_v4 = vld [vmem:[%s8105_s12 + $0x208] sm:$0xff] }
 0x1a0   : > { %7498 = vmatprep.mubr.msk.f32.mxu0 %vm1801_vm2, %v8540_v39  ;;  %7508 = vmatpush3.msra.mxu1 %v6598_v37  ;;  %v6622_v39 = vld [vmem:[%s8105_s12 + $0x210] sm:$0xff] }
 0x1a1   : > { %7480 = vmatmul.mubr.msk.f32.gmra.mxu1 %vm364_vm0, %v6578_v44  ;;  %7535 = vmatprep.subr.mxu1 %v8892_v28 }
 0x1a2   : > { %7482 = vmatprep.mubr.msk.f32.mxu1 %vm364_vm0, %v6579_v51 }
 0x1a3   : > { %7499 = vmatmul.mubr.msk.f32.gmra.mxu0 %vm1801_vm2, %v8542_v53  ;;  %v6624_v53 = vld [vmem:[%s8105_s12 + $0x220] sm:$0xff] }
 0x1a4   : > { %7523 = vmatprep.mubr.msk.f32.mxu0 %vm364_vm0, %v6620_v52 }
 0x1a5   : > { %7483 = vmatmul.mubr.msk.f32.gmra.mxu1 %vm364_vm0, %v6580_v55 }
 0x1a6   : > { %7509 = vmatprep.mubr.msk.f32.mxu1 %vm1931_vm1, %v10131_v50  ;;  %v6625_v50 = vld [vmem:[%s8105_s12 + $0x228] sm:$0xff] }
 0x1a7   : > { %7524 = vmatmul.mubr.msk.f32.vlgmr.msra.gmra.mxu0 %vm364_vm0, %v6621_v4 }
 0x1a8   : > { %7526 = vmatprep.mubr.msk.f32.mxu0 %vm364_vm0, %v6622_v39  ;;  %7552 = vmatpush3.msra.mxu0 %v6601_v62 }
 0x1a9   : > { %7510 = vmatmul.mubr.msk.f32.vlgmr.msra.gmra.mxu1 %vm1931_vm1, %v10134_v46  ;;  %7553 = vmatprep.subr.mxu0 %v6600_v36  ;;  %v6626_v46 = vld [vmem:[%s8105_s12 + $0x230] sm:$0xff] }
 0x1aa   : > { %7536 = vmatpush3.msra.mxu1 %v8892_v28  ;;  %7512 = vmatprep.mubr.msk.f32.mxu1 %vm1931_vm1, %v10135_v20  ;;  %v6627_v20 = vld [vmem:[%s8105_s12 + $0x238] sm:$0xff] }
 0x1ab   : > { %7527 = vmatmul.mubr.msk.f32.gmra.mxu0 %vm364_vm0, %v6623_v57  ;;  %7537 = vmatprep.subr.mxu1 %v8909_v30 }
 0x1ac   : > { %7529 = vmatprep.mubr.msk.f32.mxu0 %vm364_vm0, %v6624_v53  ;;  %7538 = vmatpush3.msra.mxu1 %v8909_v30 }
 0x1ad   : > { %7513 = vmatmul.mubr.msk.f32.gmra.mxu1 %vm1931_vm1, %v10138_v35  ;;  %7554 = vmatpush3.msra.mxu0 %v6600_v36  ;;  %v6682_v35 = vld [vmem:[%s8105_s12 + $0x278] sm:$0xff] }
 0x1ae   : > { %7515 = vmatprep.mubr.msk.f32.mxu1 %vm1931_vm1, %v10139_v41  ;;  %7555 = vmatprep.subr.mxu0 %v6599_v42 }
 0x1af   : > { %7530 = vmatmul.mubr.msk.f32.gmra.mxu0 %vm364_vm0, %v6625_v50  ;;  %7571 = vmatprep.subr.mxu1 %v8459_v61 }
 0x1b0   : > { %7532 = vmatprep.mubr.msk.f32.mxu0 %vm364_vm0, %v6626_v46  ;;  %7556 = vmatpush3.msra.mxu0 %v6599_v42 }
 0x1b1   : > { %7516 = vmatmul.mubr.msk.f32.gmra.mxu1 %vm1931_vm1, %v10142_v1  ;;  %7557 = vmatprep.subr.mxu0 %v6598_v37 }
 0x1b2   : > { %7518 = vmatprep.mubr.msk.f32.mxu1 %vm1931_vm1, %v10143_v21  ;;  %7558 = vmatpush3.msra.mxu0 %v6598_v37 }
 0x1b3   : > { %7533 = vmatmul.mubr.msk.f32.gmra.mxu0 %vm364_vm0, %v6627_v20 }
 0x1b4   : > { %7559 = vmatprep.mubr.msk.f32.mxu0 %vm1931_vm1, %v8584_v17  ;;  %v7211_v17 = vpop.f32.mrf.mxu1 }
 0x1b5   : > { %7519 = vmatmul.mubr.msk.f32.gmra.mxu1 %vm1931_vm1, %v10145_v58 }
 0x1b6   : > { %7539 = vmatprep.mubr.msk.f32.mxu1 %vm1801_vm2, %v8600_v7  ;;  %v6677_v7 = vld [vmem:[%s8105_s12 + $0x250] sm:$0xff] }
 0x1b7   : > { %7560 = vmatmul.mubr.msk.f32.vlgmr.msra.gmra.mxu0 %vm1931_vm1, %v8594_v63  ;;  %v6676_v63 = vld [vmem:[%s8105_s12 + $0x248] sm:$0xff] }
 0x1b8   : > { %7562 = vmatprep.mubr.msk.f32.mxu0 %vm1931_vm1, %v8597_v59 }
 0x1b9   : > { %7540 = vmatmul.mubr.msk.f32.vlgmr.msra.gmra.mxu1 %vm1801_vm2, %v8602_v48  ;;  %v2022_v48 = vpop.f32.mrf.mxu1 }
 0x1ba   : > { %7542 = vmatprep.mubr.msk.f32.mxu1 %vm1801_vm2, %v8632_v8  ;;  %7572 = vmatpush3.msra.mxu1 %v8459_v61  ;;  %v6675_v61 = vld [vmem:[%s8105_s12 + $0x240] sm:$0xff] }
 0x1bb   : > { %7563 = vmatmul.mubr.msk.f32.gmra.mxu0 %vm1931_vm1, %v8618_v56 }
 0x1bc   : > { %7565 = vmatprep.mubr.msk.f32.mxu0 %vm1931_vm1, %v8629_v27  ;;  %v6678_v27 = vld [vmem:[%s8105_s12 + $0x258] sm:$0xff] }
 0x1bd   : > { %7543 = vmatmul.mubr.msk.f32.gmra.mxu1 %vm1801_vm2, %v8636_v16  ;;  %v6679_v16 = vld [vmem:[%s8105_s12 + $0x260] sm:$0xff] }
 0x1be   : > { %7545 = vmatprep.mubr.msk.f32.mxu1 %vm1801_vm2, %v8656_v47  ;;  %v6680_v47 = vld [vmem:[%s8105_s12 + $0x268] sm:$0xff] }
 0x1bf   : > { %7566 = vmatmul.mubr.msk.f32.gmra.mxu0 %vm1931_vm1, %v8648_v13  ;;  %v7214_v13 = vpop.f32.mrf.mxu1 }
 0x1c0   : > { %7568 = vmatprep.mubr.msk.f32.mxu0 %vm1931_vm1, %v8653_v2 }
 0x1c1   : > { %7546 = vmatmul.mubr.msk.f32.gmra.mxu1 %vm1801_vm2, %v8659_v0 }
 0x1c2   : > { %7548 = vmatprep.mubr.msk.f32.mxu1 %vm1801_vm2, %v8674_v33  ;;  %v2032_v33 = vpop.f32.mrf.mxu1 }
 0x1c3   : > { %7569 = vmatmul.mubr.msk.f32.gmra.mxu0 %vm1931_vm1, %v8670_v43  ;;  %v6681_v43 = vld [vmem:[%s8105_s12 + $0x270] sm:$0xff]  ;;  %s7905_s12 = scalar_lea.vmem %s7904_s15, 16384 }
 0x1c4   : > { %v7217_v1 = vpop.f32.mrf.mxu1  ;;  %p7907_p2 = scmp.lt.s32.totalorder %s7905_s12, %s7899_s8 }
 0x1c5   : > { %7549 = vmatmul.mubr.msk.f32.gmra.mxu1 %vm1801_vm2, %v8676_v49 }
 0x1c6   : > { %7573 = vmatprep.mubr.msk.f32.mxu1 %vm364_vm0, %v6675_v61  ;;  %v2042_v19 = vpop.f32.mrf.mxu1  ;;  %p7908_p3 = por %p7907_p2, %p7906_p1 }
 0x1c7   : > { %v7191_v59 = vpop.f32.mrf.mxu0 }
 0x1c8   : > { %v2028_v58 = vadd.f32 %v7211_v17, %v7191_v59  ;;  %v7220_v6 = vpop.f32.mrf.mxu1  ;;  %p7909_p5 = pnand %p7908_p3, %p7902_p0 }
 0x1c9   : > { %v1892_v56 = vpop.f32.mrf.mxu0  ;;  %7574 = vmatmul.mubr.msk.f32.vlgmr.msra.gmra.mxu1 %vm364_vm0, %v6676_v63 }
 0x1ca   : > { %7576 = vmatprep.mubr.msk.f32.mxu1 %vm364_vm0, %v6677_v7  ;;  %v2023_v15 = vadd.f32 %v2022_v48, %v1892_v56  ;;  %v2052_v30 = vpop.f32.mrf.mxu1 }
 0x1cb   : > { %v7194_v8 = vpop.f32.mrf.mxu0 }
 0x1cc   : > { %v2038_v29 = vadd.f32 %v7214_v13, %v7194_v8 }
 0x1cd   : > { %v1902_v2 = vpop.f32.mrf.mxu0  ;;  %7577 = vmatmul.mubr.msk.f32.gmra.mxu1 %vm364_vm0, %v6678_v27 }
 0x1ce   : > { %7579 = vmatprep.mubr.msk.f32.mxu1 %vm364_vm0, %v6679_v16  ;;  %v2033_v11 = vadd.f32 %v2032_v33, %v1902_v2 }
 0x1cf   : > { %v7197_v0 = vpop.f32.mrf.mxu0 }
 0x1d0   : > { %v2048_v38 = vadd.f32 %v7217_v1, %v7197_v0 }
 0x1d1   : > { %v1912_v49 = vpop.f32.mrf.mxu0  ;;  %7580 = vmatmul.mubr.msk.f32.gmra.mxu1 %vm364_vm0, %v6680_v47 }
 0x1d2   : > { %7582 = vmatprep.mubr.msk.f32.mxu1 %vm364_vm0, %v6681_v43  ;;  %v2043_v26 = vadd.f32 %v2042_v19, %v1912_v49 }
 0x1d3   : > { %v7200_v41 = vpop.f32.mrf.mxu0 }
 0x1d4   : > { %v2058_v14 = vadd.f32 %v7220_v6, %v7200_v41 }
 0x1d5   : > { %v1922_v21 = vpop.f32.mrf.mxu0  ;;  %7583 = vmatmul.mubr.msk.f32.gmra.mxu1 %vm364_vm0, %v6682_v35 }
 0x1d6   : > { %v2053_v9 = vadd.f32 %v2052_v30, %v1922_v21 }
 0x1d7   : > { %v7225_v23 = vpop.f32.mrf.mxu0 }
 0x1d8   : > { %v2168_v3 = vadd.f32 %v7225_v23, %v2028_v58 }
 0x1d9   : > { %v2128_v5 = vpop.f32.mrf.mxu0 }
 0x1da   : > { %v2167_v10 = vadd.f32 %v2128_v5, %v2023_v15  ;;  %v9081_v45 = vadd.f32 %v9078_v25, %v2168_v3 }
 0x1db   : > { %v7228_v40 = vpop.f32.mrf.mxu0 }
 0x1dc   : > { %v2170_v18 = vadd.f32 %v7228_v40, %v2038_v29  ;;  %v2193_v31 = vsel %vm1801_vm2, %v9081_v45, -inf  ;;  %v9086_v34 = vadd.f32 %v9078_v25, %v2167_v10 }
 0x1dd   : > { %v2138_v54 = vpop.f32.mrf.mxu0  ;;  %2194 = vmax.xlane.f32.xlu0 %v2193_v31 }
 0x1de   : > { %v2169_v22 = vadd.f32 %v2138_v54, %v2033_v11  ;;  %v9089_v24 = vadd.f32 %v9078_v25, %v2170_v18  ;;  %v2190_v12 = vsel %vm1801_vm2, %v9086_v34, -inf }
 0x1df   : > { %v7231_v28 = vpop.f32.mrf.mxu0 }
 0x1e0   : > { %v2172_v62 = vadd.f32 %v7231_v28, %v2048_v38  ;;  %v2199_v32 = vsel %vm1801_vm2, %v9089_v24, -inf  ;;  %v9096_v60 = vadd.f32 %v9078_v25, %v2169_v22 }
 0x1e1   : > { %v2148_v36 = vpop.f32.mrf.mxu0  ;;  %2200 = vmax.xlane.f32.xlu1 %v2199_v32  ;;  %2191 = vmax.xlane.f32.xlu0 %v2190_v12 }
 0x1e2   : > { %v2171_v42 = vadd.f32 %v2148_v36, %v2043_v26  ;;  %v2196_v51 = vsel %vm1801_vm2, %v9096_v60, -inf  ;;  %v9104_v55 = vadd.f32 %v9078_v25, %v2172_v62 }
 0x1e3   : > { %v7234_v37 = vpop.f32.mrf.mxu0 }
 0x1e4   : > { %v2174_v44 = vadd.f32 %v7234_v37, %v2058_v14  ;;  %v9101_v52 = vadd.f32 %v9078_v25, %v2171_v42  ;;  %v2205_v50 = vsel %vm1801_vm2, %v9104_v55, -inf }
 0x1e5   : > { %v2158_v4 = vpop.f32.mrf.mxu0  ;;  %2197 = vmax.xlane.f32.xlu1 %v2196_v51 }
 0x1e6   : > { %v2173_v39 = vadd.f32 %v2158_v4, %v2053_v9  ;;  %v2202_v57 = vsel %vm1801_vm2, %v9101_v52, -inf  ;;  %v9114_v20 = vadd.f32 %v9078_v25, %v2174_v44 }
 0x1e7   : > { %v7261_v53 = vpop.f32.mrf.mxu0  ;;  %2203 = vmax.xlane.f32.xlu0 %v2202_v57 }
 0x1e8   : > { %v9111_v46 = vadd.f32 %v9078_v25, %v2173_v39  ;;  %v2211_v48 = vsel %vm1801_vm2, %v9114_v20, -inf }
 0x1e9   : > { %v7241_v61 = vpop.f32.mrf.mxu1  ;;  %v2544_v17 = vpop.f32.mrf.mxu0  ;;  %2206 = vmax.xlane.f32.xlu1 %v2205_v50 }
 0x1ea   : > { %v2208_v63 = vsel %vm1801_vm2, %v9111_v46, -inf  ;;  %v2550_v41 = vadd.f32 %v7261_v53, %v7241_v61 }
 0x1eb   : > { %v2415_v59 = vpop.f32.mrf.mxu1  ;;  %v7264_v7 = vpop.f32.mrf.mxu0  ;;  %2209 = vmax.xlane.f32.xlu0 %v2208_v63 }
 0x1ec   : > { %v2545_v58 = vadd.f32 %v2544_v17, %v2415_v59 }
 0x1ed   : > { %v7244_v56 = vpop.f32.mrf.mxu1  ;;  %v2554_v27 = vpop.f32.mrf.mxu0  ;;  %2212 = vmax.xlane.f32.xlu1 %v2211_v48 }
 0x1ee   : > { %v2560_v3 = vadd.f32 %v7264_v7, %v7244_v56 }
 0x1ef   : > { %v2425_v8 = vpop.f32.mrf.mxu1  ;;  %v7267_v16 = vpop.f32.mrf.mxu0 }
 0x1f0   : > { %v2555_v11 = vadd.f32 %v2554_v27, %v2425_v8 }
 0x1f1   : > { %v7247_v13 = vpop.f32.mrf.mxu1  ;;  %v2564_v2 = vpop.f32.mrf.mxu0 }
 0x1f2   : > { %v2570_v22 = vadd.f32 %v7267_v16, %v7247_v13 }
 0x1f3   : > { %v2435_v47 = vpop.f32.mrf.mxu1  ;;  %v7270_v0 = vpop.f32.mrf.mxu0 }
 0x1f4   : > { %v2565_v12 = vadd.f32 %v2564_v2, %v2435_v47 }
 0x1f5   : > { %v7250_v43 = vpop.f32.mrf.mxu1  ;;  %v2574_v33 = vpop.f32.mrf.mxu0 }
 0x1f6   : > { %v2580_v44 = vadd.f32 %v7270_v0, %v7250_v43 }
 0x1f7   : > { %v2445_v49 = vpop.f32.mrf.mxu1  ;;  %v7291_v35 = vpop.f32.mrf.mxu0 }
 0x1f8   : > { %v2575_v50 = vadd.f32 %v2574_v33, %v2445_v49 }
 0x1f9   : > { %v7275_v1 = vpop.f32.mrf.mxu1  ;;  %v2946_v21 = vpop.f32.mrf.mxu0 }
 0x1fa   : > { %v2722_v23 = vadd.f32 %v7275_v1, %v2550_v41 }
 0x1fb   : > { %v2682_v15 = vpop.f32.mrf.mxu1  ;;  %v7294_v19 = vpop.f32.mrf.mxu0 }
 0x1fc   : > { %v2721_v5 = vadd.f32 %v2682_v15, %v2545_v58  ;;  %v9121_v29 = vadd.f32 %v9078_v25, %v2722_v23 }
 0x1fd   : > { %v7278_v10 = vpop.f32.mrf.mxu1  ;;  %v2956_v40 = vpop.f32.mrf.mxu0 }
 0x1fe   : > { %v2724_v6 = vadd.f32 %v7278_v10, %v2560_v3  ;;  %v2747_v18 = vsel %vm1801_vm2, %v9121_v29, -inf  ;;  %v9126_v31 = vadd.f32 %v9078_v25, %v2721_v5 }
 0x1ff   : > { %v2692_v54 = vpop.f32.mrf.mxu1  ;;  %v7297_v38 = vpop.f32.mrf.mxu0  ;;  %2748 = vmax.xlane.f32.xlu1 %v2747_v18 }
 0x200   : > { %v2723_v26 = vadd.f32 %v2692_v54, %v2555_v11  ;;  %v2744_v28 = vsel %vm1801_vm2, %v9126_v31, -inf  ;;  %v9131_v30 = vadd.f32 %v9078_v25, %v2724_v6 }
 0x201   : > { %v7281_v62 = vpop.f32.mrf.mxu1  ;;  %v2966_v32 = vpop.f32.mrf.mxu0  ;;  %2745 = vmax.xlane.f32.xlu0 %v2744_v28 }
 0x202   : > { %v2726_v36 = vadd.f32 %v7281_v62, %v2570_v22  ;;  %v2753_v14 = vsel %vm1801_vm2, %v9131_v30, -inf  ;;  %v9136_v42 = vadd.f32 %v9078_v25, %v2723_v26 }
 0x203   : > { %v2702_v9 = vpop.f32.mrf.mxu1  ;;  %v7300_v37 = vpop.f32.mrf.mxu0  ;;  %2754 = vmax.xlane.f32.xlu1 %v2753_v14 }
 0x204   : > { %v2725_v51 = vadd.f32 %v2702_v9, %v2565_v12  ;;  %v2750_v4 = vsel %vm1801_vm2, %v9136_v42, -inf  ;;  %v9141_v39 = vadd.f32 %v9078_v25, %v2726_v36 }
 0x205   : > { %v7284_v57 = vpop.f32.mrf.mxu1  ;;  %v2976_v53 = vpop.f32.mrf.mxu0  ;;  %2751 = vmax.xlane.f32.xlu0 %v2750_v4 }
 0x206   : > { %v2728_v61 = vadd.f32 %v7284_v57, %v2580_v44  ;;  %v2759_v17 = vsel %vm1801_vm2, %v9141_v39, -inf  ;;  %v9146_v63 = vadd.f32 %v9078_v25, %v2725_v51 }
 0x207   : > { %v2712_v59 = vpop.f32.mrf.mxu1  ;;  %v7325_v7 = vpop.f32.mrf.mxu0  ;;  %2760 = vmax.xlane.f32.xlu1 %v2759_v17 }
 0x208   : > { %v2727_v48 = vadd.f32 %v2712_v59, %v2575_v50  ;;  %v2756_v56 = vsel %vm1801_vm2, %v9146_v63, -inf  ;;  %v9151_v27 = vadd.f32 %v9078_v25, %v2728_v61 }
 0x209   : > { %v7311_v8 = vpop.f32.mrf.mxu1  ;;  %v3213_v16 = vpop.f32.mrf.mxu0  ;;  %2757 = vmax.xlane.f32.xlu0 %v2756_v56 }
 0x20a   : > { %v3081_v13 = vadd.f32 %v7311_v8, %v7291_v35  ;;  %v2765_v2 = vsel %vm1801_vm2, %v9151_v27, -inf  ;;  %v9156_v47 = vadd.f32 %v9078_v25, %v2727_v48 }
 0x20b   : > { %v3075_v0 = vpop.f32.mrf.mxu1  ;;  %v7328_v43 = vpop.f32.mrf.mxu0  ;;  %2766 = vmax.xlane.f32.xlu1 %v2765_v2 }
 0x20c   : > { %v3253_v33 = vadd.f32 %v7325_v7, %v3081_v13  ;;  %v3076_v49 = vadd.f32 %v3075_v0, %v2946_v21  ;;  %v2762_v41 = vsel %vm1801_vm2, %v9156_v47, -inf }
 0x20d   : > { %v7314_v1 = vpop.f32.mrf.mxu1  ;;  %v3223_v58 = vpop.f32.mrf.mxu0  ;;  %2763 = vmax.xlane.f32.xlu0 %v2762_v41 }
 0x20e   : > { %v3252_v23 = vadd.f32 %v3213_v16, %v3076_v49  ;;  %v3091_v15 = vadd.f32 %v7314_v1, %v7294_v19  ;;  %v9161_v35 = vadd.f32 %v9078_v25, %v3253_v33 }
 0x20f   : > { %v3085_v3 = vpop.f32.mrf.mxu1  ;;  %v7331_v5 = vpop.f32.mrf.mxu0 }
 0x210   : > { %v3255_v10 = vadd.f32 %v7328_v43, %v3091_v15  ;;  %v3086_v11 = vadd.f32 %v3085_v3, %v2956_v40  ;;  %v3278_v6 = vsel %vm1801_vm2, %v9161_v35, -inf  ;;  %v9166_v21 = vadd.f32 %v9078_v25, %v3252_v23 }
 0x211   : > { %v7317_v18 = vpop.f32.mrf.mxu1  ;;  %v3233_v54 = vpop.f32.mrf.mxu0  ;;  %3279 = vmax.xlane.f32.xlu1 %v3278_v6 }
 0x212   : > { %v3254_v22 = vadd.f32 %v3223_v58, %v3086_v11  ;;  %v3101_v26 = vadd.f32 %v7317_v18, %v7297_v38  ;;  %v3275_v19 = vsel %vm1801_vm2, %v9166_v21, -inf  ;;  %v9171_v28 = vadd.f32 %v9078_v25, %v3255_v10 }
 0x213   : > { %v3095_v62 = vpop.f32.mrf.mxu1  ;;  %v7334_v12 = vpop.f32.mrf.mxu0  ;;  %3276 = vmax.xlane.f32.xlu0 %v3275_v19 }
 0x214   : > { %v3257_v40 = vadd.f32 %v7331_v5, %v3101_v26  ;;  %v3096_v36 = vadd.f32 %v3095_v62, %v2966_v32  ;;  %v3284_v14 = vsel %vm1801_vm2, %v9171_v28, -inf  ;;  %v9176_v9 = vadd.f32 %v9078_v25, %v3254_v22 }
 0x215   : > { %v7320_v44 = vpop.f32.mrf.mxu1  ;;  %v3243_v51 = vpop.f32.mrf.mxu0  ;;  %3285 = vmax.xlane.f32.xlu1 %v3284_v14 }
 0x216   : > { %v3256_v38 = vadd.f32 %v3233_v54, %v3096_v36  ;;  %v3111_v4 = vadd.f32 %v7320_v44, %v7300_v37  ;;  %v3281_v57 = vsel %vm1801_vm2, %v9176_v9, -inf  ;;  %v9181_v50 = vadd.f32 %v9078_v25, %v3257_v40 }
 0x217   : > { %v3105_v61 = vpop.f32.mrf.mxu1  ;;  %v7361_v17 = vpop.f32.mrf.mxu0  ;;  %3282 = vmax.xlane.f32.xlu0 %v3281_v57 }
 0x218   : > { %v3259_v32 = vadd.f32 %v7334_v12, %v3111_v4  ;;  %v3106_v59 = vadd.f32 %v3105_v61, %v2976_v53  ;;  %v3290_v7 = vsel %vm1801_vm2, %v9181_v50, -inf  ;;  %v9186_v48 = vadd.f32 %v9078_v25, %v3256_v38 }
 0x219   : > { %v7341_v56 = vpop.f32.mrf.mxu1  ;;  %v3605_v8 = vpop.f32.mrf.mxu0  ;;  %3291 = vmax.xlane.f32.xlu1 %v3290_v7 }
 0x21a   : > { %v3258_v37 = vadd.f32 %v3243_v51, %v3106_v59  ;;  %v3287_v16 = vsel %vm1801_vm2, %v9186_v48, -inf  ;;  %v9191_v13 = vadd.f32 %v9078_v25, %v3259_v32  ;;  %v3611_v54 = vadd.f32 %v7361_v17, %v7341_v56 }
 0x21b   : > { %v3476_v2 = vpop.f32.mrf.mxu1  ;;  %v7364_v0 = vpop.f32.mrf.mxu0  ;;  %3288 = vmax.xlane.f32.xlu0 %v3287_v16 }
 0x21c   : > { %v3296_v53 = vsel %vm1801_vm2, %v9191_v13, -inf  ;;  %v9196_v43 = vadd.f32 %v9078_v25, %v3258_v37  ;;  %v3606_v19 = vadd.f32 %v3605_v8, %v3476_v2 }
 0x21d   : > { %v7344_v33 = vpop.f32.mrf.mxu1  ;;  %v3615_v49 = vpop.f32.mrf.mxu0  ;;  %3297 = vmax.xlane.f32.xlu1 %v3296_v53 }
 0x21e   : > { %v3293_v41 = vsel %vm1801_vm2, %v9196_v43, -inf  ;;  %v3621_v36 = vadd.f32 %v7364_v0, %v7344_v33 }
 0x21f   : > { %v3486_v1 = vpop.f32.mrf.mxu1  ;;  %v7367_v58 = vpop.f32.mrf.mxu0  ;;  %3294 = vmax.xlane.f32.xlu0 %v3293_v41 }
 0x220   : > { %v3616_v4 = vadd.f32 %v3615_v49, %v3486_v1 }
 0x221   : > { %v7347_v23 = vpop.f32.mrf.mxu1  ;;  %v3625_v15 = vpop.f32.mrf.mxu0 }
 0x222   : > { %v3631_v7 = vadd.f32 %v7367_v58, %v7347_v23 }
 0x223   : > { %v3496_v3 = vpop.f32.mrf.mxu1  ;;  %v7370_v5 = vpop.f32.mrf.mxu0 }
 0x224   : > { %v3626_v0 = vadd.f32 %v3625_v15, %v3496_v3 }
 0x225   : > { %v7350_v10 = vpop.f32.mrf.mxu1  ;;  %v3635_v11 = vpop.f32.mrf.mxu0 }
 0x226   : > { %v3641_v58 = vadd.f32 %v7370_v5, %v7350_v10 }
 0x227   : > { %v3506_v6 = vpop.f32.mrf.mxu1  ;;  %v7391_v18 = vpop.f32.mrf.mxu0 }
 0x228   : > { %v3636_v3 = vadd.f32 %v3635_v11, %v3506_v6 }
 0x229   : > { %v7375_v22 = vpop.f32.mrf.mxu1  ;;  %v4007_v26 = vpop.f32.mrf.mxu0 }
 0x22a   : > { %v3783_v62 = vadd.f32 %v7375_v22, %v3611_v54 }
 0x22b   : > { %v3743_v12 = vpop.f32.mrf.mxu1  ;;  %v7394_v40 = vpop.f32.mrf.mxu0 }
 0x22c   : > { %v3782_v14 = vadd.f32 %v3743_v12, %v3606_v19  ;;  %v9201_v44 = vadd.f32 %v9078_v25, %v3783_v62 }
 0x22d   : > { %v7378_v51 = vpop.f32.mrf.mxu1  ;;  %v4017_v38 = vpop.f32.mrf.mxu0 }
 0x22e   : > { %v3785_v57 = vadd.f32 %v7378_v51, %v3621_v36  ;;  %v3808_v61 = vsel %vm1801_vm2, %v9201_v44, -inf  ;;  %v9206_v17 = vadd.f32 %v9078_v25, %v3782_v14 }
 0x22f   : > { %v3753_v32 = vpop.f32.mrf.mxu1  ;;  %v7397_v59 = vpop.f32.mrf.mxu0  ;;  %3809 = vmax.xlane.f32.xlu1 %v3808_v61 }
 0x230   : > { %v3784_v56 = vadd.f32 %v3753_v32, %v3616_v4  ;;  %v3805_v8 = vsel %vm1801_vm2, %v9206_v17, -inf  ;;  %v9211_v37 = vadd.f32 %v9078_v25, %v3785_v57 }
 0x231   : > { %v7381_v16 = vpop.f32.mrf.mxu1  ;;  %v4027_v2 = vpop.f32.mrf.mxu0  ;;  %3806 = vmax.xlane.f32.xlu0 %v3805_v8 }
 0x232   : > { %v3787_v53 = vadd.f32 %v7381_v16, %v3631_v7  ;;  %v3814_v33 = vsel %vm1801_vm2, %v9211_v37, -inf  ;;  %v9216_v49 = vadd.f32 %v9078_v25, %v3784_v56 }
 0x233   : > { %v3763_v41 = vpop.f32.mrf.mxu1  ;;  %v7400_v1 = vpop.f32.mrf.mxu0  ;;  %3815 = vmax.xlane.f32.xlu1 %v3814_v33 }
 0x234   : > { %v3786_v23 = vadd.f32 %v3763_v41, %v3626_v0  ;;  %v3811_v54 = vsel %vm1801_vm2, %v9216_v49, -inf  ;;  %v9221_v22 = vadd.f32 %v9078_v25, %v3787_v53 }
 0x235   : > { %v7384_v19 = vpop.f32.mrf.mxu1  ;;  %v4037_v15 = vpop.f32.mrf.mxu0  ;;  %3812 = vmax.xlane.f32.xlu0 %v3811_v54 }
 0x236   : > { %v3789_v62 = vadd.f32 %v7384_v19, %v3641_v58  ;;  %v3820_v12 = vsel %vm1801_vm2, %v9221_v22, -inf  ;;  %v9226_v36 = vadd.f32 %v9078_v25, %v3786_v23 }
 0x237   : > { %v3773_v14 = vpop.f32.mrf.mxu1  ;;  %v7425_v5 = vpop.f32.mrf.mxu0  ;;  %3821 = vmax.xlane.f32.xlu1 %v3820_v12 }
 0x238   : > { %v3788_v10 = vadd.f32 %v3773_v14, %v3636_v3  ;;  %v3817_v51 = vsel %vm1801_vm2, %v9226_v36, -inf  ;;  %v9231_v4 = vadd.f32 %v9078_v25, %v3789_v62 }
 0x239   : > { %v7411_v57 = vpop.f32.mrf.mxu1  ;;  %v4274_v61 = vpop.f32.mrf.mxu0  ;;  %3818 = vmax.xlane.f32.xlu0 %v3817_v51 }
 0x23a   : > { %v4142_v11 = vadd.f32 %v7411_v57, %v7391_v18  ;;  %v3826_v6 = vsel %vm1801_vm2, %v9231_v4, -inf  ;;  %v9236_v32 = vadd.f32 %v9078_v25, %v3788_v10 }
 0x23b   : > { %v4136_v7 = vpop.f32.mrf.mxu1  ;;  %v7428_v56 = vpop.f32.mrf.mxu0  ;;  %3827 = vmax.xlane.f32.xlu1 %v3826_v6 }
 0x23c   : > { %v4314_v8 = vadd.f32 %v7425_v5, %v4142_v11  ;;  %v4137_v16 = vadd.f32 %v4136_v7, %v4007_v26  ;;  %v3823_v0 = vsel %vm1801_vm2, %v9236_v32, -inf }
 0x23d   : > { %v7414_v53 = vpop.f32.mrf.mxu1  ;;  %v4284_v33 = vpop.f32.mrf.mxu0  ;;  %3824 = vmax.xlane.f32.xlu0 %v3823_v0 }
 0x23e   : > { %v4313_v41 = vadd.f32 %v4274_v61, %v4137_v16  ;;  %v4152_v58 = vadd.f32 %v7414_v53, %v7394_v40  ;;  %v9241_v18 = vadd.f32 %v9078_v25, %v4314_v8 }
 0x23f   : > { %v4146_v23 = vpop.f32.mrf.mxu1  ;;  %v7431_v54 = vpop.f32.mrf.mxu0 }
 0x240   : > { %10160 = vst [vmem:[#allocation5_spill] sm:$0xff] %v9241_v18  ;;  %v4316_v19 = vadd.f32 %v7428_v56, %v4152_v58  ;;  %v4147_v3 = vadd.f32 %v4146_v23, %v4017_v38  ;;  %v4339_v62 = vsel %vm1801_vm2, %v9241_v18, -inf  ;;  %v9246_v26 = vadd.f32 %v9078_v25, %v4313_v41 }
 0x241   : > { %v7417_v12 = vpop.f32.mrf.mxu1  ;;  %v4294_v14 = vpop.f32.mrf.mxu0  ;;  %4340 = vmax.xlane.f32.xlu1 %v4339_v62 }
 0x242   : > { %10161 = vst [vmem:[#allocation7_spill] sm:$0xff] %v9246_v26  ;;  %v4315_v5 = vadd.f32 %v4284_v33, %v4147_v3  ;;  %v4162_v10 = vadd.f32 %v7417_v12, %v7397_v59  ;;  %v4336_v40 = vsel %vm1801_vm2, %v9246_v26, -inf  ;;  %v9251_v51 = vadd.f32 %v9078_v25, %v4316_v19 }
 0x243   : > { %v4156_v57 = vpop.f32.mrf.mxu1  ;;  %v7434_v61 = vpop.f32.mrf.mxu0  ;;  %4337 = vmax.xlane.f32.xlu0 %v4336_v40 }
 0x244   : > { %10162 = vst [vmem:[#allocation6_spill] sm:$0xff] %v9251_v51  ;;  %v4318_v38 = vadd.f32 %v7431_v54, %v4162_v10  ;;  %v4157_v11 = vadd.f32 %v4156_v57, %v4027_v2  ;;  %v4345_v6 = vsel %vm1801_vm2, %v9251_v51, -inf  ;;  %v9256_v7 = vadd.f32 %v9078_v25, %v4315_v5 }
 0x245   : > { %v7420_v56 = vpop.f32.mrf.mxu1  ;;  %v4304_v8 = vpop.f32.mrf.mxu0  ;;  %4346 = vmax.xlane.f32.xlu1 %v4345_v6 }
 0x246   : > { %10163 = vst [vmem:[#allocation29_spill] sm:$0xff] %v9256_v7  ;;  %v4317_v59 = vadd.f32 %v4294_v14, %v4157_v11  ;;  %v4172_v16 = vadd.f32 %v7420_v56, %v7400_v1  ;;  %v4342_v0 = vsel %vm1801_vm2, %v9256_v7, -inf  ;;  %v9261_v53 = vadd.f32 %v9078_v25, %v4318_v38 }
 0x247   : > { %v4166_v33 = vpop.f32.mrf.mxu1  ;;  %v7461_v41 = vpop.f32.mrf.mxu0  ;;  %4343 = vmax.xlane.f32.xlu0 %v4342_v0 }
 0x248   : > { %10164 = vst [vmem:[#allocation9_spill] sm:$0xff] %v9261_v53  ;;  %v4320_v2 = vadd.f32 %v7434_v61, %v4172_v16  ;;  %v4167_v58 = vadd.f32 %v4166_v33, %v4037_v15  ;;  %v4351_v23 = vsel %vm1801_vm2, %v9261_v53, -inf  ;;  %v9266_v54 = vadd.f32 %v9078_v25, %v4317_v59 }
 0x249   : > { %v7441_v19 = vpop.f32.mrf.mxu1  ;;  %v4666_v3 = vpop.f32.mrf.mxu0  ;;  %4352 = vmax.xlane.f32.xlu1 %v4351_v23 }
 0x24a   : > { %10165 = vst [vmem:[#allocation11_spill] sm:$0xff] %v9266_v54  ;;  %v4319_v1 = vadd.f32 %v4304_v8, %v4167_v58  ;;  %v4348_v62 = vsel %vm1801_vm2, %v9266_v54, -inf  ;;  %v9271_v12 = vadd.f32 %v9078_v25, %v4320_v2  ;;  %v4672_v58 = vadd.f32 %v7461_v41, %v7441_v19 }
 0x24b   : > { %v4537_v14 = vpop.f32.mrf.mxu1  ;;  %v7464_v5 = vpop.f32.mrf.mxu0  ;;  %4349 = vmax.xlane.f32.xlu0 %v4348_v62 }
 0x24c   : > { %10166 = vst [vmem:[#allocation30_spill] sm:$0xff] %v9271_v12  ;;  %v4357_v15 = vsel %vm1801_vm2, %v9271_v12, -inf  ;;  %v9276_v10 = vadd.f32 %v9078_v25, %v4319_v1  ;;  %v4667_v62 = vadd.f32 %v4666_v3, %v4537_v14 }
 0x24d   : > { %v7444_v40 = vpop.f32.mrf.mxu1  ;;  %v4676_v57 = vpop.f32.mrf.mxu0  ;;  %4358 = vmax.xlane.f32.xlu1 %v4357_v15 }
 0x24e   : > { %10167 = vst [vmem:[#allocation31_spill] sm:$0xff] %v9276_v10  ;;  %v4354_v61 = vsel %vm1801_vm2, %v9276_v10, -inf  ;;  %v4682_v10 = vadd.f32 %v7464_v5, %v7444_v40 }
 0x24f   : > { %v4547_v38 = vpop.f32.mrf.mxu1  ;;  %v7467_v11 = vpop.f32.mrf.mxu0  ;;  %4355 = vmax.xlane.f32.xlu0 %v4354_v61 }
 0x250   : > { %v4677_v26 = vadd.f32 %v4676_v57, %v4547_v38 }
 0x251   : > { %v7447_v6 = vpop.f32.mrf.mxu1  ;;  %v4686_v56 = vpop.f32.mrf.mxu0 }
 0x252   : > { %v4692_v5 = vadd.f32 %v7467_v11, %v7447_v6 }
 0x253   : > { %v4557_v8 = vpop.f32.mrf.mxu1  ;;  %v7470_v59 = vpop.f32.mrf.mxu0 }
 0x255   : > { %v7450_v16 = vpop.f32.mrf.mxu1  ;;  %v4696_v0 = vpop.f32.mrf.mxu0 }
 0x256   : > { %v4702_v6 = vadd.f32 %v7470_v59, %v7450_v16 }
 0x257   : > { %v4567_v33 = vpop.f32.mrf.mxu1  ;;  %v7491_v2 = vpop.f32.mrf.mxu0 }
 0x259   : > { %v7475_v23 = vpop.f32.mrf.mxu1  ;;  %v9280_v1 = vpop.f32.mrf.mxu0 }
 0x25a   : > { %v4844_v15 = vadd.f32 %v7475_v23, %v4672_v58 }
 0x25b   : > { %v4804_v12 = vpop.f32.mrf.mxu1  ;;  %v9282_v54 = vpop.f32.mrf.mxu0 }
 0x25c   : > { %v4843_v53 = vadd.f32 %v4804_v12, %v4667_v62  ;;  %v9285_v61 = vadd.f32 %v9078_v25, %v4844_v15 }
 0x25d   : > { %v7478_v7 = vpop.f32.mrf.mxu1  ;;  %v9287_v51 = vpop.f32.mrf.mxu0 }
 0x25e   : > { %v4846_v18 = vadd.f32 %v7478_v7, %v4682_v10  ;;  %v4869_v41 = vsel %vm1801_vm2, %v9285_v61, -inf  ;;  %v9292_v19 = vadd.f32 %v9078_v25, %v4843_v53  ;;  %v4687_v10 = vadd.f32 %v4686_v56, %v4557_v8 }
 0x25f   : > { %v4814_v3 = vpop.f32.mrf.mxu1  ;;  %v9294_v14 = vpop.f32.mrf.mxu0  ;;  %4870 = vmax.xlane.f32.xlu1 %v4869_v41  ;;  %v4697_v41 = vadd.f32 %v4696_v0, %v4567_v33 }
 0x260   : > { %v4845_v12 = vadd.f32 %v4814_v3, %v4677_v26  ;;  %v4866_v40 = vsel %vm1801_vm2, %v9292_v19, -inf  ;;  %v9299_v58 = vadd.f32 %v9078_v25, %v4846_v18 }
 0x261   : > { %v7481_v57 = vpop.f32.mrf.mxu1  ;;  %v9301_v7 = vpop.f32.mrf.mxu0  ;;  %4867 = vmax.xlane.f32.xlu0 %v4866_v40 }
 0x262   : > { %v4848_v38 = vadd.f32 %v7481_v57, %v4692_v5  ;;  %v4875_v53 = vsel %vm1801_vm2, %v9299_v58, -inf  ;;  %v9306_v23 = vadd.f32 %v9078_v25, %v4845_v12 }
 0x263   : > { %v4824_v11 = vpop.f32.mrf.mxu1  ;;  %v9308_v26 = vpop.f32.mrf.mxu0  ;;  %4876 = vmax.xlane.f32.xlu1 %v4875_v53 }
 0x264   : > { %v4847_v62 = vadd.f32 %v4824_v11, %v4687_v10  ;;  %v4872_v18 = vsel %vm1801_vm2, %v9306_v23, -inf  ;;  %v9313_v15 = vadd.f32 %v9078_v25, %v4848_v38 }
 0x265   : > { %v7484_v56 = vpop.f32.mrf.mxu1  ;;  %v9315_v8 = vpop.f32.mrf.mxu0  ;;  %4873 = vmax.xlane.f32.xlu0 %v4872_v18 }
 0x266   : > { %v4850_v3 = vadd.f32 %v7484_v56, %v4702_v6  ;;  %v2195_v5 = vpop.xlane.xlu0 %2194  ;;  %v4881_v12 = vsel %vm1801_vm2, %v9313_v15, -inf  ;;  %v9320_v40 = vadd.f32 %v9078_v25, %v4847_v62 }
 0x267   : > { %v2215_v59 = vsub.f32 %v9081_v45, %v2195_v5  ;;  %v4834_v16 = vpop.f32.mrf.mxu1  ;;  %4882 = vmax.xlane.f32.xlu1 %v4881_v12  ;;  %v7525_v57 = vpop.f32.mrf.mxu0 }
 0x268   : > { %10168 = vst [vmem:[#allocation13_spill] sm:$0xff] %v9320_v40  ;;  %v4849_v10 = vadd.f32 %v4834_v16, %v4697_v41  ;;  %v4878_v38 = vsel %vm1801_vm2, %v9320_v40, -inf  ;;  %v9326_v53 = vadd.f32 %v9078_v25, %v4850_v3 }
 0x269   : > { %v2224_v0 = vmul.f32 1.442695, %v2215_v59  ;;  %v7511_v33 = vpop.f32.mrf.mxu1  ;;  %4879 = vmax.xlane.f32.xlu0 %v4878_v38  ;;  %v5335_v11 = vpop.f32.mrf.mxu0 }
 0x26a   : > { %10169 = vst [vmem:[#allocation15_spill] sm:$0xff] %v9326_v53  ;;  %v5203_v6 = vadd.f32 %v7511_v33, %v7491_v2  ;;  %v2201_v18 = vpop.xlane.xlu1 %2200  ;;  %v2192_v62 = vpop.xlane.xlu0 %2191  ;;  %v4887_v45 = vsel %vm1801_vm2, %v9326_v53, -inf  ;;  %v9331_v56 = vadd.f32 %v9078_v25, %v4849_v10 }
 0x26b   : > { %v2217_v41 = vsub.f32 %v9089_v24, %v2201_v18  ;;  %v2214_v5 = vsub.f32 %v9086_v34, %v2192_v62  ;;  %v5197_v12 = vpop.f32.mrf.mxu1  ;;  %4888 = vmax.xlane.f32.xlu1 %v4887_v45  ;;  %v7528_v3 = vpop.f32.mrf.mxu0  ;;  %7643 = vpow2.f32 %v2224_v0 }
 0x26c   : > { %v5375_v59 = vadd.f32 %v7525_v57, %v5203_v6  ;;  %v5198_v16 = vadd.f32 %v5197_v12, %v9280_v1  ;;  %v4884_v2 = vsel %vm1801_vm2, %v9331_v56, -inf }
 0x26d   : > { %v2222_v38 = vmul.f32 1.442695, %v2214_v5  ;;  %v7514_v33 = vpop.f32.mrf.mxu1  ;;  %4885 = vmax.xlane.f32.xlu0 %v4884_v2  ;;  %v5345_v53 = vpop.f32.mrf.mxu0  ;;  %v2228_v18 = vmul.f32 1.442695, %v2217_v41 }
 0x26e   : > { %v5374_v10 = vadd.f32 %v5335_v11, %v5198_v16  ;;  %v5213_v40 = vadd.f32 %v7514_v33, %v9282_v54  ;;  %v2198_v24 = vpop.xlane.xlu1 %2197  ;;  %v9340_v34 = vadd.f32 %v9078_v25, %v5375_v59 }
 0x26f   : > { %v2216_v0 = vsub.f32 %v9096_v60, %v2198_v24  ;;  %v5207_v57 = vpop.f32.mrf.mxu1  ;;  %v7531_v6 = vpop.f32.mrf.mxu0  ;;  %7645 = vpow2.f32 %v2222_v38 }
 0x270   : > { %v5377_v1 = vadd.f32 %v7528_v3, %v5213_v40  ;;  %v5208_v62 = vadd.f32 %v5207_v57, %v9287_v51  ;;  %v2204_v45 = vpop.xlane.xlu0 %2203  ;;  %v5400_v5 = vsel %vm1801_vm2, %v9340_v34, -inf  ;;  %v9347_v59 = vadd.f32 %v9078_v25, %v5374_v10 }
 0x271   : > { %v2226_v11 = vmul.f32 1.442695, %v2216_v0  ;;  %v7517_v12 = vpop.f32.mrf.mxu1  ;;  %5401 = vmax.xlane.f32.xlu1 %v5400_v5  ;;  %v5355_v54 = vpop.f32.mrf.mxu0  ;;  %7647 = vpow2.f32 %v2228_v18  ;;  %v2218_v51 = vsub.f32 %v9101_v52, %v2204_v45 }
 0x272   : > { %v5376_v41 = vadd.f32 %v5345_v53, %v5208_v62  ;;  %v5223_v60 = vadd.f32 %v7517_v12, %v9294_v14  ;;  %v2207_v16 = vpop.xlane.xlu1 %2206  ;;  %v9351_v2 = vadd.f32 %v9078_v25, %v5377_v1  ;;  %v5397_v38 = vsel %vm1801_vm2, %v9347_v59, -inf }
 0x273   : > { %v2219_v40 = vsub.f32 %v9104_v55, %v2207_v16  ;;  %v5217_v3 = vpop.f32.mrf.mxu1  ;;  %v7534_v33 = vpop.f32.mrf.mxu0  ;;  %5398 = vmax.xlane.f32.xlu0 %v5397_v38  ;;  %7649 = vpow2.f32 %v2226_v11  ;;  %v2230_v45 = vmul.f32 1.442695, %v2218_v51 }
 0x274   : > { %v5379_v24 = vadd.f32 %v7531_v6, %v5223_v60  ;;  %v5218_v10 = vadd.f32 %v5217_v3, %v9301_v7  ;;  %v2210_v53 = vpop.xlane.xlu0 %2209  ;;  %v5406_v14 = vsel %vm1801_vm2, %v9351_v2, -inf  ;;  %v9361_v0 = vadd.f32 %v9078_v25, %v5376_v41 }
 0x275   : > { %v2232_v52 = vmul.f32 1.442695, %v2219_v40  ;;  %v7520_v18 = vpop.f32.mrf.mxu1  ;;  %5407 = vmax.xlane.f32.xlu1 %v5406_v14  ;;  %v5365_v55 = vpop.f32.mrf.mxu0  ;;  %v2220_v5 = vsub.f32 %v9111_v46, %v2210_v53 }
 0x276   : > { %v5378_v57 = vadd.f32 %v5355_v54, %v5218_v10  ;;  %v5233_v1 = vadd.f32 %v7520_v18, %v9308_v26  ;;  %v2213_v62 = vpop.xlane.xlu1 %2212  ;;  %v5403_v7 = vsel %vm1801_vm2, %v9361_v0, -inf  ;;  %v9367_v6 = vadd.f32 %v9078_v25, %v5379_v24 }
 0x277   : > { %7651 = vpow2.f32 %v2232_v52  ;;  %v2221_v11 = vsub.f32 %v9114_v20, %v2213_v62  ;;  %v5227_v12 = vpop.f32.mrf.mxu1  ;;  %v7561_v41 = vpop.f32.mrf.mxu0  ;;  %5404 = vmax.xlane.f32.xlu0 %v5403_v7  ;;  %v2234_v20 = vmul.f32 1.442695, %v2220_v5 }
 0x278   : > { %10170 = vst [vmem:[#allocation32_spill] sm:$0xff] %v9367_v6  ;;  %v5381_v60 = vadd.f32 %v7534_v33, %v5233_v1  ;;  %v5228_v54 = vadd.f32 %v5227_v12, %v9315_v8  ;;  %v5412_v26 = vsel %vm1801_vm2, %v9367_v6, -inf  ;;  %v9375_v16 = vadd.f32 %v9078_v25, %v5378_v57  ;;  %v9377_v40 = vpop.eup %7643 }
 0x279   : > { %10172 = vst [vmem:[#allocation17_spill] sm:$0xff] %v9377_v40  ;;  %v2236_v51 = vmul.f32 1.442695, %v2221_v11  ;;  %v7541_v3 = vpop.f32.mrf.mxu1  ;;  %5413 = vmax.xlane.f32.xlu1 %v5412_v26  ;;  %7653 = vpow2.f32 %v2230_v45  ;;  %v5727_v8 = vpop.f32.mrf.mxu0  ;;  %v2241_v24 = vsel %vm1801_vm2, %v9377_v40, 0.0 }
 0x27a   : > { %10171 = vst [vmem:[#allocation33_spill] sm:$0xff] %v9375_v16  ;;  %v5409_v46 = vsel %vm1801_vm2, %v9375_v16, -inf  ;;  %v5380_v38 = vadd.f32 %v5365_v55, %v5228_v54  ;;  %v9384_v10 = vadd.f32 %v9078_v25, %v5381_v60 }
 0x27b   : > { %v5598_v33 = vpop.f32.mrf.mxu1  ;;  %7655 = vpow2.f32 %v2236_v51  ;;  %5410 = vmax.xlane.f32.xlu0 %v5409_v46  ;;  %v7564_v18 = vpop.f32.mrf.mxu0 }
 0x27c   : > { %10173 = vst [vmem:[#allocation19_spill] sm:$0xff] %v9384_v10  ;;  %v9386_v53 = vpop.eup %7645  ;;  %7657 = vpow2.f32 %v2234_v20  ;;  %v9391_v57 = vadd.f32 %v9078_v25, %v5380_v38  ;;  %v5418_v62 = vsel %vm1801_vm2, %v9384_v10, -inf  ;;  %v5733_v38 = vadd.f32 %v7561_v41, %v7541_v3 }
 0x27d   : > { %10174 = vst [vmem:[#allocation34_spill] sm:$0xff] %v9386_v53  ;;  %v7544_v14 = vpop.f32.mrf.mxu1  ;;  %2242 = vadd.xlane.f32.xlu1 %v2241_v24  ;;  %v2238_v52 = vsel %vm1801_vm2, %v9386_v53, 0.0  ;;  %v5737_v5 = vpop.f32.mrf.mxu0 }
 0x27e   : > { %10175 = vst [vmem:[#allocation35_spill] sm:$0xff] %v9391_v57  ;;  %v9393_v1 = vpop.eup %7647  ;;  %v5415_v12 = vsel %vm1801_vm2, %v9391_v57, -inf }
 0x27f   : > { %v5608_v55 = vpop.f32.mrf.mxu1  ;;  %10176 = vst [vmem:[#allocation21_spill] sm:$0xff] %v9393_v1  ;;  %2239 = vadd.xlane.f32.xlu0 %v2238_v52  ;;  %v2247_v25 = vsel %vm1801_vm2, %v9393_v1, 0.0  ;;  %v7567_v26 = vpop.f32.mrf.mxu0 }
 0x280   : > { %v9397_v45 = vpop.eup %7649 }
 0x281   : > { %v7547_v7 = vpop.f32.mrf.mxu1  ;;  %5419 = vmax.xlane.f32.xlu1 %v5418_v62  ;;  %10177 = vst [vmem:[#allocation36_spill] sm:$0xff] %v9397_v45  ;;  %v2244_v46 = vsel %vm1801_vm2, %v9397_v45, 0.0  ;;  %v5728_v45 = vadd.f32 %v5727_v8, %v5598_v33  ;;  %v5747_v41 = vpop.f32.mrf.mxu0 }
 0x283   : > { %v5618_v11 = vpop.f32.mrf.mxu1  ;;  %5416 = vmax.xlane.f32.xlu0 %v5415_v12  ;;  %v7570_v6 = vpop.f32.mrf.mxu0 }
 0x284   : > { %v9401_v60 = vpop.eup %7651 }
 0x285   : > { %10178 = vst [vmem:[#allocation8_spill] sm:$0xff] %v9401_v60  ;;  %v7550_v54 = vpop.f32.mrf.mxu1  ;;  %2248 = vadd.xlane.f32.xlu1 %v2247_v25  ;;  %v2253_v52 = vsel %vm1801_vm2, %v9401_v60, 0.0  ;;  %v9419_v25 = vld [vmem:[%s10012_s6] ss:$0 sm:$0xff] }
 0x286   : > { %v9409_v20 = vpop.eup %7653 }
 0x287   : > { %v9405_v51 = vpop.f32.mrf.mxu1  ;;  %10179 = vst [vmem:[#allocation10_spill] sm:$0xff] %v9409_v20  ;;  %2245 = vadd.xlane.f32.xlu0 %v2244_v46  ;;  %v2250_v60 = vsel %vm1801_vm2, %v9409_v20, 0.0 }
 0x288   : > { %v2749_v24 = vpop.xlane.xlu1 %2748  ;;  %v9413_v62 = vpop.eup %7655 }
 0x289   : > { %v2769_v12 = vsub.f32 %v9121_v29, %v2749_v24  ;;  %v7575_v1 = vpop.f32.mrf.mxu1  ;;  %2254 = vadd.xlane.f32.xlu1 %v2253_v52  ;;  %v9424_v10 = vpop.eup %7657  ;;  %v5743_v29 = vadd.f32 %v7564_v18, %v7544_v14  ;;  %v2259_v16 = vsel %vm1801_vm2, %v9413_v62, 0.0 }
 0x28a   : > { %v5906_v53 = vadd.f32 %v7575_v1, %v5733_v38  ;;  %v2746_v40 = vpop.xlane.xlu0 %2745 }
 0x28b   : > { %v2778_v3 = vmul.f32 1.442695, %v2769_v12  ;;  %v2768_v46 = vsub.f32 %v9126_v31, %v2746_v40  ;;  %v5866_v57 = vpop.f32.mrf.mxu1  ;;  %2251 = vadd.xlane.f32.xlu0 %v2250_v60  ;;  %v5738_v31 = vadd.f32 %v5737_v5, %v5608_v55  ;;  %v5753_v40 = vadd.f32 %v7567_v26, %v7547_v7 }
 0x28c   : > { %v5905_v24 = vadd.f32 %v5866_v57, %v5728_v45  ;;  %v2755_v52 = vpop.xlane.xlu1 %2754  ;;  %v9429_v33 = vadd.f32 %v9419_v25, %v5906_v53  ;;  %v2256_v57 = vsel %vm1801_vm2, %v9424_v10, 0.0  ;;  %v5748_v5 = vadd.f32 %v5747_v41, %v5618_v11 }
 0x28d   : > { %v2771_v8 = vsub.f32 %v9131_v30, %v2755_v52  ;;  %v7578_v1 = vpop.f32.mrf.mxu1  ;;  %2260 = vadd.xlane.f32.xlu1 %v2259_v16  ;;  %v2776_v38 = vmul.f32 1.442695, %v2768_v46  ;;  %7659 = vpow2.f32 %v2778_v3  ;;  %v5763_v26 = vadd.f32 %v7570_v6, %v7550_v54 }
 0x28e   : > { %v5908_v12 = vadd.f32 %v7578_v1, %v5743_v29  ;;  %v2752_v20 = vpop.xlane.xlu0 %2751  ;;  %v9436_v53 = vadd.f32 %v9419_v25, %v5905_v24  ;;  %v5931_v55 = vsel %vm1801_vm2, %v9429_v33, -inf  ;;  %v5757_v29 = vpop.f32.mrf.mxu0 }
 0x28f   : > { %v2770_v14 = vsub.f32 %v9136_v42, %v2752_v20  ;;  %v5876_v18 = vpop.f32.mrf.mxu1  ;;  %v2782_v45 = vmul.f32 1.442695, %v2771_v8  ;;  %2257 = vadd.xlane.f32.xlu0 %v2256_v57  ;;  %7661 = vpow2.f32 %v2776_v38 }
 0x290   : > { %v5907_v30 = vadd.f32 %v5876_v18, %v5738_v31  ;;  %v2761_v16 = vpop.xlane.xlu1 %2760  ;;  %v9441_v7 = vadd.f32 %v9419_v25, %v5908_v12  ;;  %v5928_v1 = vsel %vm1801_vm2, %v9436_v53, -inf }
 0x291   : > { %v2773_v42 = vsub.f32 %v9141_v39, %v2761_v16  ;;  %v7581_v60 = vpop.f32.mrf.mxu1  ;;  %5932 = vmax.xlane.f32.xlu1 %v5931_v55  ;;  %v2780_v20 = vmul.f32 1.442695, %v2770_v14  ;;  %7663 = vpow2.f32 %v2782_v45 }
 0x292   : > { %v5910_v3 = vadd.f32 %v7581_v60, %v5753_v40  ;;  %v2758_v46 = vpop.xlane.xlu0 %2757  ;;  %v9448_v31 = vadd.f32 %v9419_v25, %v5907_v30  ;;  %v5937_v6 = vsel %vm1801_vm2, %v9441_v7, -inf  ;;  %v5758_v40 = vadd.f32 %v5757_v29, %v9405_v51 }
 0x293   : > { %v2786_v24 = vmul.f32 1.442695, %v2773_v42  ;;  %v2772_v52 = vsub.f32 %v9146_v63, %v2758_v46  ;;  %v5886_v8 = vpop.f32.mrf.mxu1  ;;  %5929 = vmax.xlane.f32.xlu0 %v5928_v1  ;;  %7665 = vpow2.f32 %v2780_v20 }
 0x294   : > { %v5909_v39 = vadd.f32 %v5886_v8, %v5748_v5  ;;  %v2767_v11 = vpop.xlane.xlu1 %2766  ;;  %v9453_v54 = vadd.f32 %v9419_v25, %v5910_v3  ;;  %v5934_v45 = vsel %vm1801_vm2, %v9448_v31, -inf }
 0x295   : > { %v2775_v41 = vsub.f32 %v9151_v27, %v2767_v11  ;;  %v7584_v63 = vpop.f32.mrf.mxu1  ;;  %5938 = vmax.xlane.f32.xlu1 %v5937_v6  ;;  %v2784_v38 = vmul.f32 1.442695, %v2772_v52  ;;  %7667 = vpow2.f32 %v2786_v24 }
 0x296   : > { %v5912_v12 = vadd.f32 %v7584_v63, %v5763_v26  ;;  %v2764_v14 = vpop.xlane.xlu0 %2763  ;;  %v9461_v30 = vadd.f32 %v9419_v25, %v5909_v39  ;;  %v5943_v51 = vsel %vm1801_vm2, %v9453_v54, -inf }
 0x297   : > { %v2774_v18 = vsub.f32 %v9156_v47, %v2764_v14  ;;  %v5896_v57 = vpop.f32.mrf.mxu1  ;;  %v2790_v16 = vmul.f32 1.442695, %v2775_v41  ;;  %5935 = vmax.xlane.f32.xlu0 %v5934_v45  ;;  %7669 = vpow2.f32 %v2784_v38 }
 0x298   : > { %v5911_v27 = vadd.f32 %v5896_v57, %v5758_v40  ;;  %v9466_v55 = vadd.f32 %v9419_v25, %v5912_v12  ;;  %v5940_v60 = vsel %vm1801_vm2, %v9461_v30, -inf }
 0x299   : > { %5944 = vmax.xlane.f32.xlu1 %v5943_v51  ;;  %v2788_v47 = vmul.f32 1.442695, %v2774_v18  ;;  %7671 = vpow2.f32 %v2790_v16 }
 0x29a   : > { %v3280_v5 = vpop.xlane.xlu1 %3279  ;;  %v9472_v26 = vadd.f32 %v9419_v25, %v5911_v27  ;;  %v9474_v20 = vpop.eup %7659  ;;  %v5949_v46 = vsel %vm1801_vm2, %v9466_v55, -inf }
 0x29b   : > { %v3300_v42 = vsub.f32 %v9161_v35, %v3280_v5  ;;  %5941 = vmax.xlane.f32.xlu0 %v5940_v60  ;;  %7673 = vpow2.f32 %v2788_v47  ;;  %v2795_v11 = vsel %vm1801_vm2, %v9474_v20, 0.0 }
 0x29c   : > { %v3277_v3 = vpop.xlane.xlu0 %3276  ;;  %v9479_v35 = vpop.eup %7661  ;;  %v5946_v1 = vsel %vm1801_vm2, %v9472_v26, -inf }
 0x29d   : > { %v3309_v29 = vmul.f32 1.442695, %v3300_v42  ;;  %v3299_v24 = vsub.f32 %v9166_v21, %v3277_v3  ;;  %5950 = vmax.xlane.f32.xlu1 %v5949_v46  ;;  %v2792_v12 = vsel %vm1801_vm2, %v9479_v35, 0.0 }
 0x29e   : > { %v3286_v52 = vpop.xlane.xlu1 %3285  ;;  %v9486_v6 = vpop.eup %7663 }
 0x29f   : > { %v3307_v8 = vmul.f32 1.442695, %v3299_v24  ;;  %v3302_v25 = vsub.f32 %v9171_v28, %v3286_v52  ;;  %7675 = vpow2.f32 %v3309_v29  ;;  %5947 = vmax.xlane.f32.xlu0 %v5946_v1  ;;  %v2801_v57 = vsel %vm1801_vm2, %v9486_v6, 0.0 }
 0x2a0   : > { %v3283_v39 = vpop.xlane.xlu0 %3282  ;;  %v9489_v40 = vpop.eup %7665 }
 0x2a1   : > { %v3313_v21 = vmul.f32 1.442695, %v3302_v25  ;;  %v3301_v41 = vsub.f32 %v9176_v9, %v3283_v39  ;;  %2796 = vadd.xlane.f32.xlu1 %v2795_v11  ;;  %7677 = vpow2.f32 %v3307_v8  ;;  %v2798_v5 = vsel %vm1801_vm2, %v9489_v40, 0.0 }
 0x2a2   : > { %v3292_v63 = vpop.xlane.xlu1 %3291  ;;  %v9494_v14 = vpop.eup %7667 }
 0x2a3   : > { %v3311_v28 = vmul.f32 1.442695, %v3301_v41  ;;  %v3304_v38 = vsub.f32 %v9181_v50, %v3292_v63  ;;  %7679 = vpow2.f32 %v3313_v21  ;;  %2793 = vadd.xlane.f32.xlu0 %v2792_v12  ;;  %v2807_v42 = vsel %vm1801_vm2, %v9494_v14, 0.0 }
 0x2a4   : > { %v3289_v18 = vpop.xlane.xlu0 %3288  ;;  %v9499_v27 = vpop.eup %7669 }
 0x2a5   : > { %v3317_v9 = vmul.f32 1.442695, %v3304_v38  ;;  %v3303_v45 = vsub.f32 %v9186_v48, %v3289_v18  ;;  %2802 = vadd.xlane.f32.xlu1 %v2801_v57  ;;  %7681 = vpow2.f32 %v3311_v28 }
 0x2a6   : > { %v3298_v16 = vpop.xlane.xlu1 %3297  ;;  %v9506_v60 = vpop.eup %7671 }
 0x2a7   : > { %v3315_v50 = vmul.f32 1.442695, %v3303_v45  ;;  %v3306_v51 = vsub.f32 %v9191_v13, %v3298_v16  ;;  %7683 = vpow2.f32 %v3317_v9  ;;  %2799 = vadd.xlane.f32.xlu0 %v2798_v5  ;;  %v2804_v13 = vsel %vm1801_vm2, %v9499_v27, 0.0 }
 0x2a8   : > { %v3295_v47 = vpop.xlane.xlu0 %3294  ;;  %v9511_v29 = vpop.eup %7673  ;;  %v2813_v24 = vsel %vm1801_vm2, %v9506_v60, 0.0 }
 0x2a9   : > { %v3321_v48 = vmul.f32 1.442695, %v3306_v51  ;;  %v3305_v3 = vsub.f32 %v9196_v43, %v3295_v47  ;;  %2808 = vadd.xlane.f32.xlu1 %v2807_v42  ;;  %7685 = vpow2.f32 %v3315_v50  ;;  %v2810_v43 = vsel %vm1801_vm2, %v9511_v29, 0.0 }
 0x2ab   : > { %v3319_v46 = vmul.f32 1.442695, %v3305_v3  ;;  %7687 = vpow2.f32 %v3321_v48  ;;  %2805 = vadd.xlane.f32.xlu0 %v2804_v13 }
 0x2ac   : > { %v9515_v52 = vpop.eup %7675 }
 0x2ad   : > { %2814 = vadd.xlane.f32.xlu1 %v2813_v24  ;;  %7689 = vpow2.f32 %v3319_v46  ;;  %v3326_v25 = vsel %vm1801_vm2, %v9515_v52, 0.0 }
 0x2ae   : > { %v9519_v8 = vpop.eup %7677 }
 0x2af   : > { %2811 = vadd.xlane.f32.xlu0 %v2810_v43  ;;  %v3323_v39 = vsel %vm1801_vm2, %v9519_v8, 0.0 }
 0x2b0   : > { %v9523_v1 = vpop.eup %7679 }
 0x2b1   : > { %3327 = vadd.xlane.f32.xlu1 %v3326_v25  ;;  %v3332_v21 = vsel %vm1801_vm2, %v9523_v1, 0.0 }
 0x2b2   : > { %v9527_v11 = vpop.eup %7681 }
 0x2b3   : > { %3324 = vadd.xlane.f32.xlu0 %v3323_v39  ;;  %v3329_v63 = vsel %vm1801_vm2, %v9527_v11, 0.0 }
 0x2b4   : > { %v9531_v41 = vpop.eup %7683 }
 0x2b5   : > { %3333 = vadd.xlane.f32.xlu1 %v3332_v21  ;;  %v3338_v12 = vsel %vm1801_vm2, %v9531_v41, 0.0 }
 0x2b6   : > { %v9535_v28 = vpop.eup %7685 }
 0x2b7   : > { %3330 = vadd.xlane.f32.xlu0 %v3329_v63  ;;  %v3335_v50 = vsel %vm1801_vm2, %v9535_v28, 0.0 }
 0x2b8   : > { %v3810_v38 = vpop.xlane.xlu1 %3809  ;;  %v9539_v18 = vpop.eup %7687 }
 0x2b9   : > { %v3830_v57 = vsub.f32 %v9201_v44, %v3810_v38  ;;  %3339 = vadd.xlane.f32.xlu1 %v3338_v12  ;;  %v3344_v47 = vsel %vm1801_vm2, %v9539_v18, 0.0 }
 0x2ba   : > { %v3807_v9 = vpop.xlane.xlu0 %3806  ;;  %v9545_v51 = vpop.eup %7689 }
 0x2bb   : > { %v3839_v45 = vmul.f32 1.442695, %v3830_v57  ;;  %v3829_v16 = vsub.f32 %v9206_v17, %v3807_v9  ;;  %3336 = vadd.xlane.f32.xlu0 %v3335_v50  ;;  %v3341_v46 = vsel %vm1801_vm2, %v9545_v51, 0.0 }
 0x2bc   : > { %v3816_v5 = vpop.xlane.xlu1 %3815 }
 0x2bd   : > { %7691 = vpow2.f32 %v3839_v45  ;;  %v3837_v42 = vmul.f32 1.442695, %v3829_v16  ;;  %v3832_v48 = vsub.f32 %v9211_v37, %v3816_v5  ;;  %3345 = vadd.xlane.f32.xlu1 %v3344_v47  ;;  %v10180_v16 = vld [vmem:[#allocation5_spill] sm:$0xff] }
 0x2be   : > { %v3813_v44 = vpop.xlane.xlu0 %3812 }
 0x2bf   : > { %7693 = vpow2.f32 %v3837_v42  ;;  %v3843_v3 = vmul.f32 1.442695, %v3832_v48  ;;  %v3831_v17 = vsub.f32 %v9216_v49, %v3813_v44  ;;  %3342 = vadd.xlane.f32.xlu0 %v3341_v46  ;;  %v10181_v42 = vld [vmem:[#allocation7_spill] sm:$0xff]  ;;  %v10182_v46 = vld [vmem:[#allocation6_spill] sm:$0xff] }
 0x2c0   : > { %v3822_v13 = vpop.xlane.xlu1 %3821 }
 0x2c1   : > { %7695 = vpow2.f32 %v3843_v3  ;;  %v3841_v24 = vmul.f32 1.442695, %v3831_v17  ;;  %v3834_v43 = vsub.f32 %v9221_v22, %v3822_v13 }
 0x2c2   : > { %v3819_v25 = vpop.xlane.xlu0 %3818 }
 0x2c3   : > { %7697 = vpow2.f32 %v3841_v24  ;;  %v3847_v39 = vmul.f32 1.442695, %v3834_v43  ;;  %v3833_v37 = vsub.f32 %v9226_v36, %v3819_v25 }
 0x2c4   : > { %v3828_v21 = vpop.xlane.xlu1 %3827 }
 0x2c5   : > { %7699 = vpow2.f32 %v3847_v39  ;;  %v3845_v63 = vmul.f32 1.442695, %v3833_v37  ;;  %v3836_v38 = vsub.f32 %v9231_v4, %v3828_v21  ;;  %v10183_v37 = vld [vmem:[#allocation29_spill] sm:$0xff] }
 0x2c6   : > { %v3825_v49 = vpop.xlane.xlu0 %3824 }
 0x2c7   : > { %7701 = vpow2.f32 %v3845_v63  ;;  %v3851_v12 = vmul.f32 1.442695, %v3836_v38  ;;  %v3835_v57 = vsub.f32 %v9236_v32, %v3825_v49 }
 0x2c9   : > { %7703 = vpow2.f32 %v3851_v12  ;;  %v3849_v9 = vmul.f32 1.442695, %v3835_v57  ;;  %v10184_v57 = vld [vmem:[#allocation9_spill] sm:$0xff] }
 0x2ca   : > { %v9557_v45 = vpop.eup %7691  ;;  %v4341_v22 = vpop.xlane.xlu1 %4340 }
 0x2cb   : > { %7705 = vpow2.f32 %v3849_v9  ;;  %v4361_v50 = vsub.f32 %v10180_v16, %v4341_v22  ;;  %v3856_v36 = vsel %vm1801_vm2, %v9557_v45, 0.0 }
 0x2cc   : > { %v9562_v5 = vpop.eup %7693  ;;  %3857 = vadd.xlane.f32.xlu1 %v3856_v36  ;;  %v4338_v4 = vpop.xlane.xlu0 %4337 }
 0x2cd   : > { %v4370_v47 = vmul.f32 1.442695, %v4361_v50  ;;  %v4360_v48 = vsub.f32 %v10181_v42, %v4338_v4  ;;  %v3853_v32 = vsel %vm1801_vm2, %v9562_v5, 0.0  ;;  %v10185_v4 = vld [vmem:[#allocation11_spill] sm:$0xff] }
 0x2ce   : > { %v9567_v44 = vpop.eup %7695  ;;  %v4347_v3 = vpop.xlane.xlu1 %4346  ;;  %3854 = vadd.xlane.f32.xlu0 %v3853_v32 }
 0x2cf   : > { %7707 = vpow2.f32 %v4370_v47  ;;  %v4368_v17 = vmul.f32 1.442695, %v4360_v48  ;;  %v4363_v13 = vsub.f32 %v10182_v46, %v4347_v3  ;;  %v3862_v24 = vsel %vm1801_vm2, %v9567_v44, 0.0 }
 0x2d0   : > { %v9572_v43 = vpop.eup %7697  ;;  %3863 = vadd.xlane.f32.xlu1 %v3862_v24  ;;  %v4344_v25 = vpop.xlane.xlu0 %4343 }
 0x2d1   : > { %7709 = vpow2.f32 %v4368_v17  ;;  %v4374_v39 = vmul.f32 1.442695, %v4363_v13  ;;  %v4362_v21 = vsub.f32 %v10183_v37, %v4344_v25  ;;  %v3859_v63 = vsel %vm1801_vm2, %v9572_v43, 0.0  ;;  %v10186_v17 = vld [vmem:[#allocation30_spill] sm:$0xff]  ;;  %v10187_v37 = vld [vmem:[#allocation31_spill] sm:$0xff] }
 0x2d2   : > { %v9577_v38 = vpop.eup %7699  ;;  %v4353_v49 = vpop.xlane.xlu1 %4352  ;;  %3860 = vadd.xlane.f32.xlu0 %v3859_v63 }
 0x2d3   : > { %7711 = vpow2.f32 %v4374_v39  ;;  %v4372_v12 = vmul.f32 1.442695, %v4362_v21  ;;  %v4365_v9 = vsub.f32 %v10184_v57, %v4353_v49  ;;  %v3868_v22 = vsel %vm1801_vm2, %v9577_v38, 0.0 }
 0x2d4   : > { %v9582_v16 = vpop.eup %7701  ;;  %3869 = vadd.xlane.f32.xlu1 %v3868_v22  ;;  %v4350_v50 = vpop.xlane.xlu0 %4349 }
 0x2d5   : > { %7713 = vpow2.f32 %v4372_v12  ;;  %v4378_v36 = vmul.f32 1.442695, %v4365_v9  ;;  %v4364_v47 = vsub.f32 %v10185_v4, %v4350_v50  ;;  %v3865_v42 = vsel %vm1801_vm2, %v9582_v16, 0.0 }
 0x2d6   : > { %v9587_v48 = vpop.eup %7703  ;;  %v4359_v32 = vpop.xlane.xlu1 %4358  ;;  %3866 = vadd.xlane.f32.xlu0 %v3865_v42 }
 0x2d7   : > { %7715 = vpow2.f32 %v4378_v36  ;;  %v4376_v3 = vmul.f32 1.442695, %v4364_v47  ;;  %v4367_v46 = vsub.f32 %v10186_v17, %v4359_v32  ;;  %v3874_v13 = vsel %vm1801_vm2, %v9587_v48, 0.0 }
 0x2d8   : > { %v9592_v24 = vpop.eup %7705  ;;  %3875 = vadd.xlane.f32.xlu1 %v3874_v13  ;;  %v4356_v25 = vpop.xlane.xlu0 %4355 }
 0x2d9   : > { %7717 = vpow2.f32 %v4376_v3  ;;  %v4382_v39 = vmul.f32 1.442695, %v4367_v46  ;;  %v4366_v21 = vsub.f32 %v10187_v37, %v4356_v25  ;;  %v3871_v63 = vsel %vm1801_vm2, %v9592_v24, 0.0 }
 0x2da   : > { %3872 = vadd.xlane.f32.xlu0 %v3871_v63 }
 0x2db   : > { %7719 = vpow2.f32 %v4382_v39  ;;  %v4380_v49 = vmul.f32 1.442695, %v4366_v21 }
 0x2dc   : > { %v9597_v12 = vpop.eup %7707 }
 0x2dd   : > { %7721 = vpow2.f32 %v4380_v49  ;;  %v4387_v57 = vsel %vm1801_vm2, %v9597_v12, 0.0 }
 0x2de   : > { %v9601_v9 = vpop.eup %7709  ;;  %4388 = vadd.xlane.f32.xlu1 %v4387_v57 }
 0x2df   : > { %v4384_v22 = vsel %vm1801_vm2, %v9601_v9, 0.0 }
 0x2e0   : > { %v9605_v50 = vpop.eup %7711  ;;  %4385 = vadd.xlane.f32.xlu0 %v4384_v22 }
 0x2e1   : > { %v4393_v36 = vsel %vm1801_vm2, %v9605_v50, 0.0 }
 0x2e2   : > { %v9609_v4 = vpop.eup %7713  ;;  %4394 = vadd.xlane.f32.xlu1 %v4393_v36 }
 0x2e3   : > { %v4390_v47 = vsel %vm1801_vm2, %v9609_v4, 0.0 }
 0x2e4   : > { %v9613_v42 = vpop.eup %7715  ;;  %4391 = vadd.xlane.f32.xlu0 %v4390_v47 }
 0x2e5   : > { %v4399_v32 = vsel %vm1801_vm2, %v9613_v42, 0.0 }
 0x2e6   : > { %v9617_v3 = vpop.eup %7717  ;;  %4400 = vadd.xlane.f32.xlu1 %v4399_v32 }
 0x2e7   : > { %v4396_v17 = vsel %vm1801_vm2, %v9617_v3, 0.0 }
 0x2e8   : > { %v9621_v46 = vpop.eup %7719  ;;  %v4871_v13 = vpop.xlane.xlu1 %4870  ;;  %4397 = vadd.xlane.f32.xlu0 %v4396_v17 }
 0x2e9   : > { %10188 = vst [vmem:[#allocation12_spill] sm:$0xff] %v9621_v46  ;;  %v4891_v25 = vsub.f32 %v9285_v61, %v4871_v13  ;;  %v4405_v39 = vsel %vm1801_vm2, %v9621_v46, 0.0 }
 0x2ea   : > { %v9626_v37 = vpop.eup %7721  ;;  %4406 = vadd.xlane.f32.xlu1 %v4405_v39  ;;  %v4868_v21 = vpop.xlane.xlu0 %4867 }
 0x2eb   : > { %10189 = vst [vmem:[#allocation14_spill] sm:$0xff] %v9626_v37  ;;  %v4900_v63 = vmul.f32 1.442695, %v4891_v25  ;;  %v4890_v49 = vsub.f32 %v9292_v19, %v4868_v21  ;;  %v4402_v57 = vsel %vm1801_vm2, %v9626_v37, 0.0  ;;  %v10190_v37 = vld [vmem:[#allocation13_spill] sm:$0xff] }
 0x2ec   : > { %v4877_v22 = vpop.xlane.xlu1 %4876  ;;  %4403 = vadd.xlane.f32.xlu0 %v4402_v57 }
 0x2ed   : > { %7723 = vpow2.f32 %v4900_v63  ;;  %v4898_v36 = vmul.f32 1.442695, %v4890_v49  ;;  %v4893_v47 = vsub.f32 %v9299_v58, %v4877_v22  ;;  %v10191_v49 = vld [vmem:[#allocation15_spill] sm:$0xff] }
 0x2ee   : > { %v4874_v61 = vpop.xlane.xlu0 %4873 }
 0x2ef   : > { %7725 = vpow2.f32 %v4898_v36  ;;  %v4904_v32 = vmul.f32 1.442695, %v4893_v47  ;;  %v4892_v17 = vsub.f32 %v9306_v23, %v4874_v61 }
 0x2f0   : > { %v4883_v13 = vpop.xlane.xlu1 %4882 }
 0x2f1   : > { %7727 = vpow2.f32 %v4904_v32  ;;  %v4902_v39 = vmul.f32 1.442695, %v4892_v17  ;;  %v4895_v25 = vsub.f32 %v9313_v15, %v4883_v13 }
 0x2f2   : > { %v4880_v19 = vpop.xlane.xlu0 %4879 }
 0x2f3   : > { %7729 = vpow2.f32 %v4902_v39  ;;  %v4908_v21 = vmul.f32 1.442695, %v4895_v25  ;;  %v4894_v46 = vsub.f32 %v10190_v37, %v4880_v19 }
 0x2f4   : > { %v4889_v57 = vpop.xlane.xlu1 %4888 }
 0x2f5   : > { %7731 = vpow2.f32 %v4908_v21  ;;  %v4906_v63 = vmul.f32 1.442695, %v4894_v46  ;;  %v4897_v58 = vsub.f32 %v10191_v49, %v4889_v57 }
 0x2f6   : > { %v4886_v22 = vpop.xlane.xlu0 %4885 }
 0x2f7   : > { %7733 = vpow2.f32 %v4906_v63  ;;  %v4912_v36 = vmul.f32 1.442695, %v4897_v58  ;;  %v4896_v23 = vsub.f32 %v9331_v56, %v4886_v22 }
 0x2f9   : > { %7735 = vpow2.f32 %v4912_v36  ;;  %v4910_v47 = vmul.f32 1.442695, %v4896_v23 }
 0x2fa   : > { %v9637_v61 = vpop.eup %7723  ;;  %v5402_v15 = vpop.xlane.xlu1 %5401 }
 0x2fb   : > { %10192 = vst [vmem:[#allocation16_spill] sm:$0xff] %v9637_v61  ;;  %7737 = vpow2.f32 %v4910_v47  ;;  %v5422_v32 = vsub.f32 %v9340_v34, %v5402_v15  ;;  %v4917_v37 = vsel %vm1801_vm2, %v9637_v61, 0.0 }
 0x2fc   : > { %v9642_v17 = vpop.eup %7725  ;;  %4918 = vadd.xlane.f32.xlu1 %v4917_v37  ;;  %v5399_v13 = vpop.xlane.xlu0 %5398 }
 0x2fd   : > { %10193 = vst [vmem:[#allocation18_spill] sm:$0xff] %v9642_v17  ;;  %v5431_v46 = vmul.f32 1.442695, %v5422_v32  ;;  %v4914_v39 = vsel %vm1801_vm2, %v9642_v17, 0.0  ;;  %v5421_v25 = vsub.f32 %v9347_v59, %v5399_v13 }
 0x2fe   : > { %v9646_v56 = vpop.eup %7727  ;;  %v5408_v19 = vpop.xlane.xlu1 %5407  ;;  %4915 = vadd.xlane.f32.xlu0 %v4914_v39 }
 0x2ff   : > { %10194 = vst [vmem:[#allocation20_spill] sm:$0xff] %v9646_v56  ;;  %7739 = vpow2.f32 %v5431_v46  ;;  %v5424_v34 = vsub.f32 %v9351_v2, %v5408_v19  ;;  %v4923_v21 = vsel %vm1801_vm2, %v9646_v56, 0.0  ;;  %v5429_v63 = vmul.f32 1.442695, %v5421_v25  ;;  %v10197_v2 = vld [vmem:[#allocation32_spill] sm:$0xff] }
 0x300   : > { %v9652_v57 = vpop.eup %7729  ;;  %4924 = vadd.xlane.f32.xlu1 %v4923_v21  ;;  %v5405_v58 = vpop.xlane.xlu0 %5404 }
 0x301   : > { %10195 = vst [vmem:[#allocation23_spill] sm:$0xff] %v9652_v57  ;;  %v5435_v49 = vmul.f32 1.442695, %v5424_v34  ;;  %v4920_v22 = vsel %vm1801_vm2, %v9652_v57, 0.0  ;;  %7741 = vpow2.f32 %v5429_v63  ;;  %v5423_v59 = vsub.f32 %v9361_v0, %v5405_v58  ;;  %v10200_v0 = vld [vmem:[#allocation33_spill] sm:$0xff] }
 0x302   : > { %v9656_v36 = vpop.eup %7731  ;;  %v5414_v23 = vpop.xlane.xlu1 %5413  ;;  %4921 = vadd.xlane.f32.xlu0 %v4920_v22 }
 0x303   : > { %10196 = vst [vmem:[#allocation22_spill] sm:$0xff] %v9656_v36  ;;  %7743 = vpow2.f32 %v5435_v49  ;;  %v5426_v47 = vsub.f32 %v10197_v2, %v5414_v23  ;;  %v4929_v15 = vsel %vm1801_vm2, %v9656_v36, 0.0  ;;  %v5433_v37 = vmul.f32 1.442695, %v5423_v59  ;;  %v10202_v23 = vld [vmem:[#allocation19_spill] sm:$0xff]  ;;  %v10211_v36 = vld [vmem:[#allocation17_spill] sm:$0xff] }
 0x304   : > { %v9662_v32 = vpop.eup %7733  ;;  %4930 = vadd.xlane.f32.xlu1 %v4929_v15  ;;  %v5411_v13 = vpop.xlane.xlu0 %5410 }
 0x305   : > { %10198 = vst [vmem:[#allocation24_spill] sm:$0xff] %v9662_v32  ;;  %v5439_v46 = vmul.f32 1.442695, %v5426_v47  ;;  %v4926_v39 = vsel %vm1801_vm2, %v9662_v32, 0.0  ;;  %7745 = vpow2.f32 %v5433_v37  ;;  %v5425_v19 = vsub.f32 %v10200_v0, %v5411_v13  ;;  %v10204_v13 = vld [vmem:[#allocation35_spill] sm:$0xff] }
 0x306   : > { %v9666_v25 = vpop.eup %7735  ;;  %v2243_v34 = vpop.xlane.xlu1 %2242  ;;  %4927 = vadd.xlane.f32.xlu0 %v4926_v39 }
 0x307   : > { %10199 = vst [vmem:[#allocation25_spill] sm:$0xff] %v9666_v25  ;;  %7747 = vpow2.f32 %v5439_v46  ;;  %v4935_v21 = vsel %vm1801_vm2, %v9666_v25, 0.0  ;;  %v5437_v49 = vmul.f32 1.442695, %v5425_v19 }
 0x308   : > { %v9671_v63 = vpop.eup %7737  ;;  %7749 = vrcp.f32 %v2243_v34  ;;  %4936 = vadd.xlane.f32.xlu1 %v4935_v21  ;;  %v2240_v58 = vpop.xlane.xlu0 %2239 }
 0x309   : > { %10201 = vst [vmem:[#allocation26_spill] sm:$0xff] %v9671_v63  ;;  %v4932_v22 = vsel %vm1801_vm2, %v9671_v63, 0.0  ;;  %7751 = vpow2.f32 %v5437_v49 }
 0x30a   : > { %v5420_v59 = vpop.xlane.xlu1 %5419  ;;  %4933 = vadd.xlane.f32.xlu0 %v4932_v22  ;;  %7753 = vrcp.f32 %v2240_v58 }
 0x30b   : > { %v5428_v2 = vsub.f32 %v10202_v23, %v5420_v59 }
 0x30c   : > { %v9676_v47 = vpop.eup %7739  ;;  %v5417_v37 = vpop.xlane.xlu0 %5416 }
 0x30d   : > { %10203 = vst [vmem:[#allocation27_spill] sm:$0xff] %v9676_v47  ;;  %v5443_v15 = vmul.f32 1.442695, %v5428_v2  ;;  %v5448_v46 = vsel %vm1801_vm2, %v9676_v47, 0.0  ;;  %v5427_v39 = vsub.f32 %v10204_v13, %v5417_v37 }
 0x30e   : > { %5449 = vadd.xlane.f32.xlu1 %v5448_v46  ;;  %v2249_v0 = vpop.xlane.xlu1 %2248  ;;  %v9681_v19 = vpop.eup %7741 }
 0x30f   : > { %10205 = vst [vmem:[#allocation28_spill] sm:$0xff] %v9681_v19  ;;  %7755 = vpow2.f32 %v5443_v15  ;;  %v5441_v49 = vmul.f32 1.442695, %v5427_v39  ;;  %v5445_v22 = vsel %vm1801_vm2, %v9681_v19, 0.0 }
 0x310   : > { %v9683_v21 = vpop.eup %7743  ;;  %7757 = vrcp.f32 %v2249_v0  ;;  %5446 = vadd.xlane.f32.xlu0 %v5445_v22  ;;  %v2246_v59 = vpop.xlane.xlu0 %2245 }
 0x311   : > { %10206 = vst [vmem:[#allocation5_spill] sm:$0xff] %v9683_v21  ;;  %v5454_v23 = vsel %vm1801_vm2, %v9683_v21, 0.0  ;;  %7759 = vpow2.f32 %v5441_v49 }
 0x312   : > { %5455 = vadd.xlane.f32.xlu1 %v5454_v23  ;;  %v2255_v2 = vpop.xlane.xlu1 %2254  ;;  %v9689_v37 = vpop.eup %7745  ;;  %7761 = vrcp.f32 %v2246_v59 }
 0x313   : > { %10207 = vst [vmem:[#allocation7_spill] sm:$0xff] %v9689_v37  ;;  %7763 = vrcp.f32 %v2255_v2  ;;  %v5451_v46 = vsel %vm1801_vm2, %v9689_v37, 0.0 }
 0x314   : > { %v9691_v15 = vpop.eup %7747  ;;  %5452 = vadd.xlane.f32.xlu0 %v5451_v46  ;;  %v2252_v39 = vpop.xlane.xlu0 %2251 }
 0x315   : > { %10208 = vst [vmem:[#allocation6_spill] sm:$0xff] %v9691_v15  ;;  %v7750_v13 = vpop.eup %7749  ;;  %v5460_v22 = vsel %vm1801_vm2, %v9691_v15, 0.0  ;;  %7765 = vrcp.f32 %v2252_v39 }
 0x316   : > { %v2271_v49 = vmul.f32 %v7750_v13, %v2243_v34  ;;  %5461 = vadd.xlane.f32.xlu1 %v5460_v22  ;;  %v2261_v23 = vpop.xlane.xlu1 %2260  ;;  %v9698_v21 = vpop.eup %7751 }
 0x317   : > { %10209 = vst [vmem:[#allocation29_spill] sm:$0xff] %v9698_v21  ;;  %7767 = vrcp.f32 %v2261_v23  ;;  %v7754_v19 = vpop.eup %7753  ;;  %v5457_v37 = vsel %vm1801_vm2, %v9698_v21, 0.0 }
 0x318   : > { %v2279_v47 = vsub.f32 2.0, %v2271_v49  ;;  %v2270_v63 = vmul.f32 %v7754_v19, %v2240_v58  ;;  %5458 = vadd.xlane.f32.xlu0 %v5457_v37  ;;  %v9704_v46 = vpop.xlane.xlu0 %2257 }
 0x319   : > { %7769 = vrcp.f32 %v9704_v46 }
 0x31a   : > { %v2287_v25 = vmul.f32 %v7750_v13, %v2279_v47  ;;  %v5933_v34 = vpop.xlane.xlu1 %5932  ;;  %v2278_v22 = vsub.f32 2.0, %v2270_v63 }
 0x31b   : > { %v5953_v15 = vsub.f32 %v9429_v33, %v5933_v34 }
 0x31c   : > { %v9708_v32 = vpop.eup %7755  ;;  %v2295_v57 = vmul.f32 %v10211_v36, %v2287_v25  ;;  %v2286_v49 = vmul.f32 %v7754_v19, %v2278_v22  ;;  %v5930_v61 = vpop.xlane.xlu0 %5929  ;;  %v10213_v36 = vld [vmem:[#allocation34_spill] sm:$0xff] }
 0x31d   : > { %10210 = vst [vmem:[#allocation9_spill] sm:$0xff] %v9708_v32  ;;  %v7758_v56 = vpop.eup %7757  ;;  %v5962_v17 = vmul.f32 1.442695, %v5953_v15  ;;  %v5466_v58 = vsel %vm1801_vm2, %v9708_v32, 0.0  ;;  %v5952_v33 = vsub.f32 %v9436_v53, %v5930_v61 }
 0x31e   : > { %2303 = vst.msk [vmem:[%s9713_s19 + $0x8] sm:$0xff] %vm1801_vm2, %v2295_v57  ;;  %v2273_v63 = vmul.f32 %v7758_v56, %v2249_v0  ;;  %5467 = vadd.xlane.f32.xlu1 %v5466_v58  ;;  %v5939_v47 = vpop.xlane.xlu1 %5938  ;;  %v9718_v37 = vpop.eup %7759  ;;  %v2294_v25 = vmul.f32 %v10213_v36, %v2286_v49  ;;  %v10214_v36 = vld [vmem:[#allocation21_spill] sm:$0xff] }
 0x31f   : > { %10212 = vst [vmem:[#allocation11_spill] sm:$0xff] %v9718_v37  ;;  %7771 = vpow2.f32 %v5962_v17  ;;  %v5955_v19 = vsub.f32 %v9441_v7, %v5939_v47  ;;  %v7762_v15 = vpop.eup %7761  ;;  %v5960_v34 = vmul.f32 1.442695, %v5952_v33  ;;  %v5463_v22 = vsel %vm1801_vm2, %v9718_v37, 0.0 }
 0x320   : > { %v2281_v13 = vsub.f32 2.0, %v2273_v63  ;;  %v7764_v32 = vpop.eup %7763  ;;  %2302 = vst.msk [vmem:[%s9713_s19] sm:$0xff] %vm1801_vm2, %v2294_v25  ;;  %v2272_v57 = vmul.f32 %v7762_v15, %v2246_v59  ;;  %5464 = vadd.xlane.f32.xlu0 %v5463_v22  ;;  %v5936_v61 = vpop.xlane.xlu0 %5935 }
 0x321   : > { %v5966_v53 = vmul.f32 1.442695, %v5955_v19  ;;  %v2275_v58 = vmul.f32 %v7764_v32, %v2255_v2  ;;  %7773 = vpow2.f32 %v5960_v34  ;;  %v5954_v17 = vsub.f32 %v9448_v31, %v5936_v61 }
 0x322   : > { %v2289_v0 = vmul.f32 %v7758_v56, %v2281_v13  ;;  %v5945_v7 = vpop.xlane.xlu1 %5944  ;;  %v7766_v49 = vpop.eup %7765  ;;  %v2280_v63 = vsub.f32 2.0, %v2272_v57 }
 0x323   : > { %7775 = vpow2.f32 %v5966_v53  ;;  %v5957_v33 = vsub.f32 %v9453_v54, %v5945_v7  ;;  %v2283_v25 = vsub.f32 2.0, %v2275_v58  ;;  %v2274_v59 = vmul.f32 %v7766_v49, %v2252_v39  ;;  %v10215_v53 = vld [vmem:[#allocation36_spill] sm:$0xff] }
 0x324   : > { %v7768_v47 = vpop.eup %7767  ;;  %v2297_v37 = vmul.f32 %v10214_v36, %v2289_v0  ;;  %v5964_v19 = vmul.f32 1.442695, %v5954_v17  ;;  %v2288_v22 = vmul.f32 %v7762_v15, %v2280_v63  ;;  %v5942_v2 = vpop.xlane.xlu0 %5941  ;;  %v10217_v63 = vld [vmem:[#allocation10_spill] sm:$0xff] }
 0x325   : > { %v2277_v21 = vmul.f32 %v7768_v47, %v2261_v23  ;;  %v5970_v56 = vmul.f32 1.442695, %v5957_v33  ;;  %v2291_v31 = vmul.f32 %v7764_v32, %v2283_v25  ;;  %v2282_v13 = vsub.f32 2.0, %v2274_v59  ;;  %v10216_v23 = vld [vmem:[#allocation8_spill] sm:$0xff] }
 0x326   : > { %2305 = vst.msk [vmem:[%s9713_s19 + $0x18] sm:$0xff] %vm1801_vm2, %v2297_v37  ;;  %7777 = vpow2.f32 %v5964_v19  ;;  %v5956_v34 = vsub.f32 %v9461_v30, %v5942_v2  ;;  %v5951_v54 = vpop.xlane.xlu1 %5950  ;;  %v7770_v57 = vpop.eup %7769  ;;  %v2296_v61 = vmul.f32 %v10215_v53, %v2288_v22 }
 0x327   : > { %v2285_v0 = vsub.f32 2.0, %v2277_v21  ;;  %7779 = vpow2.f32 %v5970_v56  ;;  %v5959_v39 = vsub.f32 %v9466_v55, %v5951_v54  ;;  %v2299_v15 = vmul.f32 %v10216_v23, %v2291_v31 }
 0x328   : > { %v2290_v58 = vmul.f32 %v7766_v49, %v2282_v13  ;;  %v2276_v37 = vmul.f32 %v7770_v57, %v9704_v46  ;;  %v5968_v32 = vmul.f32 1.442695, %v5956_v34  ;;  %2304 = vst.msk [vmem:[%s9713_s19 + $0x10] sm:$0xff] %vm1801_vm2, %v2296_v61  ;;  %v5948_v7 = vpop.xlane.xlu0 %5947 }
 0x329   : > { %v2293_v17 = vmul.f32 %v7768_v47, %v2285_v0  ;;  %v5974_v30 = vmul.f32 1.442695, %v5959_v39  ;;  %2307 = vst.msk [vmem:[%s9713_s19 + $0x28] sm:$0xff] %vm1801_vm2, %v2299_v15  ;;  %v5958_v55 = vsub.f32 %v9472_v26, %v5948_v7 }
 0x32a   : > { %v2298_v21 = vmul.f32 %v10217_v63, %v2290_v58  ;;  %v2284_v33 = vsub.f32 2.0, %v2276_v37  ;;  %7781 = vpow2.f32 %v5968_v32  ;;  %v2797_v36 = vpop.xlane.xlu1 %2796 }
 0x32b   : > { %v2301_v49 = vmul.f32 %v9413_v62, %v2293_v17  ;;  %7783 = vpow2.f32 %v5974_v30  ;;  %v5972_v25 = vmul.f32 1.442695, %v5958_v55 }
 0x32c   : > { %v9743_v46 = vpop.eup %7771  ;;  %2306 = vst.msk [vmem:[%s9713_s19 + $0x20] sm:$0xff] %vm1801_vm2, %v2298_v21  ;;  %v2292_v47 = vmul.f32 %v7770_v57, %v2284_v33  ;;  %7785 = vrcp.f32 %v2797_v36  ;;  %v2794_v59 = vpop.xlane.xlu0 %2793 }
 0x32d   : > { %2309 = vst.msk [vmem:[%s9713_s19 + $0x38] sm:$0xff] %vm1801_vm2, %v2301_v49  ;;  %v5979_v19 = vsel %vm1801_vm2, %v9743_v46, 0.0  ;;  %7787 = vpow2.f32 %v5972_v25 }
 0x32e   : > { %v2300_v26 = vmul.f32 %v9424_v10, %v2292_v47  ;;  %5980 = vadd.xlane.f32.xlu1 %v5979_v19  ;;  %v2803_v62 = vpop.xlane.xlu1 %2802  ;;  %v9752_v22 = vpop.eup %7773  ;;  %7789 = vrcp.f32 %v2794_v59 }
 0x32f   : > { %7791 = vrcp.f32 %v2803_v62  ;;  %v5976_v2 = vsel %vm1801_vm2, %v9752_v22, 0.0 }
 0x330   : > { %v9754_v56 = vpop.eup %7775  ;;  %2308 = vst.msk [vmem:[%s9713_s19 + $0x30] sm:$0xff] %vm1801_vm2, %v2300_v26  ;;  %5977 = vadd.xlane.f32.xlu0 %v5976_v2  ;;  %v2800_v31 = vpop.xlane.xlu0 %2799 }
 0x331   : > { %v5985_v13 = vsel %vm1801_vm2, %v9754_v56, 0.0  ;;  %7793 = vrcp.f32 %v2800_v31 }
 0x332   : > { %5986 = vadd.xlane.f32.xlu1 %v5985_v13  ;;  %v2809_v10 = vpop.xlane.xlu1 %2808 }
 0x333   : > { %v9762_v34 = vpop.eup %7777  ;;  %7795 = vrcp.f32 %v2809_v10 }
 0x334   : > { %v9764_v54 = vpop.eup %7779  ;;  %v5982_v57 = vsel %vm1801_vm2, %v9762_v34, 0.0  ;;  %v2806_v53 = vpop.xlane.xlu0 %2805 }
 0x335   : > { %5983 = vadd.xlane.f32.xlu0 %v5982_v57  ;;  %v5991_v61 = vsel %vm1801_vm2, %v9764_v54, 0.0  ;;  %7797 = vrcp.f32 %v2806_v53 }
 0x336   : > { %5992 = vadd.xlane.f32.xlu1 %v5991_v61  ;;  %v2815_v0 = vpop.xlane.xlu1 %2814 }
 0x337   : > { %v9770_v39 = vpop.eup %7781  ;;  %7799 = vrcp.f32 %v2815_v0 }
 0x338   : > { %v9772_v23 = vpop.eup %7783  ;;  %v5988_v15 = vsel %vm1801_vm2, %v9770_v39, 0.0  ;;  %v2812_v37 = vpop.xlane.xlu0 %2811 }
 0x339   : > { %10218 = vst [vmem:[#allocation30_spill] sm:$0xff] %v9772_v23  ;;  %v7786_v58 = vpop.eup %7785  ;;  %5989 = vadd.xlane.f32.xlu0 %v5988_v15  ;;  %v5997_v32 = vsel %vm1801_vm2, %v9772_v23, 0.0  ;;  %7801 = vrcp.f32 %v2812_v37 }
 0x33a   : > { %v2825_v17 = vmul.f32 %v7786_v58, %v2797_v36  ;;  %5998 = vadd.xlane.f32.xlu1 %v5997_v32  ;;  %v3328_v30 = vpop.xlane.xlu1 %3327  ;;  %v9778_v7 = vpop.eup %7787 }
 0x33b   : > { %10219 = vst [vmem:[#allocation31_spill] sm:$0xff] %v9778_v7  ;;  %7803 = vrcp.f32 %v3328_v30  ;;  %v7790_v63 = vpop.eup %7789  ;;  %v5994_v33 = vsel %vm1801_vm2, %v9778_v7, 0.0 }
 0x33c   : > { %v2833_v21 = vsub.f32 2.0, %v2825_v17  ;;  %v7792_v55 = vpop.eup %7791  ;;  %v2824_v49 = vmul.f32 %v7790_v63, %v2794_v59  ;;  %v3325_v47 = vpop.xlane.xlu0 %3324 }
 0x33d   : > { %5995 = vadd.xlane.f32.xlu0 %v5994_v33  ;;  %v2827_v19 = vmul.f32 %v7792_v55, %v2803_v62  ;;  %7805 = vrcp.f32 %v3325_v47 }
 0x33e   : > { %v2841_v25 = vmul.f32 %v7786_v58, %v2833_v21  ;;  %v3334_v36 = vpop.xlane.xlu1 %3333  ;;  %v7794_v26 = vpop.eup %7793  ;;  %v2832_v2 = vsub.f32 2.0, %v2824_v49 }
 0x33f   : > { %7807 = vrcp.f32 %v3334_v36  ;;  %v2835_v61 = vsub.f32 2.0, %v2827_v19  ;;  %v2826_v15 = vmul.f32 %v7794_v26, %v2800_v31 }
 0x340   : > { %v7796_v13 = vpop.eup %7795  ;;  %v2849_v57 = vmul.f32 %v9474_v20, %v2841_v25  ;;  %v2840_v32 = vmul.f32 %v7790_v63, %v2832_v2  ;;  %v3331_v7 = vpop.xlane.xlu0 %3330 }
 0x341   : > { %v2829_v17 = vmul.f32 %v7796_v13, %v2809_v10  ;;  %v2843_v59 = vmul.f32 %v7792_v55, %v2835_v61  ;;  %v2834_v58 = vsub.f32 2.0, %v2826_v15  ;;  %7809 = vrcp.f32 %v3331_v7 }
 0x342   : > { %6387 = vst.msk [vmem:[%s9713_s19 + $0x48] sm:$0xff] %vm1801_vm2, %v2849_v57  ;;  %v3340_v62 = vpop.xlane.xlu1 %3339  ;;  %v7798_v21 = vpop.eup %7797  ;;  %v2848_v33 = vmul.f32 %v9479_v35, %v2840_v32 }
 0x343   : > { %v2837_v49 = vsub.f32 2.0, %v2829_v17  ;;  %7811 = vrcp.f32 %v3340_v62  ;;  %v2851_v20 = vmul.f32 %v9486_v6, %v2843_v59  ;;  %v2842_v31 = vmul.f32 %v7794_v26, %v2834_v58 }
 0x344   : > { %v7800_v23 = vpop.eup %7799  ;;  %v2828_v63 = vmul.f32 %v7798_v21, %v2806_v53  ;;  %6386 = vst.msk [vmem:[%s9713_s19 + $0x40] sm:$0xff] %vm1801_vm2, %v2848_v33  ;;  %v3337_v25 = vpop.xlane.xlu0 %3336 }
 0x345   : > { %v2845_v10 = vmul.f32 %v7796_v13, %v2837_v49  ;;  %v2831_v55 = vmul.f32 %v7800_v23, %v2815_v0  ;;  %6389 = vst.msk [vmem:[%s9713_s19 + $0x58] sm:$0xff] %vm1801_vm2, %v2851_v20  ;;  %v2850_v19 = vmul.f32 %v9489_v40, %v2842_v31  ;;  %7813 = vrcp.f32 %v3337_v25 }
 0x346   : > { %v2836_v2 = vsub.f32 2.0, %v2828_v63  ;;  %v3346_v35 = vpop.xlane.xlu1 %3345  ;;  %v7802_v57 = vpop.eup %7801 }
 0x347   : > { %v2853_v61 = vmul.f32 %v9494_v14, %v2845_v10  ;;  %v2839_v6 = vsub.f32 2.0, %v2831_v55  ;;  %7815 = vrcp.f32 %v3346_v35  ;;  %6388 = vst.msk [vmem:[%s9713_s19 + $0x50] sm:$0xff] %vm1801_vm2, %v2850_v19  ;;  %v2830_v0 = vmul.f32 %v7802_v57, %v2812_v37 }
 0x348   : > { %v7804_v53 = vpop.eup %7803  ;;  %v2844_v26 = vmul.f32 %v7798_v21, %v2836_v2  ;;  %v3343_v40 = vpop.xlane.xlu0 %3342 }
 0x349   : > { %6391 = vst.msk [vmem:[%s9713_s19 + $0x68] sm:$0xff] %vm1801_vm2, %v2853_v61  ;;  %v2847_v13 = vmul.f32 %v7800_v23, %v2839_v6  ;;  %v3356_v15 = vmul.f32 %v7804_v53, %v3328_v30  ;;  %v2838_v17 = vsub.f32 2.0, %v2830_v0  ;;  %7817 = vrcp.f32 %v3343_v40 }
 0x34a   : > { %v2852_v32 = vmul.f32 %v9499_v27, %v2844_v26  ;;  %v7806_v59 = vpop.eup %7805 }
 0x34b   : > { %v2855_v14 = vmul.f32 %v9506_v60, %v2847_v13  ;;  %v3364_v58 = vsub.f32 2.0, %v3356_v15  ;;  %v2846_v21 = vmul.f32 %v7802_v57, %v2838_v17  ;;  %v3355_v37 = vmul.f32 %v7806_v59, %v3325_v47 }
 0x34c   : > { %v7808_v33 = vpop.eup %7807  ;;  %6390 = vst.msk [vmem:[%s9713_s19 + $0x60] sm:$0xff] %vm1801_vm2, %v2852_v32 }
 0x34d   : > { %6393 = vst.msk [vmem:[%s9713_s19 + $0x78] sm:$0xff] %vm1801_vm2, %v2855_v14  ;;  %v3372_v23 = vmul.f32 %v7804_v53, %v3364_v58  ;;  %v3358_v30 = vmul.f32 %v7808_v33, %v3334_v36  ;;  %v2854_v49 = vmul.f32 %v9511_v29, %v2846_v21  ;;  %v3363_v27 = vsub.f32 2.0, %v3355_v37 }
 0x34e   : > { %v7810_v20 = vpop.eup %7809 }
 0x34f   : > { %v3380_v31 = vmul.f32 %v9515_v52, %v3372_v23  ;;  %v3366_v63 = vsub.f32 2.0, %v3358_v30  ;;  %6392 = vst.msk [vmem:[%s9713_s19 + $0x70] sm:$0xff] %vm1801_vm2, %v2854_v49  ;;  %v3371_v10 = vmul.f32 %v7806_v59, %v3363_v27  ;;  %v3357_v55 = vmul.f32 %v7810_v20, %v3331_v7 }
 0x350   : > { %v7812_v60 = vpop.eup %7811 }
 0x351   : > { %6434 = vst.msk [vmem:[%s9713_s19 + $0x88] sm:$0xff] %vm1801_vm2, %v3380_v31  ;;  %v3374_v47 = vmul.f32 %v7808_v33, %v3366_v63  ;;  %v3360_v19 = vmul.f32 %v7812_v60, %v3340_v62  ;;  %v3379_v36 = vmul.f32 %v9519_v8, %v3371_v10  ;;  %v3365_v2 = vsub.f32 2.0, %v3357_v55 }
 0x352   : > { %v7814_v29 = vpop.eup %7813 }
 0x353   : > { %v3382_v57 = vmul.f32 %v9523_v1, %v3374_v47  ;;  %v3368_v61 = vsub.f32 2.0, %v3360_v19  ;;  %6433 = vst.msk [vmem:[%s9713_s19 + $0x80] sm:$0xff] %vm1801_vm2, %v3379_v36  ;;  %v3373_v6 = vmul.f32 %v7810_v20, %v3365_v2  ;;  %v3359_v53 = vmul.f32 %v7814_v29, %v3337_v25 }
 0x354   : > { %v7816_v52 = vpop.eup %7815 }
 0x355   : > { %6436 = vst.msk [vmem:[%s9713_s19 + $0x98] sm:$0xff] %vm1801_vm2, %v3382_v57  ;;  %v3376_v7 = vmul.f32 %v7812_v60, %v3368_v61  ;;  %v3362_v26 = vmul.f32 %v7816_v52, %v3346_v35  ;;  %v3858_v0 = vpop.xlane.xlu1 %3857  ;;  %v3381_v62 = vmul.f32 %v9527_v11, %v3373_v6  ;;  %v3367_v8 = vsub.f32 2.0, %v3359_v53 }
 0x356   : > { %7819 = vrcp.f32 %v3858_v0  ;;  %v7818_v13 = vpop.eup %7817 }
 0x357   : > { %v3384_v1 = vmul.f32 %v9531_v41, %v3376_v7  ;;  %v3370_v15 = vsub.f32 2.0, %v3362_v26  ;;  %v3855_v32 = vpop.xlane.xlu0 %3854  ;;  %6435 = vst.msk [vmem:[%s9713_s19 + $0x90] sm:$0xff] %vm1801_vm2, %v3381_v62  ;;  %v3375_v25 = vmul.f32 %v7814_v29, %v3367_v8  ;;  %v3361_v17 = vmul.f32 %v7818_v13, %v3343_v40 }
 0x358   : > { %7821 = vrcp.f32 %v3855_v32 }
 0x359   : > { %6438 = vst.msk [vmem:[%s9713_s19 + $0xa8] sm:$0xff] %vm1801_vm2, %v3384_v1  ;;  %v3378_v35 = vmul.f32 %v7816_v52, %v3370_v15  ;;  %v3864_v59 = vpop.xlane.xlu1 %3863  ;;  %v3383_v11 = vmul.f32 %v9535_v28, %v3375_v25  ;;  %v3369_v14 = vsub.f32 2.0, %v3361_v17 }
 0x35a   : > { %7823 = vrcp.f32 %v3864_v59 }
 0x35b   : > { %v3386_v58 = vmul.f32 %v9539_v18, %v3378_v35  ;;  %v3861_v41 = vpop.xlane.xlu0 %3860  ;;  %6437 = vst.msk [vmem:[%s9713_s19 + $0xa0] sm:$0xff] %vm1801_vm2, %v3383_v11  ;;  %v3377_v33 = vmul.f32 %v7818_v13, %v3369_v14 }
 0x35c   : > { %7825 = vrcp.f32 %v3861_v41 }
 0x35d   : > { %6440 = vst.msk [vmem:[%s9713_s19 + $0xb8] sm:$0xff] %vm1801_vm2, %v3386_v58  ;;  %v3870_v40 = vpop.xlane.xlu1 %3869  ;;  %v3385_v21 = vmul.f32 %v9545_v51, %v3377_v33 }
 0x35e   : > { %7827 = vrcp.f32 %v3870_v40 }
 0x35f   : > { %v3867_v37 = vpop.xlane.xlu0 %3866  ;;  %6439 = vst.msk [vmem:[%s9713_s19 + $0xb0] sm:$0xff] %vm1801_vm2, %v3385_v21 }
 0x360   : > { %7829 = vrcp.f32 %v3867_v37 }
 0x361   : > { %v3876_v28 = vpop.xlane.xlu1 %3875 }
 0x362   : > { %7831 = vrcp.f32 %v3876_v28 }
 0x363   : > { %v7820_v23 = vpop.eup %7819  ;;  %v3873_v30 = vpop.xlane.xlu0 %3872 }
 0x364   : > { %v3886_v18 = vmul.f32 %v7820_v23, %v3858_v0  ;;  %7833 = vrcp.f32 %v3873_v30 }
 0x365   : > { %v7822_v49 = vpop.eup %7821 }
 0x366   : > { %v3894_v27 = vsub.f32 2.0, %v3886_v18  ;;  %v3885_v20 = vmul.f32 %v7822_v49, %v3855_v32 }
 0x367   : > { %v7824_v31 = vpop.eup %7823  ;;  %v4389_v63 = vpop.xlane.xlu1 %4388 }
 0x368   : > { %v3902_v60 = vmul.f32 %v7820_v23, %v3894_v27  ;;  %v3893_v10 = vsub.f32 2.0, %v3885_v20  ;;  %v3888_v51 = vmul.f32 %v7824_v31, %v3864_v59  ;;  %7835 = vrcp.f32 %v4389_v63 }
 0x369   : > { %v7826_v55 = vpop.eup %7825  ;;  %v4386_v47 = vpop.xlane.xlu0 %4385 }
 0x36a   : > { %v3910_v19 = vmul.f32 %v9557_v45, %v3902_v60  ;;  %v3901_v36 = vmul.f32 %v7822_v49, %v3893_v10  ;;  %v3896_v2 = vsub.f32 2.0, %v3888_v51  ;;  %v3887_v29 = vmul.f32 %v7826_v55, %v3861_v41 }
 0x36b   : > { %v7828_v57 = vpop.eup %7827  ;;  %7837 = vrcp.f32 %v4386_v47  ;;  %v4395_v61 = vpop.xlane.xlu1 %4394 }
 0x36c   : > { %6489 = vst.msk [vmem:[%s9713_s19 + $0xc8] sm:$0xff] %vm1801_vm2, %v3910_v19  ;;  %v3909_v52 = vmul.f32 %v9562_v5, %v3901_v36  ;;  %v3904_v6 = vmul.f32 %v7824_v31, %v3896_v2  ;;  %v3895_v53 = vsub.f32 2.0, %v3887_v29  ;;  %v3890_v7 = vmul.f32 %v7828_v57, %v3870_v40 }
 0x36d   : > { %v7830_v26 = vpop.eup %7829  ;;  %7839 = vrcp.f32 %v4395_v61  ;;  %v4392_v0 = vpop.xlane.xlu0 %4391 }
 0x36e   : > { %6488 = vst.msk [vmem:[%s9713_s19 + $0xc0] sm:$0xff] %vm1801_vm2, %v3909_v52  ;;  %v3912_v45 = vmul.f32 %v9567_v44, %v3904_v6  ;;  %v3903_v62 = vmul.f32 %v7826_v55, %v3895_v53  ;;  %v3898_v8 = vsub.f32 2.0, %v3890_v7  ;;  %v3889_v13 = vmul.f32 %v7830_v26, %v3867_v37 }
 0x36f   : > { %v7832_v1 = vpop.eup %7831  ;;  %7841 = vrcp.f32 %v4392_v0  ;;  %v4401_v15 = vpop.xlane.xlu1 %4400 }
 0x370   : > { %6491 = vst.msk [vmem:[%s9713_s19 + $0xd8] sm:$0xff] %vm1801_vm2, %v3912_v45  ;;  %v3911_v5 = vmul.f32 %v9572_v43, %v3903_v62  ;;  %v3906_v32 = vmul.f32 %v7828_v57, %v3898_v8  ;;  %v3897_v25 = vsub.f32 2.0, %v3889_v13  ;;  %v3892_v17 = vmul.f32 %v7832_v1, %v3876_v28 }
 0x371   : > { %v7834_v35 = vpop.eup %7833  ;;  %7843 = vrcp.f32 %v4401_v15  ;;  %v4398_v59 = vpop.xlane.xlu0 %4397 }
 0x372   : > { %6490 = vst.msk [vmem:[%s9713_s19 + $0xd0] sm:$0xff] %vm1801_vm2, %v3911_v5  ;;  %v3914_v44 = vmul.f32 %v9577_v38, %v3906_v32  ;;  %v3905_v11 = vmul.f32 %v7830_v26, %v3897_v25  ;;  %v3900_v14 = vsub.f32 2.0, %v3892_v17  ;;  %v3891_v58 = vmul.f32 %v7834_v35, %v3873_v30  ;;  %v10220_v32 = vld [vmem:[#allocation12_spill] sm:$0xff] }
 0x373   : > { %7845 = vrcp.f32 %v4398_v59  ;;  %v4407_v41 = vpop.xlane.xlu1 %4406 }
 0x374   : > { %6493 = vst.msk [vmem:[%s9713_s19 + $0xe8] sm:$0xff] %vm1801_vm2, %v3914_v44  ;;  %v3913_v43 = vmul.f32 %v9582_v16, %v3905_v11  ;;  %v3908_v33 = vmul.f32 %v7832_v1, %v3900_v14  ;;  %v3899_v40 = vsub.f32 2.0, %v3891_v58  ;;  %7847 = vrcp.f32 %v4407_v41 }
 0x375   : > { %v7836_v21 = vpop.eup %7835  ;;  %v4404_v37 = vpop.xlane.xlu0 %4403 }
 0x376   : > { %6492 = vst.msk [vmem:[%s9713_s19 + $0xe0] sm:$0xff] %vm1801_vm2, %v3913_v43  ;;  %v3916_v38 = vmul.f32 %v9587_v48, %v3908_v33  ;;  %v3907_v28 = vmul.f32 %v7834_v35, %v3899_v40  ;;  %v4417_v23 = vmul.f32 %v7836_v21, %v4389_v63  ;;  %7849 = vrcp.f32 %v4404_v37 }
 0x378   : > { %v7838_v30 = vpop.eup %7837  ;;  %6495 = vst.msk [vmem:[%s9713_s19 + $0xf8] sm:$0xff] %vm1801_vm2, %v3916_v38  ;;  %v3915_v18 = vmul.f32 %v9592_v24, %v3907_v28  ;;  %v4425_v16 = vsub.f32 2.0, %v4417_v23 }
 0x379   : > { %v4416_v49 = vmul.f32 %v7838_v30, %v4386_v47 }
 0x37a   : > { %v7840_v27 = vpop.eup %7839  ;;  %6494 = vst.msk [vmem:[%s9713_s19 + $0xf0] sm:$0xff] %vm1801_vm2, %v3915_v18  ;;  %v4433_v20 = vmul.f32 %v7836_v21, %v4425_v16  ;;  %v10222_v16 = vld [vmem:[#allocation16_spill] sm:$0xff] }
 0x37b   : > { %v4424_v31 = vsub.f32 2.0, %v4416_v49  ;;  %v4419_v60 = vmul.f32 %v7840_v27, %v4395_v61 }
 0x37c   : > { %v7842_v10 = vpop.eup %7841  ;;  %v4441_v48 = vmul.f32 %v9597_v12, %v4433_v20 }
 0x37d   : > { %v4432_v63 = vmul.f32 %v7838_v30, %v4424_v31  ;;  %v4427_v51 = vsub.f32 2.0, %v4419_v60  ;;  %v4418_v55 = vmul.f32 %v7842_v10, %v4392_v0 }
 0x37e   : > { %v7844_v19 = vpop.eup %7843  ;;  %6536 = vst.msk [vmem:[%s9713_s19 + $0x108] sm:$0xff] %vm1801_vm2, %v4441_v48 }
 0x37f   : > { %v4440_v24 = vmul.f32 %v9601_v9, %v4432_v63  ;;  %v4435_v47 = vmul.f32 %v7840_v27, %v4427_v51  ;;  %v4426_v36 = vsub.f32 2.0, %v4418_v55  ;;  %v4421_v2 = vmul.f32 %v7844_v19, %v4401_v15  ;;  %v10223_v63 = vld [vmem:[#allocation18_spill] sm:$0xff] }
 0x380   : > { %v7846_v29 = vpop.eup %7845 }
 0x381   : > { %v7848_v57 = vpop.eup %7847  ;;  %6535 = vst.msk [vmem:[%s9713_s19 + $0x100] sm:$0xff] %vm1801_vm2, %v4440_v24  ;;  %v4443_v61 = vmul.f32 %v9605_v50, %v4435_v47  ;;  %v4434_v12 = vmul.f32 %v7842_v10, %v4426_v36  ;;  %v4429_v52 = vsub.f32 2.0, %v4421_v2  ;;  %v4420_v6 = vmul.f32 %v7846_v29, %v4398_v59  ;;  %v10224_v36 = vld [vmem:[#allocation20_spill] sm:$0xff] }
 0x382   : > { %v4423_v53 = vmul.f32 %v7848_v57, %v4407_v41 }
 0x383   : > { %v7850_v7 = vpop.eup %7849  ;;  %6538 = vst.msk [vmem:[%s9713_s19 + $0x118] sm:$0xff] %vm1801_vm2, %v4443_v61  ;;  %v4442_v9 = vmul.f32 %v9609_v4, %v4434_v12  ;;  %v4437_v26 = vmul.f32 %v7844_v19, %v4429_v52  ;;  %v4428_v0 = vsub.f32 2.0, %v4420_v6 }
 0x384   : > { %v4431_v45 = vsub.f32 2.0, %v4423_v53  ;;  %v4422_v62 = vmul.f32 %v7850_v7, %v4404_v37  ;;  %v10225_v53 = vld [vmem:[#allocation23_spill] sm:$0xff] }
 0x385   : > { %6537 = vst.msk [vmem:[%s9713_s19 + $0x110] sm:$0xff] %vm1801_vm2, %v4442_v9  ;;  %v4445_v50 = vmul.f32 %v9613_v42, %v4437_v26  ;;  %v4436_v8 = vmul.f32 %v7846_v29, %v4428_v0  ;;  %v4919_v13 = vpop.xlane.xlu1 %4918  ;;  %v10221_v42 = vld [vmem:[#allocation14_spill] sm:$0xff] }
 0x386   : > { %v4439_v1 = vmul.f32 %v7848_v57, %v4431_v45  ;;  %v4430_v15 = vsub.f32 2.0, %v4422_v62  ;;  %7851 = vrcp.f32 %v4919_v13  ;;  %v10226_v62 = vld [vmem:[#allocation22_spill] sm:$0xff] }
 0x387   : > { %6540 = vst.msk [vmem:[%s9713_s19 + $0x128] sm:$0xff] %vm1801_vm2, %v4445_v50  ;;  %v4444_v4 = vmul.f32 %v9617_v3, %v4436_v8  ;;  %v4916_v5 = vpop.xlane.xlu0 %4915 }
 0x388   : > { %v4447_v25 = vmul.f32 %v10220_v32, %v4439_v1  ;;  %v4438_v17 = vmul.f32 %v7850_v7, %v4430_v15  ;;  %7853 = vrcp.f32 %v4916_v5 }
 0x389   : > { %6539 = vst.msk [vmem:[%s9713_s19 + $0x120] sm:$0xff] %vm1801_vm2, %v4444_v4  ;;  %v4925_v35 = vpop.xlane.xlu1 %4924  ;;  %v10227_v4 = vld [vmem:[#allocation24_spill] sm:$0xff] }
 0x38a   : > { %6542 = vst.msk [vmem:[%s9713_s19 + $0x138] sm:$0xff] %vm1801_vm2, %v4447_v25  ;;  %v4446_v59 = vmul.f32 %v10221_v42, %v4438_v17  ;;  %7855 = vrcp.f32 %v4925_v35 }
 0x38b   : > { %v4922_v44 = vpop.xlane.xlu0 %4921 }
 0x38c   : > { %6541 = vst.msk [vmem:[%s9713_s19 + $0x130] sm:$0xff] %vm1801_vm2, %v4446_v59  ;;  %7857 = vrcp.f32 %v4922_v44 }
 0x38d   : > { %v4931_v11 = vpop.xlane.xlu1 %4930 }
 0x38e   : > { %7859 = vrcp.f32 %v4931_v11 }
 0x38f   : > { %v4928_v3 = vpop.xlane.xlu0 %4927 }
 0x390   : > { %7861 = vrcp.f32 %v4928_v3 }
 0x391   : > { %v4937_v14 = vpop.xlane.xlu1 %4936 }
 0x392   : > { %7863 = vrcp.f32 %v4937_v14 }
 0x393   : > { %v7852_v58 = vpop.eup %7851  ;;  %v4934_v41 = vpop.xlane.xlu0 %4933 }
 0x394   : > { %v4947_v43 = vmul.f32 %v7852_v58, %v4919_v13  ;;  %7865 = vrcp.f32 %v4934_v41 }
 0x395   : > { %v7854_v33 = vpop.eup %7853 }
 0x396   : > { %v4955_v40 = vsub.f32 2.0, %v4947_v43  ;;  %v4946_v21 = vmul.f32 %v7854_v33, %v4916_v5 }
 0x397   : > { %v7856_v37 = vpop.eup %7855  ;;  %v5450_v38 = vpop.xlane.xlu1 %5449 }
 0x398   : > { %v4963_v28 = vmul.f32 %v7852_v58, %v4955_v40  ;;  %v4954_v23 = vsub.f32 2.0, %v4946_v21  ;;  %v4949_v30 = vmul.f32 %v7856_v37, %v4925_v35  ;;  %7867 = vrcp.f32 %v5450_v38  ;;  %v10228_v35 = vld [vmem:[#allocation25_spill] sm:$0xff] }
 0x399   : > { %v7858_v18 = vpop.eup %7857  ;;  %v5447_v60 = vpop.xlane.xlu0 %5446 }
 0x39a   : > { %v4971_v49 = vmul.f32 %v10222_v16, %v4963_v28  ;;  %v4962_v27 = vmul.f32 %v7854_v33, %v4954_v23  ;;  %v4957_v20 = vsub.f32 2.0, %v4949_v30  ;;  %v4948_v31 = vmul.f32 %v7858_v18, %v4922_v44  ;;  %v10230_v23 = vld [vmem:[#allocation27_spill] sm:$0xff] }
 0x39b   : > { %v7860_v10 = vpop.eup %7859  ;;  %7869 = vrcp.f32 %v5447_v60  ;;  %v5456_v48 = vpop.xlane.xlu1 %5455 }
 0x39c   : > { %6591 = vst.msk [vmem:[%s9713_s19 + $0x148] sm:$0xff] %vm1801_vm2, %v4971_v49  ;;  %v4970_v51 = vmul.f32 %v10223_v63, %v4962_v27  ;;  %v4965_v55 = vmul.f32 %v7856_v37, %v4957_v20  ;;  %v4956_v19 = vsub.f32 2.0, %v4948_v31  ;;  %v4951_v24 = vmul.f32 %v7860_v10, %v4931_v11  ;;  %v10231_v20 = vld [vmem:[#allocation28_spill] sm:$0xff] }
 0x39d   : > { %v7862_v47 = vpop.eup %7861  ;;  %7871 = vrcp.f32 %v5456_v48  ;;  %v5453_v12 = vpop.xlane.xlu0 %5452 }
 0x39e   : > { %6590 = vst.msk [vmem:[%s9713_s19 + $0x140] sm:$0xff] %vm1801_vm2, %v4970_v51  ;;  %v4973_v2 = vmul.f32 %v10224_v36, %v4965_v55  ;;  %v4964_v29 = vmul.f32 %v7858_v18, %v4956_v19  ;;  %v4959_v57 = vsub.f32 2.0, %v4951_v24  ;;  %v4950_v61 = vmul.f32 %v7862_v47, %v4928_v3  ;;  %v10233_v36 = vld [vmem:[#allocation7_spill] sm:$0xff] }
 0x39f   : > { %v7864_v52 = vpop.eup %7863  ;;  %7873 = vrcp.f32 %v5453_v12  ;;  %v5462_v6 = vpop.xlane.xlu1 %5461 }
 0x3a0   : > { %6593 = vst.msk [vmem:[%s9713_s19 + $0x158] sm:$0xff] %vm1801_vm2, %v4973_v2  ;;  %v4972_v7 = vmul.f32 %v10225_v53, %v4964_v29  ;;  %v4967_v9 = vmul.f32 %v7860_v10, %v4959_v57  ;;  %v4958_v26 = vsub.f32 2.0, %v4950_v61  ;;  %v4953_v0 = vmul.f32 %v7864_v52, %v4937_v14  ;;  %v10229_v14 = vld [vmem:[#allocation26_spill] sm:$0xff] }
 0x3a1   : > { %v7866_v45 = vpop.eup %7865  ;;  %7875 = vrcp.f32 %v5462_v6  ;;  %v5459_v15 = vpop.xlane.xlu0 %5458 }
 0x3a2   : > { %6592 = vst.msk [vmem:[%s9713_s19 + $0x150] sm:$0xff] %vm1801_vm2, %v4972_v7  ;;  %v4975_v50 = vmul.f32 %v10226_v62, %v4967_v9  ;;  %v4966_v8 = vmul.f32 %v7862_v47, %v4958_v26  ;;  %v4961_v13 = vsub.f32 2.0, %v4953_v0  ;;  %v4952_v1 = vmul.f32 %v7866_v45, %v4934_v41  ;;  %v10235_v7 = vld [vmem:[#allocation29_spill] sm:$0xff] }
 0x3a3   : > { %7877 = vrcp.f32 %v5459_v15 }
 0x3a4   : > { %6595 = vst.msk [vmem:[%s9713_s19 + $0x168] sm:$0xff] %vm1801_vm2, %v4975_v50  ;;  %v4974_v5 = vmul.f32 %v10227_v4, %v4966_v8  ;;  %v4969_v32 = vmul.f32 %v7864_v52, %v4961_v13  ;;  %v4960_v25 = vsub.f32 2.0, %v4952_v1 }
 0x3a5   : > { %v7868_v17 = vpop.eup %7867 }
 0x3a6   : > { %6594 = vst.msk [vmem:[%s9713_s19 + $0x160] sm:$0xff] %vm1801_vm2, %v4974_v5  ;;  %v4977_v42 = vmul.f32 %v10228_v35, %v4969_v32  ;;  %v4968_v59 = vmul.f32 %v7866_v45, %v4960_v25  ;;  %v5478_v44 = vmul.f32 %v7868_v17, %v5450_v38  ;;  %v10237_v25 = vld [vmem:[#allocation11_spill] sm:$0xff] }
 0x3a7   : > { %v5468_v11 = vpop.xlane.xlu1 %5467 }
 0x3a8   : > { %v7870_v3 = vpop.eup %7869  ;;  %6597 = vst.msk [vmem:[%s9713_s19 + $0x178] sm:$0xff] %vm1801_vm2, %v4977_v42  ;;  %v4976_v58 = vmul.f32 %v10229_v14, %v4968_v59  ;;  %v5486_v41 = vsub.f32 2.0, %v5478_v44  ;;  %7879 = vrcp.f32 %v5468_v11 }
 0x3a9   : > { %v5477_v43 = vmul.f32 %v7870_v3, %v5447_v60  ;;  %v5465_v21 = vpop.xlane.xlu0 %5464 }
 0x3aa   : > { %v7872_v33 = vpop.eup %7871  ;;  %6596 = vst.msk [vmem:[%s9713_s19 + $0x170] sm:$0xff] %vm1801_vm2, %v4976_v58  ;;  %v5494_v40 = vmul.f32 %v7868_v17, %v5486_v41  ;;  %7881 = vrcp.f32 %v5465_v21 }
 0x3ab   : > { %v5485_v37 = vsub.f32 2.0, %v5477_v43  ;;  %v5480_v28 = vmul.f32 %v7872_v33, %v5456_v48  ;;  %v10232_v48 = vld [vmem:[#allocation5_spill] sm:$0xff] }
 0x3ac   : > { %v7874_v38 = vpop.eup %7873  ;;  %v5502_v30 = vmul.f32 %v10230_v23, %v5494_v40 }
 0x3ad   : > { %v5493_v18 = vmul.f32 %v7870_v3, %v5485_v37  ;;  %v5488_v16 = vsub.f32 2.0, %v5480_v28  ;;  %v5479_v49 = vmul.f32 %v7874_v38, %v5453_v12  ;;  %v10234_v12 = vld [vmem:[#allocation6_spill] sm:$0xff] }
 0x3ae   : > { %v7876_v27 = vpop.eup %7875  ;;  %6638 = vst.msk [vmem:[%s9713_s19 + $0x188] sm:$0xff] %vm1801_vm2, %v5502_v30 }
 0x3af   : > { %v5501_v31 = vmul.f32 %v10231_v20, %v5493_v18  ;;  %v5496_v60 = vmul.f32 %v7872_v33, %v5488_v16  ;;  %v5487_v10 = vsub.f32 2.0, %v5479_v49  ;;  %v5482_v63 = vmul.f32 %v7876_v27, %v5462_v6 }
 0x3b0   : > { %v7878_v51 = vpop.eup %7877 }
 0x3b1   : > { %6637 = vst.msk [vmem:[%s9713_s19 + $0x180] sm:$0xff] %vm1801_vm2, %v5501_v31  ;;  %v5504_v55 = vmul.f32 %v10232_v48, %v5496_v60  ;;  %v5495_v19 = vmul.f32 %v7874_v38, %v5487_v10  ;;  %v5490_v24 = vsub.f32 2.0, %v5482_v63  ;;  %v5481_v47 = vmul.f32 %v7878_v51, %v5459_v15  ;;  %v10236_v15 = vld [vmem:[#allocation9_spill] sm:$0xff] }
 0x3b3   : > { %6640 = vst.msk [vmem:[%s9713_s19 + $0x198] sm:$0xff] %vm1801_vm2, %v5504_v55  ;;  %v5503_v2 = vmul.f32 %v10233_v36, %v5495_v19  ;;  %v5498_v29 = vmul.f32 %v7876_v27, %v5490_v24  ;;  %v5489_v57 = vsub.f32 2.0, %v5481_v47 }
 0x3b5   : > { %v7880_v61 = vpop.eup %7879  ;;  %6639 = vst.msk [vmem:[%s9713_s19 + $0x190] sm:$0xff] %vm1801_vm2, %v5503_v2  ;;  %v5506_v52 = vmul.f32 %v10234_v12, %v5498_v29  ;;  %v5497_v6 = vmul.f32 %v7878_v51, %v5489_v57 }
 0x3b6   : > { %v5484_v53 = vmul.f32 %v7880_v61, %v5468_v11 }
 0x3b7   : > { %6642 = vst.msk [vmem:[%s9713_s19 + $0x1a8] sm:$0xff] %vm1801_vm2, %v5506_v52  ;;  %v5505_v9 = vmul.f32 %v10235_v7, %v5497_v6  ;;  %v5981_v26 = vpop.xlane.xlu1 %5980  ;;  %v7882_v0 = vpop.eup %7881  ;;  %v10239_v52 = vld [vmem:[#allocation31_spill] sm:$0xff] }
 0x3b8   : > { %v5492_v45 = vsub.f32 2.0, %v5484_v53  ;;  %7883 = vrcp.f32 %v5981_v26  ;;  %v5483_v62 = vmul.f32 %v7882_v0, %v5465_v21 }
 0x3b9   : > { %6641 = vst.msk [vmem:[%s9713_s19 + $0x1a0] sm:$0xff] %vm1801_vm2, %v5505_v9  ;;  %v5978_v8 = vpop.xlane.xlu0 %5977 }
 0x3ba   : > { %v5500_v50 = vmul.f32 %v7880_v61, %v5492_v45  ;;  %v5491_v13 = vsub.f32 2.0, %v5483_v62  ;;  %7885 = vrcp.f32 %v5978_v8 }
 0x3bb   : > { %v5987_v1 = vpop.xlane.xlu1 %5986 }
 0x3bc   : > { %v5508_v4 = vmul.f32 %v10236_v15, %v5500_v50  ;;  %7887 = vrcp.f32 %v5987_v1  ;;  %v5499_v5 = vmul.f32 %v7882_v0, %v5491_v13 }
 0x3be   : > { %6644 = vst.msk [vmem:[%s9713_s19 + $0x1b8] sm:$0xff] %vm1801_vm2, %v5508_v4  ;;  %v5984_v32 = vpop.xlane.xlu0 %5983  ;;  %v5507_v17 = vmul.f32 %v10237_v25, %v5499_v5 }
 0x3bf   : > { %7889 = vrcp.f32 %v5984_v32  ;;  %v5993_v35 = vpop.xlane.xlu1 %5992 }
 0x3c0   : > { %7891 = vrcp.f32 %v5993_v35  ;;  %6643 = vst.msk [vmem:[%s9713_s19 + $0x1b0] sm:$0xff] %vm1801_vm2, %v5507_v17 }
 0x3c2   : > { %v5990_v42 = vpop.xlane.xlu0 %5989 }
 0x3c3   : > { %7893 = vrcp.f32 %v5990_v42  ;;  %v5999_v59 = vpop.xlane.xlu1 %5998 }
 0x3c4   : > { %7895 = vrcp.f32 %v5999_v59 }
 0x3c5   : > { %v7884_v44 = vpop.eup %7883 }
 0x3c6   : > { %v6009_v11 = vmul.f32 %v7884_v44, %v5981_v26  ;;  %v5996_v3 = vpop.xlane.xlu0 %5995 }
 0x3c7   : > { %7897 = vrcp.f32 %v5996_v3  ;;  %v7886_v14 = vpop.eup %7885 }
 0x3c8   : > { %v6017_v58 = vsub.f32 2.0, %v6009_v11  ;;  %v6008_v43 = vmul.f32 %v7886_v14, %v5978_v8 }
 0x3c9   : > { %v7888_v41 = vpop.eup %7887 }
 0x3ca   : > { %v6025_v33 = vmul.f32 %v7884_v44, %v6017_v58  ;;  %v6011_v40 = vmul.f32 %v7888_v41, %v5987_v1  ;;  %v6016_v21 = vsub.f32 2.0, %v6008_v43 }
 0x3cc   : > { %v7890_v37 = vpop.eup %7889  ;;  %v6033_v28 = vmul.f32 %v9743_v46, %v6025_v33  ;;  %v6019_v38 = vsub.f32 2.0, %v6011_v40  ;;  %v6024_v30 = vmul.f32 %v7886_v14, %v6016_v21 }
 0x3cd   : > { %v7892_v23 = vpop.eup %7891  ;;  %v6010_v18 = vmul.f32 %v7890_v37, %v5984_v32 }
 0x3ce   : > { %6693 = vst.msk [vmem:[%s9713_s19 + $0x1c8] sm:$0xff] %vm1801_vm2, %v6033_v28  ;;  %v6027_v16 = vmul.f32 %v7888_v41, %v6019_v38  ;;  %v6013_v49 = vmul.f32 %v7892_v23, %v5993_v35  ;;  %v6032_v27 = vmul.f32 %v9752_v22, %v6024_v30 }
 0x3cf   : > { %v6018_v20 = vsub.f32 2.0, %v6010_v18 }
 0x3d0   : > { %v7894_v31 = vpop.eup %7893  ;;  %v6035_v60 = vmul.f32 %v9754_v56, %v6027_v16  ;;  %v6021_v10 = vsub.f32 2.0, %v6013_v49  ;;  %6692 = vst.msk [vmem:[%s9713_s19 + $0x1c0] sm:$0xff] %vm1801_vm2, %v6032_v27 }
 0x3d1   : > { %v7896_v63 = vpop.eup %7895  ;;  %v6026_v46 = vmul.f32 %v7890_v37, %v6018_v20  ;;  %v6012_v51 = vmul.f32 %v7894_v31, %v5990_v42 }
 0x3d2   : > { %6695 = vst.msk [vmem:[%s9713_s19 + $0x1d8] sm:$0xff] %vm1801_vm2, %v6035_v60  ;;  %v6029_v48 = vmul.f32 %v7892_v23, %v6021_v10  ;;  %v6015_v55 = vmul.f32 %v7896_v63, %v5999_v59 }
 0x3d3   : > { %v6034_v22 = vmul.f32 %v9762_v34, %v6026_v46  ;;  %v6020_v19 = vsub.f32 2.0, %v6012_v51  ;;  %v10238_v34 = vld [vmem:[#allocation30_spill] sm:$0xff] }
 0x3d4   : > { %v7898_v24 = vpop.eup %7897  ;;  %v6037_v56 = vmul.f32 %v9764_v54, %v6029_v48  ;;  %v6023_v47 = vsub.f32 2.0, %v6015_v55 }
 0x3d5   : > { %6694 = vst.msk [vmem:[%s9713_s19 + $0x1d0] sm:$0xff] %vm1801_vm2, %v6034_v22  ;;  %v6028_v36 = vmul.f32 %v7894_v31, %v6020_v19  ;;  %v6014_v2 = vmul.f32 %v7898_v24, %v5996_v3 }
 0x3d6   : > { %6697 = vst.msk [vmem:[%s9713_s19 + $0x1e8] sm:$0xff] %vm1801_vm2, %v6037_v56  ;;  %v6031_v29 = vmul.f32 %v7896_v63, %v6023_v47 }
 0x3d7   : > { %v6036_v57 = vmul.f32 %v9770_v39, %v6028_v36  ;;  %v6022_v61 = vsub.f32 2.0, %v6014_v2 }
 0x3d8   : > { %v6039_v12 = vmul.f32 %v10238_v34, %v6031_v29 }
 0x3d9   : > { %6696 = vst.msk [vmem:[%s9713_s19 + $0x1e0] sm:$0xff] %vm1801_vm2, %v6036_v57  ;;  %v6030_v54 = vmul.f32 %v7898_v24, %v6022_v61 }
 0x3da   : > { %6699 = vst.msk [vmem:[%s9713_s19 + $0x1f8] sm:$0xff] %vm1801_vm2, %v6039_v12 }
 0x3db   : > { %v6038_v39 = vmul.f32 %v10239_v52, %v6030_v54 }
 0x3dd   : > { %6698 = vst.msk [vmem:[%s9713_s19 + $0x1f0] sm:$0xff] %vm1801_vm2, %v6038_v39 }
 0x3de   : > { %7912 = shalt.err (!%p7909_p5)
}
 0x3df   : > { %s7913_s16 = scalar_lea.hbm %s9952_s30, 8192  ;;  %s7917_s19 = scalar_lea.hbm %s10013_s7, 16384 }
 0x3e0   : > { %p7914_p6 = scmp.ne.s32.totalorder %s9952_s30, %s7913_s16  ;;  %p7918_p10 = scmp.lt.s32.totalorder %s9952_s30, %s10013_s7 }
 0x3e1   : > { %p7919_p11 = scmp.lt.s32.totalorder %s7917_s19, %s7913_s16 }
 0x3e2   : > { %p7915_p7 = pnand %p7914_p6, %p8060_p4 }
 0x3e3   : > { %p7920_p12 = por %p7919_p11, %p7918_p10 }
 0x3e4   : > { %p7916_p9 = pneg %p7915_p7 }
 0x3e6   : > { %p7921_p13 = pnand %p7920_p12, %p7916_p9 }
 0x3e8   : > { %7924 = shalt.err (!%p7921_p13)
}
 0x3e9   : > { %s7978_s22 = smov 128   ;;  %s7979_s8 = smov 8  }
 0x3ea   : > { %7586 = dma.vmem_to_hbm [thread:$0]  (%p8060_p4), %s9954_s21, 8192, %s9952_s30, %s9961_s27, %s7978_s22, %s7978_s22, %s7979_s8  }
 0x3eb PF: > { %p7592_p0 = scmp.ge.s32.totalorder %s7975_s29, 2  ;;  %s6080_s10 = sand.u32 1, %s7955_s24  }
 0x3ec   : > { %s6081_s15 = scalar_lea.sflag [#allocation3], %s6080_s10 }
 0x3ed   : > { %p7589_p1 = pnand %p7592_p0, %p8067_p8 }
 0x3ef   : > { %p7590_p2 = pneg %p7589_p1 }
 0x3f1   : > { %7950 = dma.done.wait (%p7590_p2), %s6081_s15, 8192  }
 0x3f2   : > { %7952 = vsyncadd (%p7590_p2), %s6081_s15, 4294959104  ;;  %s20_s29 = sadd.s32 1, %s7975_s29   ;;  %s10240_s24 = smov %s7959_s25 }
 0x3f3   : > { %p17_p3 = scmp.ge.s32.totalorder %s20_s29, 4   ;;  %s10241_s25 = smov %s7963_s26 }
 0x3f4   : > { %s10242_s26 = smov %s8073_s14  ;;  %s10243_s27 = smov %s7971_s28 }
 0x3f5   : > { %s10244_s28 = smov %s10246_s9  ;;  %19 = sbr.rel (!%p17_p3) target bundleno = 4 (0x4), region = 110 }
 0x3fa   :  { %6086 = vsyncpa [#allocation3], 1 }
 0x3fb   :  { %6088 = vsyncpa [#allocation3 + $0x1], 1 }

</bundles_post_ra>
